<compile_context>
chip_gen: v7x
topology: tpu7x:2x2x1
jax: 0.10.0
libtpu: 0.0.40
codegen_flags: <defaults>
</compile_context>

<pallas_src>
import jax
import jax.numpy as jnp
import numpy as np
from jax.experimental import pallas as pl
from jax.experimental.pallas import tpu as pltpu

LN_EPS = 1e-5


# ----------------------------------------------------------------------------- kernel
def twinq_kernel(obs_ref, act_ref, w1o_ref, w1a_ref, w2_ref, w3_ref, p_ref, out_ref):
    obs = obs_ref[...]                      # (TB, obs_dim) f32
    act = act_ref[...]                      # (TB, act_dim) f32
    P = p_ref[...]                          # (11, 2H) packed per-head vectors
    H2 = P.shape[-1]
    H = H2 // 2
    TB = obs.shape[0]

    # segment mask over the fused head axis: False -> Q1 half, True -> Q2 half
    seg = jax.lax.broadcasted_iota(jnp.int32, (TB, H2), 1) >= H
    inv_h = 1.0 / H

    def ln_per_head(h, gamma, beta):
        # Per-head LayerNorm on the fused (TB, 2H) layout via masked reductions
        # (XLU lane reduces are nearly free next to the MXU/VPU work).
        s1 = jnp.sum(jnp.where(seg, 0.0, h), axis=-1, keepdims=True) * inv_h
        s2 = jnp.sum(jnp.where(seg, h, 0.0), axis=-1, keepdims=True) * inv_h
        mean = jnp.where(seg, s2, s1)
        c = h - mean
        cc = c * c
        v1 = jnp.sum(jnp.where(seg, 0.0, cc), axis=-1, keepdims=True) * inv_h
        v2 = jnp.sum(jnp.where(seg, cc, 0.0), axis=-1, keepdims=True) * inv_h
        var = jnp.where(seg, v2, v1)
        return c * jax.lax.rsqrt(var + LN_EPS) * gamma + beta

    def mish(x):
        # mish(x) = x * tanh(softplus(x)); tanh(log1p(t)) == (t^2+2t)/(t^2+2t+2)
        xs = jnp.minimum(x, 20.0)
        t = jnp.exp(xs)
        num = t * t + 2.0 * t
        r = num / (num + 2.0)
        return jnp.where(x > 20.0, x, x * r)

    # Layer 1: fused heads, concat folded in as two matmuls (obs + act parts).
    h = (jnp.dot(obs, w1o_ref[...], preferred_element_type=jnp.float32)
         + jnp.dot(act, w1a_ref[...], preferred_element_type=jnp.float32)
         + P[0:1])                                               # + b1
    h = jnp.tanh(ln_per_head(h, P[1:2], P[2:3]))

    # Layer 2: block-diagonal fused matmul.
    h = jnp.dot(h, w2_ref[...], preferred_element_type=jnp.float32) + P[3:4]
    h = mish(ln_per_head(h, P[4:5], P[5:6]))

    # Layer 3: block-diagonal fused matmul.
    h = jnp.dot(h, w3_ref[...], preferred_element_type=jnp.float32) + P[6:7]
    h = mish(ln_per_head(h, P[7:8], P[8:9]))

    # Head (N=1): VPU multiply + lane reduce instead of an MXU matmul.
    # P[10] holds b4/H broadcast per head, so the masked sums include the bias.
    p = h * P[9:10] + P[10:11]
    q1 = jnp.sum(jnp.where(seg, 0.0, p), axis=-1)                # (TB,)
    q2 = jnp.sum(jnp.where(seg, p, 0.0), axis=-1)                # (TB,)
    out_ref[...] = jnp.minimum(q1, q2).reshape(1, TB)            # lane-dense store


# ----------------------------------------------------------------------------- params
def init_twinq_params(key, obs_dim, act_dim, hidden_dim):
    """Synthetic per-head (PyTorch-layout) params, stacked on a leading axis of 2."""
    in_dim = obs_dim + act_dim
    keys = jax.random.split(key, 8)

    def w(k, shape, fan_in):
        bound = 1.0 / np.sqrt(fan_in)
        return jax.random.uniform(k, shape, jnp.float32, -bound, bound)

    return dict(
        w1=w(keys[0], (2, in_dim, hidden_dim), in_dim),
        b1=w(keys[1], (2, hidden_dim), in_dim),
        g1=jnp.ones((2, hidden_dim), jnp.float32),
        be1=jnp.zeros((2, hidden_dim), jnp.float32),
        w2=w(keys[2], (2, hidden_dim, hidden_dim), hidden_dim),
        b2=w(keys[3], (2, hidden_dim), hidden_dim),
        g2=jnp.ones((2, hidden_dim), jnp.float32),
        be2=jnp.zeros((2, hidden_dim), jnp.float32),
        w3=w(keys[4], (2, hidden_dim, hidden_dim), hidden_dim),
        b3=w(keys[5], (2, hidden_dim), hidden_dim),
        g3=jnp.ones((2, hidden_dim), jnp.float32),
        be3=jnp.zeros((2, hidden_dim), jnp.float32),
        w4=w(keys[6], (2, hidden_dim, 1), hidden_dim),
        b4=w(keys[7], (2, 1), hidden_dim),
    )


def pack_twinq_params(params, obs_dim):
    """Pack per-head params into the fused kernel operands (done once, outside the kernel)."""
    H = params["w1"].shape[-1]
    H2 = 2 * H

    w1_fused = jnp.concatenate([params["w1"][0], params["w1"][1]], axis=1)  # (in_dim, 2H)
    w1_obs = w1_fused[:obs_dim]
    w1_act = w1_fused[obs_dim:]

    def block_diag(w):  # w: (2, H, H) -> (2H, 2H)
        bd = jnp.zeros((H2, H2), jnp.float32)
        bd = bd.at[:H, :H].set(w[0])
        bd = bd.at[H:, H:].set(w[1])
        return bd

    w2_bd = block_diag(params["w2"])
    w3_bd = block_diag(params["w3"])

    rows = [
        params["b1"].reshape(-1), params["g1"].reshape(-1), params["be1"].reshape(-1),
        params["b2"].reshape(-1), params["g2"].reshape(-1), params["be2"].reshape(-1),
        params["b3"].reshape(-1), params["g3"].reshape(-1), params["be3"].reshape(-1),
        params["w4"].reshape(-1),                              # [w4_q1; w4_q2]
        jnp.repeat(params["b4"].reshape(2), H) / float(H),     # b4/H broadcast per head
    ]
    pparams = jnp.stack(rows, axis=0).astype(jnp.float32)      # (11, 2H)

    return dict(w1_obs=w1_obs, w1_act=w1_act, w2_bd=w2_bd, w3_bd=w3_bd, pparams=pparams)


# ----------------------------------------------------------------------------- wrapper
def twinq_forward(obs, act, packed, *, block_b=None):
    obs = obs.astype(jnp.float32)
    act = act.astype(jnp.float32)
    B, obs_dim = obs.shape
    act_dim = act.shape[1]
    H2 = packed["pparams"].shape[-1]

    TB = block_b if block_b is not None else (256 if B >= 512 else 128)
    B_pad = ((B + TB - 1) // TB) * TB
    if B_pad != B:
        obs = jnp.pad(obs, ((0, B_pad - B), (0, 0)))
        act = jnp.pad(act, ((0, B_pad - B), (0, 0)))
    nb = B_pad // TB

    out = pl.pallas_call(
        twinq_kernel,
        out_shape=jax.ShapeDtypeStruct((1, B_pad), jnp.float32),
        grid=(nb,),
        in_specs=[
            pl.BlockSpec((TB, obs_dim), lambda i: (i, 0)),        # obs tile (pipelined)
            pl.BlockSpec((TB, act_dim), lambda i: (i, 0)),        # act tile (pipelined)
            pl.BlockSpec((obs_dim, H2), lambda i: (0, 0)),        # VMEM-resident weights
            pl.BlockSpec((act_dim, H2), lambda i: (0, 0)),
            pl.BlockSpec((H2, H2), lambda i: (0, 0)),
            pl.BlockSpec((H2, H2), lambda i: (0, 0)),
            pl.BlockSpec((11, H2), lambda i: (0, 0)),
        ],
        out_specs=pl.BlockSpec((1, TB), lambda i: (0, i)),        # lane-dense output
        compiler_params=pltpu.CompilerParams(
            dimension_semantics=("parallel",)),                   # 2x on v7x megacore
    )(obs, act, packed["w1_obs"], packed["w1_act"],
      packed["w2_bd"], packed["w3_bd"], packed["pparams"])

    return out[0, :B].reshape(B, 1)


# ----------------------------------------------------------------------------- reference
def twinq_forward_ref(obs, act, params):
    """Pure-JAX reference, faithful to the PyTorch module (per-head, standard mish)."""
    x = jnp.concatenate([obs, act], axis=-1).astype(jnp.float32)

    def layernorm(h, gamma, beta):
        mean = jnp.mean(h, axis=-1, keepdims=True)
        var = jnp.mean((h - mean) ** 2, axis=-1, keepdims=True)
        return (h - mean) * jax.lax.rsqrt(var + LN_EPS) * gamma + beta

    def mish(x):
        sp = jnp.where(x > 20.0, x, jnp.log1p(jnp.exp(jnp.minimum(x, 20.0))))
        return x * jnp.tanh(sp)

    def one_q(q):
        h = x @ params["w1"][q] + params["b1"][q]
        h = jnp.tanh(layernorm(h, params["g1"][q], params["be1"][q]))
        h = h @ params["w2"][q] + params["b2"][q]
        h = mish(layernorm(h, params["g2"][q], params["be2"][q]))
        h = h @ params["w3"][q] + params["b3"][q]
        h = mish(layernorm(h, params["g3"][q], params["be3"][q]))
        return h @ params["w4"][q] + params["b4"][q]

    return jnp.minimum(one_q(0), one_q(1))


# ----------------------------------------------------------------------------- main
if __name__ == "__main__":
    obs_dim, act_dim, hidden_dim = 11, 5, 32
    batch = 8

    key = jax.random.PRNGKey(0)
    k_obs, k_act, k_par = jax.random.split(key, 3)
    obs = jax.random.normal(k_obs, (batch, obs_dim), jnp.float32)
    act = jax.random.normal(k_act, (batch, act_dim), jnp.float32)
    params = init_twinq_params(k_par, obs_dim, act_dim, hidden_dim)
    packed = pack_twinq_params(params, obs_dim)

    out = jax.block_until_ready(twinq_forward(obs, act, packed))
    ref = jax.block_until_ready(twinq_forward_ref(obs, act, params))

    assert out.shape == (batch, 1)
    # Slightly relaxed vs 1e-5: single-exp mish + fused/block-diag accumulation
    # order differ from the reference path at the ~1e-6 level.
    np.testing.assert_allclose(np.asarray(out), np.asarray(ref), rtol=1e-4, atol=2e-5)

    print("KERNEL_OK")
</pallas_src>

<mosaic_0001>
module attributes {stable_mosaic.version = 11 : i64} {
  func.func @twinq_kernel(%arg0: i32, %arg1: memref<128x11xf32, #tpu.memory_space<vmem>>, %arg2: memref<128x5xf32, #tpu.memory_space<vmem>>, %arg3: memref<11x64xf32, #tpu.memory_space<vmem>>, %arg4: memref<5x64xf32, #tpu.memory_space<vmem>>, %arg5: memref<64x64xf32, #tpu.memory_space<vmem>>, %arg6: memref<64x64xf32, #tpu.memory_space<vmem>>, %arg7: memref<11x64xf32, #tpu.memory_space<vmem>>, %arg8: memref<1x128xf32, #tpu.memory_space<vmem>>) attributes {dimension_semantics = [#tpu.dimension_semantics<parallel>], iteration_bounds = array<i64: 1>, scalar_prefetch = 0 : i64, scratch_operands = 0 : i64, tpu.core_type = #tpu.core_type<tc>, window_params = [{transform_indices = @transform_0, window_bounds = array<i64: 128, 11>}, {transform_indices = @transform_1, window_bounds = array<i64: 128, 5>}, {pipeline_mode = #tpu.pipeline_mode<synchronous>, transform_indices = @transform_2, window_bounds = array<i64: 11, 64>}, {pipeline_mode = #tpu.pipeline_mode<synchronous>, transform_indices = @transform_3, window_bounds = array<i64: 5, 64>}, {pipeline_mode = #tpu.pipeline_mode<synchronous>, transform_indices = @transform_4, window_bounds = array<i64: 64, 64>}, {pipeline_mode = #tpu.pipeline_mode<synchronous>, transform_indices = @transform_5, window_bounds = array<i64: 64, 64>}, {pipeline_mode = #tpu.pipeline_mode<synchronous>, transform_indices = @transform_6, window_bounds = array<i64: 11, 64>}, {transform_indices = @transform_7, window_bounds = array<i64: 1, 128>}]} {
    %c0 = arith.constant 0 : index
    %c0_0 = arith.constant 0 : index
    %0 = vector.load %arg1[%c0, %c0_0] : memref<128x11xf32, #tpu.memory_space<vmem>>, vector<128x11xf32>
    %c0_1 = arith.constant 0 : index
    %c0_2 = arith.constant 0 : index
    %1 = vector.load %arg2[%c0_1, %c0_2] : memref<128x5xf32, #tpu.memory_space<vmem>>, vector<128x5xf32>
    %c0_3 = arith.constant 0 : index
    %c0_4 = arith.constant 0 : index
    %2 = vector.load %arg7[%c0_3, %c0_4] : memref<11x64xf32, #tpu.memory_space<vmem>>, vector<11x64xf32>
    %3 = tpu.iota {dimensions = array<i32: 1>} : vector<128x64xi32>
    %c32_i32 = arith.constant 32 : i32
    %4 = vector.broadcast %c32_i32 : i32 to vector<128x64xi32>
    %5 = arith.cmpi sge, %3, %4 : vector<128x64xi32>
    %c0_5 = arith.constant 0 : index
    %c0_6 = arith.constant 0 : index
    %6 = vector.load %arg3[%c0_5, %c0_6] : memref<11x64xf32, #tpu.memory_space<vmem>>, vector<11x64xf32>
    %cst = arith.constant dense<0.000000e+00> : vector<128x64xf32>
    %7 = tpu.matmul %0, %6, %cst {dimension_numbers = #tpu.dot_dimension_numbers<[1], [0], [0], [1], [0, 0, 1, 1], [], []>} : vector<128x11xf32>, vector<11x64xf32>, vector<128x64xf32> -> vector<128x64xf32>
    %c0_7 = arith.constant 0 : index
    %c0_8 = arith.constant 0 : index
    %8 = vector.load %arg4[%c0_7, %c0_8] : memref<5x64xf32, #tpu.memory_space<vmem>>, vector<5x64xf32>
    %cst_9 = arith.constant dense<0.000000e+00> : vector<128x64xf32>
    %9 = tpu.matmul %1, %8, %cst_9 {dimension_numbers = #tpu.dot_dimension_numbers<[1], [0], [0], [1], [0, 0, 1, 1], [], []>} : vector<128x5xf32>, vector<5x64xf32>, vector<128x64xf32> -> vector<128x64xf32>
    %10 = arith.addf %7, %9 : vector<128x64xf32>
    %11 = vector.extract_strided_slice %2 {offsets = [0, 0], sizes = [1, 64], strides = [1, 1]} : vector<11x64xf32> to vector<1x64xf32>
    %12 = vector.broadcast %11 : vector<1x64xf32> to vector<128x64xf32>
    %13 = arith.addf %10, %12 : vector<128x64xf32>
    %14 = vector.extract_strided_slice %2 {offsets = [1, 0], sizes = [1, 64], strides = [1, 1]} : vector<11x64xf32> to vector<1x64xf32>
    %15 = vector.extract_strided_slice %2 {offsets = [2, 0], sizes = [1, 64], strides = [1, 1]} : vector<11x64xf32> to vector<1x64xf32>
    %cst_10 = arith.constant 0.000000e+00 : f32
    %16 = vector.broadcast %cst_10 : f32 to vector<128x64xf32>
    %17 = arith.select %5, %16, %13 : vector<128x64xi1>, vector<128x64xf32>
    %cst_11 = arith.constant dense<0.000000e+00> : vector<128xf32>
    %18 = vector.multi_reduction <add>, %17, %cst_11 [1] : vector<128x64xf32> to vector<128xf32>
    %19 = vector.shape_cast %18 : vector<128xf32> to vector<128x1xf32>
    %cst_12 = arith.constant 3.125000e-02 : f32
    %20 = vector.broadcast %cst_12 : f32 to vector<128x1xf32>
    %21 = arith.mulf %19, %20 : vector<128x1xf32>
    %cst_13 = arith.constant 0.000000e+00 : f32
    %22 = vector.broadcast %cst_13 : f32 to vector<128x64xf32>
    %23 = arith.select %5, %13, %22 : vector<128x64xi1>, vector<128x64xf32>
    %cst_14 = arith.constant dense<0.000000e+00> : vector<128xf32>
    %24 = vector.multi_reduction <add>, %23, %cst_14 [1] : vector<128x64xf32> to vector<128xf32>
    %25 = vector.shape_cast %24 : vector<128xf32> to vector<128x1xf32>
    %cst_15 = arith.constant 3.125000e-02 : f32
    %26 = vector.broadcast %cst_15 : f32 to vector<128x1xf32>
    %27 = arith.mulf %25, %26 : vector<128x1xf32>
    %28 = vector.shape_cast %27 : vector<128x1xf32> to vector<128x1xf32>
    %29 = vector.broadcast %28 : vector<128x1xf32> to vector<128x64xf32>
    %30 = vector.shape_cast %21 : vector<128x1xf32> to vector<128x1xf32>
    %31 = vector.broadcast %30 : vector<128x1xf32> to vector<128x64xf32>
    %32 = arith.select %5, %29, %31 : vector<128x64xi1>, vector<128x64xf32>
    %33 = arith.subf %13, %32 : vector<128x64xf32>
    %34 = arith.mulf %33, %33 : vector<128x64xf32>
    %cst_16 = arith.constant 0.000000e+00 : f32
    %35 = vector.broadcast %cst_16 : f32 to vector<128x64xf32>
    %36 = arith.select %5, %35, %34 : vector<128x64xi1>, vector<128x64xf32>
    %cst_17 = arith.constant dense<0.000000e+00> : vector<128xf32>
    %37 = vector.multi_reduction <add>, %36, %cst_17 [1] : vector<128x64xf32> to vector<128xf32>
    %38 = vector.shape_cast %37 : vector<128xf32> to vector<128x1xf32>
    %cst_18 = arith.constant 3.125000e-02 : f32
    %39 = vector.broadcast %cst_18 : f32 to vector<128x1xf32>
    %40 = arith.mulf %38, %39 : vector<128x1xf32>
    %cst_19 = arith.constant 0.000000e+00 : f32
    %41 = vector.broadcast %cst_19 : f32 to vector<128x64xf32>
    %42 = arith.select %5, %34, %41 : vector<128x64xi1>, vector<128x64xf32>
    %cst_20 = arith.constant dense<0.000000e+00> : vector<128xf32>
    %43 = vector.multi_reduction <add>, %42, %cst_20 [1] : vector<128x64xf32> to vector<128xf32>
    %44 = vector.shape_cast %43 : vector<128xf32> to vector<128x1xf32>
    %cst_21 = arith.constant 3.125000e-02 : f32
    %45 = vector.broadcast %cst_21 : f32 to vector<128x1xf32>
    %46 = arith.mulf %44, %45 : vector<128x1xf32>
    %47 = vector.shape_cast %46 : vector<128x1xf32> to vector<128x1xf32>
    %48 = vector.broadcast %47 : vector<128x1xf32> to vector<128x64xf32>
    %49 = vector.shape_cast %40 : vector<128x1xf32> to vector<128x1xf32>
    %50 = vector.broadcast %49 : vector<128x1xf32> to vector<128x64xf32>
    %51 = arith.select %5, %48, %50 : vector<128x64xi1>, vector<128x64xf32>
    %cst_22 = arith.constant 9.99999974E-6 : f32
    %52 = vector.broadcast %cst_22 : f32 to vector<128x64xf32>
    %53 = arith.addf %51, %52 : vector<128x64xf32>
    %54 = math.rsqrt %53 : vector<128x64xf32>
    %55 = arith.mulf %33, %54 : vector<128x64xf32>
    %56 = vector.broadcast %14 : vector<1x64xf32> to vector<128x64xf32>
    %57 = arith.mulf %55, %56 : vector<128x64xf32>
    %58 = vector.broadcast %15 : vector<1x64xf32> to vector<128x64xf32>
    %59 = arith.addf %57, %58 : vector<128x64xf32>
    %60 = math.tanh %59 : vector<128x64xf32>
    %c0_23 = arith.constant 0 : index
    %c0_24 = arith.constant 0 : index
    %61 = vector.load %arg5[%c0_23, %c0_24] : memref<64x64xf32, #tpu.memory_space<vmem>>, vector<64x64xf32>
    %cst_25 = arith.constant dense<0.000000e+00> : vector<128x64xf32>
    %62 = tpu.matmul %60, %61, %cst_25 {dimension_numbers = #tpu.dot_dimension_numbers<[1], [0], [0], [1], [0, 0, 1, 1], [], []>} : vector<128x64xf32>, vector<64x64xf32>, vector<128x64xf32> -> vector<128x64xf32>
    %63 = vector.extract_strided_slice %2 {offsets = [3, 0], sizes = [1, 64], strides = [1, 1]} : vector<11x64xf32> to vector<1x64xf32>
    %64 = vector.broadcast %63 : vector<1x64xf32> to vector<128x64xf32>
    %65 = arith.addf %62, %64 : vector<128x64xf32>
    %66 = vector.extract_strided_slice %2 {offsets = [4, 0], sizes = [1, 64], strides = [1, 1]} : vector<11x64xf32> to vector<1x64xf32>
    %67 = vector.extract_strided_slice %2 {offsets = [5, 0], sizes = [1, 64], strides = [1, 1]} : vector<11x64xf32> to vector<1x64xf32>
    %cst_26 = arith.constant 0.000000e+00 : f32
    %68 = vector.broadcast %cst_26 : f32 to vector<128x64xf32>
    %69 = arith.select %5, %68, %65 : vector<128x64xi1>, vector<128x64xf32>
    %cst_27 = arith.constant dense<0.000000e+00> : vector<128xf32>
    %70 = vector.multi_reduction <add>, %69, %cst_27 [1] : vector<128x64xf32> to vector<128xf32>
    %71 = vector.shape_cast %70 : vector<128xf32> to vector<128x1xf32>
    %cst_28 = arith.constant 3.125000e-02 : f32
    %72 = vector.broadcast %cst_28 : f32 to vector<128x1xf32>
    %73 = arith.mulf %71, %72 : vector<128x1xf32>
    %cst_29 = arith.constant 0.000000e+00 : f32
    %74 = vector.broadcast %cst_29 : f32 to vector<128x64xf32>
    %75 = arith.select %5, %65, %74 : vector<128x64xi1>, vector<128x64xf32>
    %cst_30 = arith.constant dense<0.000000e+00> : vector<128xf32>
    %76 = vector.multi_reduction <add>, %75, %cst_30 [1] : vector<128x64xf32> to vector<128xf32>
    %77 = vector.shape_cast %76 : vector<128xf32> to vector<128x1xf32>
    %cst_31 = arith.constant 3.125000e-02 : f32
    %78 = vector.broadcast %cst_31 : f32 to vector<128x1xf32>
    %79 = arith.mulf %77, %78 : vector<128x1xf32>
    %80 = vector.shape_cast %79 : vector<128x1xf32> to vector<128x1xf32>
    %81 = vector.broadcast %80 : vector<128x1xf32> to vector<128x64xf32>
    %82 = vector.shape_cast %73 : vector<128x1xf32> to vector<128x1xf32>
    %83 = vector.broadcast %82 : vector<128x1xf32> to vector<128x64xf32>
    %84 = arith.select %5, %81, %83 : vector<128x64xi1>, vector<128x64xf32>
    %85 = arith.subf %65, %84 : vector<128x64xf32>
    %86 = arith.mulf %85, %85 : vector<128x64xf32>
    %cst_32 = arith.constant 0.000000e+00 : f32
    %87 = vector.broadcast %cst_32 : f32 to vector<128x64xf32>
    %88 = arith.select %5, %87, %86 : vector<128x64xi1>, vector<128x64xf32>
    %cst_33 = arith.constant dense<0.000000e+00> : vector<128xf32>
    %89 = vector.multi_reduction <add>, %88, %cst_33 [1] : vector<128x64xf32> to vector<128xf32>
    %90 = vector.shape_cast %89 : vector<128xf32> to vector<128x1xf32>
    %cst_34 = arith.constant 3.125000e-02 : f32
    %91 = vector.broadcast %cst_34 : f32 to vector<128x1xf32>
    %92 = arith.mulf %90, %91 : vector<128x1xf32>
    %cst_35 = arith.constant 0.000000e+00 : f32
    %93 = vector.broadcast %cst_35 : f32 to vector<128x64xf32>
    %94 = arith.select %5, %86, %93 : vector<128x64xi1>, vector<128x64xf32>
    %cst_36 = arith.constant dense<0.000000e+00> : vector<128xf32>
    %95 = vector.multi_reduction <add>, %94, %cst_36 [1] : vector<128x64xf32> to vector<128xf32>
    %96 = vector.shape_cast %95 : vector<128xf32> to vector<128x1xf32>
    %cst_37 = arith.constant 3.125000e-02 : f32
    %97 = vector.broadcast %cst_37 : f32 to vector<128x1xf32>
    %98 = arith.mulf %96, %97 : vector<128x1xf32>
    %99 = vector.shape_cast %98 : vector<128x1xf32> to vector<128x1xf32>
    %100 = vector.broadcast %99 : vector<128x1xf32> to vector<128x64xf32>
    %101 = vector.shape_cast %92 : vector<128x1xf32> to vector<128x1xf32>
    %102 = vector.broadcast %101 : vector<128x1xf32> to vector<128x64xf32>
    %103 = arith.select %5, %100, %102 : vector<128x64xi1>, vector<128x64xf32>
    %cst_38 = arith.constant 9.99999974E-6 : f32
    %104 = vector.broadcast %cst_38 : f32 to vector<128x64xf32>
    %105 = arith.addf %103, %104 : vector<128x64xf32>
    %106 = math.rsqrt %105 : vector<128x64xf32>
    %107 = arith.mulf %85, %106 : vector<128x64xf32>
    %108 = vector.broadcast %66 : vector<1x64xf32> to vector<128x64xf32>
    %109 = arith.mulf %107, %108 : vector<128x64xf32>
    %110 = vector.broadcast %67 : vector<1x64xf32> to vector<128x64xf32>
    %111 = arith.addf %109, %110 : vector<128x64xf32>
    %cst_39 = arith.constant 2.000000e+01 : f32
    %112 = vector.broadcast %cst_39 : f32 to vector<128x64xf32>
    %113 = arith.minimumf %111, %112 : vector<128x64xf32>
    %114 = math.exp %113 : vector<128x64xf32>
    %115 = arith.mulf %114, %114 : vector<128x64xf32>
    %cst_40 = arith.constant 2.000000e+00 : f32
    %116 = vector.broadcast %cst_40 : f32 to vector<128x64xf32>
    %117 = arith.mulf %116, %114 : vector<128x64xf32>
    %118 = arith.addf %115, %117 : vector<128x64xf32>
    %cst_41 = arith.constant 2.000000e+00 : f32
    %119 = vector.broadcast %cst_41 : f32 to vector<128x64xf32>
    %120 = arith.addf %118, %119 : vector<128x64xf32>
    %121 = arith.divf %118, %120 : vector<128x64xf32>
    %cst_42 = arith.constant 2.000000e+01 : f32
    %122 = vector.broadcast %cst_42 : f32 to vector<128x64xf32>
    %123 = arith.cmpf ogt, %111, %122 : vector<128x64xf32>
    %124 = arith.mulf %111, %121 : vector<128x64xf32>
    %125 = arith.select %123, %111, %124 : vector<128x64xi1>, vector<128x64xf32>
    %c0_43 = arith.constant 0 : index
    %c0_44 = arith.constant 0 : index
    %126 = vector.load %arg6[%c0_43, %c0_44] : memref<64x64xf32, #tpu.memory_space<vmem>>, vector<64x64xf32>
    %cst_45 = arith.constant dense<0.000000e+00> : vector<128x64xf32>
    %127 = tpu.matmul %125, %126, %cst_45 {dimension_numbers = #tpu.dot_dimension_numbers<[1], [0], [0], [1], [0, 0, 1, 1], [], []>} : vector<128x64xf32>, vector<64x64xf32>, vector<128x64xf32> -> vector<128x64xf32>
    %128 = vector.extract_strided_slice %2 {offsets = [6, 0], sizes = [1, 64], strides = [1, 1]} : vector<11x64xf32> to vector<1x64xf32>
    %129 = vector.broadcast %128 : vector<1x64xf32> to vector<128x64xf32>
    %130 = arith.addf %127, %129 : vector<128x64xf32>
    %131 = vector.extract_strided_slice %2 {offsets = [7, 0], sizes = [1, 64], strides = [1, 1]} : vector<11x64xf32> to vector<1x64xf32>
    %132 = vector.extract_strided_slice %2 {offsets = [8, 0], sizes = [1, 64], strides = [1, 1]} : vector<11x64xf32> to vector<1x64xf32>
    %cst_46 = arith.constant 0.000000e+00 : f32
    %133 = vector.broadcast %cst_46 : f32 to vector<128x64xf32>
    %134 = arith.select %5, %133, %130 : vector<128x64xi1>, vector<128x64xf32>
    %cst_47 = arith.constant dense<0.000000e+00> : vector<128xf32>
    %135 = vector.multi_reduction <add>, %134, %cst_47 [1] : vector<128x64xf32> to vector<128xf32>
    %136 = vector.shape_cast %135 : vector<128xf32> to vector<128x1xf32>
    %cst_48 = arith.constant 3.125000e-02 : f32
    %137 = vector.broadcast %cst_48 : f32 to vector<128x1xf32>
    %138 = arith.mulf %136, %137 : vector<128x1xf32>
    %cst_49 = arith.constant 0.000000e+00 : f32
    %139 = vector.broadcast %cst_49 : f32 to vector<128x64xf32>
    %140 = arith.select %5, %130, %139 : vector<128x64xi1>, vector<128x64xf32>
    %cst_50 = arith.constant dense<0.000000e+00> : vector<128xf32>
    %141 = vector.multi_reduction <add>, %140, %cst_50 [1] : vector<128x64xf32> to vector<128xf32>
    %142 = vector.shape_cast %141 : vector<128xf32> to vector<128x1xf32>
    %cst_51 = arith.constant 3.125000e-02 : f32
    %143 = vector.broadcast %cst_51 : f32 to vector<128x1xf32>
    %144 = arith.mulf %142, %143 : vector<128x1xf32>
    %145 = vector.shape_cast %144 : vector<128x1xf32> to vector<128x1xf32>
    %146 = vector.broadcast %145 : vector<128x1xf32> to vector<128x64xf32>
    %147 = vector.shape_cast %138 : vector<128x1xf32> to vector<128x1xf32>
    %148 = vector.broadcast %147 : vector<128x1xf32> to vector<128x64xf32>
    %149 = arith.select %5, %146, %148 : vector<128x64xi1>, vector<128x64xf32>
    %150 = arith.subf %130, %149 : vector<128x64xf32>
    %151 = arith.mulf %150, %150 : vector<128x64xf32>
    %cst_52 = arith.constant 0.000000e+00 : f32
    %152 = vector.broadcast %cst_52 : f32 to vector<128x64xf32>
    %153 = arith.select %5, %152, %151 : vector<128x64xi1>, vector<128x64xf32>
    %cst_53 = arith.constant dense<0.000000e+00> : vector<128xf32>
    %154 = vector.multi_reduction <add>, %153, %cst_53 [1] : vector<128x64xf32> to vector<128xf32>
    %155 = vector.shape_cast %154 : vector<128xf32> to vector<128x1xf32>
    %cst_54 = arith.constant 3.125000e-02 : f32
    %156 = vector.broadcast %cst_54 : f32 to vector<128x1xf32>
    %157 = arith.mulf %155, %156 : vector<128x1xf32>
    %cst_55 = arith.constant 0.000000e+00 : f32
    %158 = vector.broadcast %cst_55 : f32 to vector<128x64xf32>
    %159 = arith.select %5, %151, %158 : vector<128x64xi1>, vector<128x64xf32>
    %cst_56 = arith.constant dense<0.000000e+00> : vector<128xf32>
    %160 = vector.multi_reduction <add>, %159, %cst_56 [1] : vector<128x64xf32> to vector<128xf32>
    %161 = vector.shape_cast %160 : vector<128xf32> to vector<128x1xf32>
    %cst_57 = arith.constant 3.125000e-02 : f32
    %162 = vector.broadcast %cst_57 : f32 to vector<128x1xf32>
    %163 = arith.mulf %161, %162 : vector<128x1xf32>
    %164 = vector.shape_cast %163 : vector<128x1xf32> to vector<128x1xf32>
    %165 = vector.broadcast %164 : vector<128x1xf32> to vector<128x64xf32>
    %166 = vector.shape_cast %157 : vector<128x1xf32> to vector<128x1xf32>
    %167 = vector.broadcast %166 : vector<128x1xf32> to vector<128x64xf32>
    %168 = arith.select %5, %165, %167 : vector<128x64xi1>, vector<128x64xf32>
    %cst_58 = arith.constant 9.99999974E-6 : f32
    %169 = vector.broadcast %cst_58 : f32 to vector<128x64xf32>
    %170 = arith.addf %168, %169 : vector<128x64xf32>
    %171 = math.rsqrt %170 : vector<128x64xf32>
    %172 = arith.mulf %150, %171 : vector<128x64xf32>
    %173 = vector.broadcast %131 : vector<1x64xf32> to vector<128x64xf32>
    %174 = arith.mulf %172, %173 : vector<128x64xf32>
    %175 = vector.broadcast %132 : vector<1x64xf32> to vector<128x64xf32>
    %176 = arith.addf %174, %175 : vector<128x64xf32>
    %cst_59 = arith.constant 2.000000e+01 : f32
    %177 = vector.broadcast %cst_59 : f32 to vector<128x64xf32>
    %178 = arith.minimumf %176, %177 : vector<128x64xf32>
    %179 = math.exp %178 : vector<128x64xf32>
    %180 = arith.mulf %179, %179 : vector<128x64xf32>
    %cst_60 = arith.constant 2.000000e+00 : f32
    %181 = vector.broadcast %cst_60 : f32 to vector<128x64xf32>
    %182 = arith.mulf %181, %179 : vector<128x64xf32>
    %183 = arith.addf %180, %182 : vector<128x64xf32>
    %cst_61 = arith.constant 2.000000e+00 : f32
    %184 = vector.broadcast %cst_61 : f32 to vector<128x64xf32>
    %185 = arith.addf %183, %184 : vector<128x64xf32>
    %186 = arith.divf %183, %185 : vector<128x64xf32>
    %cst_62 = arith.constant 2.000000e+01 : f32
    %187 = vector.broadcast %cst_62 : f32 to vector<128x64xf32>
    %188 = arith.cmpf ogt, %176, %187 : vector<128x64xf32>
    %189 = arith.mulf %176, %186 : vector<128x64xf32>
    %190 = arith.select %188, %176, %189 : vector<128x64xi1>, vector<128x64xf32>
    %191 = vector.extract_strided_slice %2 {offsets = [9, 0], sizes = [1, 64], strides = [1, 1]} : vector<11x64xf32> to vector<1x64xf32>
    %192 = vector.broadcast %191 : vector<1x64xf32> to vector<128x64xf32>
    %193 = arith.mulf %190, %192 : vector<128x64xf32>
    %194 = vector.extract_strided_slice %2 {offsets = [10, 0], sizes = [1, 64], strides = [1, 1]} : vector<11x64xf32> to vector<1x64xf32>
    %195 = vector.broadcast %194 : vector<1x64xf32> to vector<128x64xf32>
    %196 = arith.addf %193, %195 : vector<128x64xf32>
    %cst_63 = arith.constant 0.000000e+00 : f32
    %197 = vector.broadcast %cst_63 : f32 to vector<128x64xf32>
    %198 = arith.select %5, %197, %196 : vector<128x64xi1>, vector<128x64xf32>
    %cst_64 = arith.constant dense<0.000000e+00> : vector<128xf32>
    %199 = vector.multi_reduction <add>, %198, %cst_64 [1] : vector<128x64xf32> to vector<128xf32>
    %cst_65 = arith.constant 0.000000e+00 : f32
    %200 = vector.broadcast %cst_65 : f32 to vector<128x64xf32>
    %201 = arith.select %5, %196, %200 : vector<128x64xi1>, vector<128x64xf32>
    %cst_66 = arith.constant dense<0.000000e+00> : vector<128xf32>
    %202 = vector.multi_reduction <add>, %201, %cst_66 [1] : vector<128x64xf32> to vector<128xf32>
    %203 = arith.minimumf %199, %202 : vector<128xf32>
    %204 = vector.shape_cast %203 : vector<128xf32> to vector<1x128xf32>
    %c0_67 = arith.constant 0 : index
    %c0_68 = arith.constant 0 : index
    %205 = vector.load %arg8[%c0_67, %c0_68] : memref<1x128xf32, #tpu.memory_space<vmem>>, vector<1x128xf32>
    tpu.vector_store %arg8[%c0_67, %c0_68], %204 {strides = array<i32>} : memref<1x128xf32, #tpu.memory_space<vmem>>, vector<1x128xf32>,
    return
  }
  func.func @transform_0(%arg0: i32) -> (i32, i32) {
    %c0_i32 = arith.constant 0 : i32
    %c0_i32_0 = arith.constant 0 : i32
    return %arg0, %c0_i32 : i32, i32
  }
  func.func @transform_1(%arg0: i32) -> (i32, i32) {
    %c0_i32 = arith.constant 0 : i32
    %c0_i32_0 = arith.constant 0 : i32
    return %arg0, %c0_i32 : i32, i32
  }
  func.func @transform_2(%arg0: i32) -> (i32, i32) {
    %c0_i32 = arith.constant 0 : i32
    %c0_i32_0 = arith.constant 0 : i32
    %c0_i32_1 = arith.constant 0 : i32
    return %c0_i32, %c0_i32_0 : i32, i32
  }
  func.func @transform_3(%arg0: i32) -> (i32, i32) {
    %c0_i32 = arith.constant 0 : i32
    %c0_i32_0 = arith.constant 0 : i32
    %c0_i32_1 = arith.constant 0 : i32
    return %c0_i32, %c0_i32_0 : i32, i32
  }
  func.func @transform_4(%arg0: i32) -> (i32, i32) {
    %c0_i32 = arith.constant 0 : i32
    %c0_i32_0 = arith.constant 0 : i32
    %c0_i32_1 = arith.constant 0 : i32
    return %c0_i32, %c0_i32_0 : i32, i32
  }
  func.func @transform_5(%arg0: i32) -> (i32, i32) {
    %c0_i32 = arith.constant 0 : i32
    %c0_i32_0 = arith.constant 0 : i32
    %c0_i32_1 = arith.constant 0 : i32
    return %c0_i32, %c0_i32_0 : i32, i32
  }
  func.func @transform_6(%arg0: i32) -> (i32, i32) {
    %c0_i32 = arith.constant 0 : i32
    %c0_i32_0 = arith.constant 0 : i32
    %c0_i32_1 = arith.constant 0 : i32
    return %c0_i32, %c0_i32_0 : i32, i32
  }
  func.func @transform_7(%arg0: i32) -> (i32, i32) {
    %c0_i32 = arith.constant 0 : i32
    %c0_i32_0 = arith.constant 0 : i32
    return %c0_i32, %arg0 : i32, i32
  }
}

</mosaic_0001>

<bundles_post_ra>
// kernel: tpu_custom_call.1
= control target key start
LH: loop header
LB: loop body
LE: loop exit
PB: predicated region body
PF: predicated region fallthrough
CT: control target
= control target key end

     0   :  { %vm116_vm0 = vcmask 1044480   ;;  %vm67_vm1 = vcmask 39936   ;;  %vm314_vm2 = vcmask 1042432   ;;  %vm3664_vm3 = vmmov 1   ;;  %s5852_s0 = inlined_call_operand.vmem [shape: f32[128,11], index: 0, kind: input, shape index: {}]   ;;  %s5853_s1 = inlined_call_operand.vmem [shape: f32[128,5], index: 1, kind: input, shape index: {}]   ;;  %s5854_s2 = inlined_call_operand.vmem [shape: f32[11,64], index: 2, kind: input, shape index: {}]   ;;  %s5855_s3 = inlined_call_operand.vmem [shape: f32[5,64], index: 3, kind: input, shape index: {}]   ;;  %s5856_s4 = inlined_call_operand.vmem [shape: f32[64,64], index: 4, kind: input, shape index: {}]   ;;  %s5857_s5 = inlined_call_operand.vmem [shape: f32[64,64], index: 5, kind: input, shape index: {}]   ;;  %s5858_s6 = inlined_call_operand.vmem [shape: f32[11,64], index: 6, kind: input, shape index: {}]   ;;  %s5859_s7 = inlined_call_operand.hbm [shape: f32[1,128], index: 7, kind: output, shape index: {}]  }
   0x1   :  { %v66_v0 = vld [vmem:[%s5855_s3] sm:$0x1f]  ;;  %v44_v2 = vld [vmem:[%s5853_s1 + $0x8] sm:$0xff]  ;;  %v45_v5 = vld [vmem:[%s5853_s1 + $0x10] sm:$0xff] }
   0x2   :  { %v43_v1 = vld [vmem:[%s5853_s1] sm:$0xff]  ;;  %3184 = vmatprep.subr.msk.mxu0 %vm116_vm0, %v66_v0  ;;  %v65_v4 = vld [vmem:[%s5854_s2 + $0x8] sm:$0x7]  ;;  %vm3319_vm4 = vmpackc.low %vm314_vm2, %vm3664_vm3 }
   0x3   :  { %3186 = vmatprep.mubr.msk.f32.mxu0 %vm67_vm1, %v43_v1  ;;  %v64_v3 = vld [vmem:[%s5854_s2] sm:$0xff]  ;;  %3185 = vmatpush3.msk.msra.mxu0 %vm116_vm0, %v66_v0  ;;  %v46_v7 = vld [vmem:[%s5853_s1 + $0x18] sm:$0xff]  ;;  %v48_v9 = vld [vmem:[%s5853_s1 + $0x28] sm:$0xff] }
   0x4   :  { %v3318_v6 = vpack.c.bf16 %v65_v4, %v64_v3  ;;  %3187 = vmatmul.mubr.msk.f32.vlgmr.msra.gmra.mrb[0].mxu0 %vm67_vm1, %v44_v2  ;;  %v47_v8 = vld [vmem:[%s5853_s1 + $0x20] sm:$0xff]  ;;  %v49_v10 = vld [vmem:[%s5853_s1 + $0x30] sm:$0xff]  ;;  %v50_v11 = vld [vmem:[%s5853_s1 + $0x38] sm:$0xff] }
   0x5   :  { %3189 = vmatprep.mubr.msk.f32.mxu0 %vm67_vm1, %v45_v5 }
   0x6   :  { %3320 = vmatprep.subr.msk.bf16.mxu0 %vm3319_vm4, %v3318_v6 }
   0x7   :  { %3323 = vmatpush3.bf16.msk.msra.mxu0 %vm3319_vm4, %v3318_v6 }
   0x8   :  { %3190 = vmatmul.mubr.msk.f32.gmra.mrb[2].mxu0 %vm67_vm1, %v46_v7 }
   0x9   :  { %3192 = vmatprep.mubr.msk.f32.mxu0 %vm67_vm1, %v47_v8 }
   0xc   :  { %3193 = vmatmul.mubr.msk.f32.gmra.mrb[4].mxu0 %vm67_vm1, %v48_v9 }
   0xd   :  { %3195 = vmatprep.mubr.msk.f32.mxu0 %vm67_vm1, %v49_v10 }
   0xe   :  { %12 = vsyncpa [#allocation3], 0  ;;  %v51_v12 = vld [vmem:[%s5853_s1 + $0x40] sm:$0xff]  ;;  %v52_v13 = vld [vmem:[%s5853_s1 + $0x48] sm:$0xff]  ;;  %vm265_vm5 = vcmask 89088   ;;  %v61_v36 = vlaneseq  ;;  %vm499_vm7 = vcmask 523264  }
   0xf   :  { %v53_v14 = vld [vmem:[%s5853_s1 + $0x50] sm:$0xff]  ;;  %v54_v15 = vld [vmem:[%s5853_s1 + $0x58] sm:$0xff]  ;;  %v55_v16 = vld [vmem:[%s5853_s1 + $0x60] sm:$0xff] }
  0x10   :  { %3196 = vmatmul.mubr.msk.f32.gmra.mrb[6].mxu0 %vm67_vm1, %v50_v11  ;;  %v56_v17 = vld [vmem:[%s5853_s1 + $0x68] sm:$0xff]  ;;  %v57_v18 = vld [vmem:[%s5853_s1 + $0x70] sm:$0xff]  ;;  %v58_v19 = vld [vmem:[%s5853_s1 + $0x78] sm:$0xff]  ;;  %v3843_v37 = vshrl.u32 %v61_v36, 7  ;;  %v3851_v40 = vand.u32 127, %v61_v36 }
  0x11   :  { %3198 = vmatprep.mubr.msk.f32.mxu0 %vm67_vm1, %v51_v12  ;;  %v27_v20 = vld [vmem:[%s5852_s0] sm:$0xff]  ;;  %v28_v21 = vld [vmem:[%s5852_s0 + $0x8] sm:$0xff]  ;;  %v29_v22 = vld [vmem:[%s5852_s0 + $0x10] sm:$0xff] }
  0x12   :  { %v30_v23 = vld [vmem:[%s5852_s0 + $0x18] sm:$0xff]  ;;  %v31_v24 = vld [vmem:[%s5852_s0 + $0x20] sm:$0xff]  ;;  %v32_v25 = vld [vmem:[%s5852_s0 + $0x28] sm:$0xff]  ;;  %v465_v38 = vsub.s32 0, %v3843_v37  ;;  %vm63_vm6 = vcmp.ge.s32.totalorder %v3851_v40, 32 }
  0x13   :  { %v33_v26 = vld [vmem:[%s5852_s0 + $0x30] sm:$0xff]  ;;  %v34_v27 = vld [vmem:[%s5852_s0 + $0x38] sm:$0xff]  ;;  %v35_v28 = vld [vmem:[%s5852_s0 + $0x40] sm:$0xff] }
  0x14   :  { %3199 = vmatmul.mubr.msk.f32.gmra.mrb[8].mxu0 %vm67_vm1, %v52_v13  ;;  %v36_v29 = vld [vmem:[%s5852_s0 + $0x48] sm:$0xff]  ;;  %v37_v30 = vld [vmem:[%s5852_s0 + $0x50] sm:$0xff]  ;;  %v38_v31 = vld [vmem:[%s5852_s0 + $0x58] sm:$0xff] }
  0x15   :  { %3201 = vmatprep.mubr.msk.f32.mxu0 %vm67_vm1, %v53_v14  ;;  %v39_v32 = vld [vmem:[%s5852_s0 + $0x60] sm:$0xff]  ;;  %v40_v33 = vld [vmem:[%s5852_s0 + $0x68] sm:$0xff]  ;;  %v41_v34 = vld [vmem:[%s5852_s0 + $0x70] sm:$0xff] }
  0x16   :  { %v42_v35 = vld [vmem:[%s5852_s0 + $0x78] sm:$0xff]  ;;  %v3849_v39 = vld [vmem:[%s5858_s6] sm:$0xff] }
  0x17   :  { %v3856_v41 = vrot.slane %v3849_v39, %v465_v38 }
  0x18   :  { %3202 = vmatmul.mubr.msk.f32.gmra.mrb[10].mxu0 %vm67_vm1, %v54_v15 }
  0x19   :  { %3204 = vmatprep.mubr.msk.f32.mxu0 %vm67_vm1, %v55_v16 }
  0x1c   :  { %3205 = vmatmul.mubr.msk.f32.gmra.mrb[12].mxu0 %vm67_vm1, %v56_v17 }
  0x1d   :  { %3207 = vmatprep.mubr.msk.f32.mxu0 %vm67_vm1, %v57_v18 }
  0x20   :  { %3208 = vmatmul.mubr.msk.f32.gmra.mrb[14].mxu0 %vm67_vm1, %v58_v19 }
  0x21   :  { %3214 = vmatprep.mubr.msk.f32.mxu0 %vm265_vm5, %v27_v20 }
  0x24   :  { %3215 = vmatmul.mubr.msk.f32.vlgmr.msra.gmra.mrb[0].mxu0 %vm265_vm5, %v28_v21 }
  0x25   :  { %3217 = vmatprep.mubr.msk.f32.mxu0 %vm265_vm5, %v29_v22 }
  0x28   :  { %3218 = vmatmul.mubr.msk.f32.gmra.mrb[2].mxu0 %vm265_vm5, %v30_v23 }
  0x29   :  { %3220 = vmatprep.mubr.msk.f32.mxu0 %vm265_vm5, %v31_v24 }
  0x2c   :  { %3221 = vmatmul.mubr.msk.f32.gmra.mrb[4].mxu0 %vm265_vm5, %v32_v25 }
  0x2d   :  { %3223 = vmatprep.mubr.msk.f32.mxu0 %vm265_vm5, %v33_v26 }
  0x30   :  { %3224 = vmatmul.mubr.msk.f32.gmra.mrb[6].mxu0 %vm265_vm5, %v34_v27 }
  0x31   :  { %3226 = vmatprep.mubr.msk.f32.mxu0 %vm265_vm5, %v35_v28 }
  0x34   :  { %3227 = vmatmul.mubr.msk.f32.gmra.mrb[8].mxu0 %vm265_vm5, %v36_v29 }
  0x35   :  { %3229 = vmatprep.mubr.msk.f32.mxu0 %vm265_vm5, %v37_v30 }
  0x38   :  { %3230 = vmatmul.mubr.msk.f32.gmra.mrb[10].mxu0 %vm265_vm5, %v38_v31 }
  0x39   :  { %3232 = vmatprep.mubr.msk.f32.mxu0 %vm265_vm5, %v39_v32 }
  0x3c   :  { %3233 = vmatmul.mubr.msk.f32.gmra.mrb[12].mxu0 %vm265_vm5, %v40_v33 }
  0x3d   :  { %3235 = vmatprep.mubr.msk.f32.mxu0 %vm265_vm5, %v41_v34 }
  0x40   :  { %3236 = vmatmul.mubr.msk.f32.gmra.mrb[14].mxu0 %vm265_vm5, %v42_v35 }
  0xf7   :  { %v3216_v42 = vpop.f32.mrb[0].mxu0 }
  0xf8   :  { %v3860_v43 = vadd.f32 %v3216_v42, %v3856_v41  ;;  %v384_v44 = vpop.f32.mrb[1].mxu0 }
  0xf9   :  { %v3863_v45 = vadd.f32 %v3856_v41, %v384_v44 }
  0xfa   :  { %v484_v46 = vsel %vm63_vm6, 0.0, %v3860_v43  ;;  %v565_v53 = vsel %vm63_vm6, %v3860_v43, 0.0 }
  0xfb   :  { %v3219_v47 = vpop.f32.mrb[2].mxu0  ;;  %v503_v48 = vsel %vm499_vm7, %v484_v46, 0.0  ;;  %v483_v49 = vsel %vm63_vm6, 0.0, %v3863_v45  ;;  %v564_v54 = vsel %vm63_vm6, %v3863_v45, 0.0  ;;  %v583_v56 = vsel %vm499_vm7, %v565_v53, 0.0 }
  0xfc   :  { %v3873_v50 = vadd.f32 %v3219_v47, %v3856_v41  ;;  %504 = vadd.xlane.f32.xlu1 %v503_v48  ;;  %v394_v51 = vpop.f32.mrb[3].mxu0  ;;  %v500_v52 = vsel %vm499_vm7, %v483_v49, 0.0  ;;  %v580_v59 = vsel %vm499_vm7, %v564_v54, 0.0 }
  0xfd   :  { %501 = vadd.xlane.f32.xlu0 %v500_v52  ;;  %v3884_v57 = vadd.f32 %v3856_v41, %v394_v51 }
  0xfe   :  { %v567_v60 = vsel %vm63_vm6, %v3873_v50, 0.0  ;;  %v486_v61 = vsel %vm63_vm6, 0.0, %v3873_v50 }
  0xff   :  { %v3222_v55 = vpop.f32.mrb[4].mxu0  ;;  %v589_v63 = vsel %vm499_vm7, %v567_v60, 0.0  ;;  %v509_v2 = vsel %vm499_vm7, %v486_v61, 0.0  ;;  %v566_v3 = vsel %vm63_vm6, %v3884_v57, 0.0  ;;  %v485_v4 = vsel %vm63_vm6, 0.0, %v3884_v57 }
 0x100   :  { %584 = vadd.xlane.f32.xlu1 %v583_v56  ;;  %v404_v58 = vpop.f32.mrb[5].mxu0  ;;  %v3895_v0 = vadd.f32 %v3222_v55, %v3856_v41  ;;  %v586_v6 = vsel %vm499_vm7, %v566_v3, 0.0  ;;  %v506_v9 = vsel %vm499_vm7, %v485_v4, 0.0 }
 0x101   :  { %581 = vadd.xlane.f32.xlu0 %v580_v59  ;;  %v3906_v7 = vadd.f32 %v3856_v41, %v404_v58 }
 0x102   :  { %v569_v10 = vsel %vm63_vm6, %v3895_v0, 0.0  ;;  %v488_v11 = vsel %vm63_vm6, 0.0, %v3895_v0 }
 0x103   :  { %v3225_v62 = vpop.f32.mrb[6].mxu0  ;;  %v595_v13 = vsel %vm499_vm7, %v569_v10, 0.0  ;;  %v515_v16 = vsel %vm499_vm7, %v488_v11, 0.0  ;;  %v568_v17 = vsel %vm63_vm6, %v3906_v7, 0.0  ;;  %v487_v18 = vsel %vm63_vm6, 0.0, %v3906_v7 }
 0x104   :  { %590 = vadd.xlane.f32.xlu1 %v589_v63  ;;  %v414_v1 = vpop.f32.mrb[7].mxu0  ;;  %v3917_v14 = vadd.f32 %v3225_v62, %v3856_v41  ;;  %v592_v20 = vsel %vm499_vm7, %v568_v17, 0.0  ;;  %v512_v23 = vsel %vm499_vm7, %v487_v18, 0.0 }
 0x105   :  { %510 = vadd.xlane.f32.xlu0 %v509_v2  ;;  %v3928_v21 = vadd.f32 %v3856_v41, %v414_v1 }
 0x106   :  { %v571_v24 = vsel %vm63_vm6, %v3917_v14, 0.0  ;;  %v490_v25 = vsel %vm63_vm6, 0.0, %v3917_v14 }
 0x107   :  { %v3228_v5 = vpop.f32.mrb[8].mxu0  ;;  %v601_v27 = vsel %vm499_vm7, %v571_v24, 0.0  ;;  %v521_v30 = vsel %vm499_vm7, %v490_v25, 0.0  ;;  %v570_v31 = vsel %vm63_vm6, %v3928_v21, 0.0  ;;  %v489_v32 = vsel %vm63_vm6, 0.0, %v3928_v21 }
 0x108   :  { %587 = vadd.xlane.f32.xlu1 %v586_v6  ;;  %v424_v8 = vpop.f32.mrb[9].mxu0  ;;  %v3939_v28 = vadd.f32 %v3228_v5, %v3856_v41  ;;  %v598_v33 = vsel %vm499_vm7, %v570_v31, 0.0  ;;  %v518_v35 = vsel %vm499_vm7, %v489_v32, 0.0 }
 0x109   :  { %507 = vadd.xlane.f32.xlu0 %v506_v9  ;;  %v3950_v34 = vadd.f32 %v3856_v41, %v424_v8 }
 0x10a   :  { %v573_v36 = vsel %vm63_vm6, %v3939_v28, 0.0  ;;  %v492_v42 = vsel %vm63_vm6, 0.0, %v3939_v28 }
 0x10b   :  { %v3231_v12 = vpop.f32.mrb[10].mxu0  ;;  %v607_v44 = vsel %vm499_vm7, %v573_v36, 0.0  ;;  %v527_v47 = vsel %vm499_vm7, %v492_v42, 0.0  ;;  %v572_v48 = vsel %vm63_vm6, %v3950_v34, 0.0  ;;  %v491_v49 = vsel %vm63_vm6, 0.0, %v3950_v34 }
 0x10c   :  { %596 = vadd.xlane.f32.xlu1 %v595_v13  ;;  %v434_v15 = vpop.f32.mrb[11].mxu0  ;;  %v3961_v46 = vadd.f32 %v3231_v12, %v3856_v41  ;;  %v604_v51 = vsel %vm499_vm7, %v572_v48, 0.0  ;;  %v524_v53 = vsel %vm499_vm7, %v491_v49, 0.0 }
 0x10d   :  { %516 = vadd.xlane.f32.xlu0 %v515_v16  ;;  %v3972_v52 = vadd.f32 %v3856_v41, %v434_v15 }
 0x10e   :  { %v575_v54 = vsel %vm63_vm6, %v3961_v46, 0.0  ;;  %v494_v55 = vsel %vm63_vm6, 0.0, %v3961_v46 }
 0x10f   :  { %v3234_v19 = vpop.f32.mrb[12].mxu0  ;;  %v613_v56 = vsel %vm499_vm7, %v575_v54, 0.0  ;;  %v533_v59 = vsel %vm499_vm7, %v494_v55, 0.0  ;;  %v574_v60 = vsel %vm63_vm6, %v3972_v52, 0.0  ;;  %v493_v61 = vsel %vm63_vm6, 0.0, %v3972_v52 }
 0x110   :  { %593 = vadd.xlane.f32.xlu1 %v592_v20  ;;  %v444_v22 = vpop.f32.mrb[13].mxu0  ;;  %v3983_v58 = vadd.f32 %v3234_v19, %v3856_v41  ;;  %v610_v62 = vsel %vm499_vm7, %v574_v60, 0.0  ;;  %v530_v1 = vsel %vm499_vm7, %v493_v61, 0.0 }
 0x111   :  { %513 = vadd.xlane.f32.xlu0 %v512_v23  ;;  %v3994_v63 = vadd.f32 %v3856_v41, %v444_v22 }
 0x112   :  { %v577_v2 = vsel %vm63_vm6, %v3983_v58, 0.0  ;;  %v496_v3 = vsel %vm63_vm6, 0.0, %v3983_v58 }
 0x113   :  { %v3237_v26 = vpop.f32.mrb[14].mxu0  ;;  %v619_v4 = vsel %vm499_vm7, %v577_v2, 0.0  ;;  %v539_v6 = vsel %vm499_vm7, %v496_v3, 0.0  ;;  %v576_v8 = vsel %vm63_vm6, %v3994_v63, 0.0  ;;  %v495_v9 = vsel %vm63_vm6, 0.0, %v3994_v63 }
 0x114   :  { %602 = vadd.xlane.f32.xlu1 %v601_v27  ;;  %v454_v29 = vpop.f32.mrb[15].mxu0  ;;  %v616_v10 = vsel %vm499_vm7, %v576_v8, 0.0  ;;  %v4016_v11 = vadd.f32 %v3237_v26, %v3856_v41  ;;  %v536_v12 = vsel %vm499_vm7, %v495_v9, 0.0 }
 0x115   :  { %522 = vadd.xlane.f32.xlu0 %v521_v30  ;;  %v4005_v5 = vadd.f32 %v3856_v41, %v454_v29 }
 0x116   :  { %v579_v41 = vsel %vm63_vm6, %v4016_v11, 0.0  ;;  %v498_v18 = vsel %vm63_vm6, 0.0, %v4016_v11 }
 0x117   :  { %v578_v13 = vsel %vm63_vm6, %v4005_v5, 0.0  ;;  %v497_v15 = vsel %vm63_vm6, 0.0, %v4005_v5  ;;  %v625_v19 = vsel %vm499_vm7, %v579_v41, 0.0  ;;  %v545_v20 = vsel %vm499_vm7, %v498_v18, 0.0 }
 0x118   :  { %599 = vadd.xlane.f32.xlu1 %v598_v33  ;;  %v622_v16 = vsel %vm499_vm7, %v578_v13, 0.0  ;;  %v542_v17 = vsel %vm499_vm7, %v497_v15, 0.0 }
 0x119   :  { %519 = vadd.xlane.f32.xlu0 %v518_v35 }
 0x11c   :  { %608 = vadd.xlane.f32.xlu1 %v607_v44 }
 0x11d   :  { %528 = vadd.xlane.f32.xlu0 %v527_v47 }
 0x120   :  { %605 = vadd.xlane.f32.xlu1 %v604_v51 }
 0x121   :  { %525 = vadd.xlane.f32.xlu0 %v524_v53 }
 0x124   :  { %614 = vadd.xlane.f32.xlu1 %v613_v56 }
 0x125   :  { %534 = vadd.xlane.f32.xlu0 %v533_v59 }
 0x128   :  { %611 = vadd.xlane.f32.xlu1 %v610_v62 }
 0x129   :  { %531 = vadd.xlane.f32.xlu0 %v530_v1 }
 0x12c   :  { %620 = vadd.xlane.f32.xlu1 %v619_v4 }
 0x12d   :  { %540 = vadd.xlane.f32.xlu0 %v539_v6 }
 0x130   :  { %617 = vadd.xlane.f32.xlu1 %v616_v10 }
 0x131   :  { %537 = vadd.xlane.f32.xlu0 %v536_v12 }
 0x134   :  { %623 = vadd.xlane.f32.xlu1 %v622_v16 }
 0x135   :  { %543 = vadd.xlane.f32.xlu0 %v542_v17 }
 0x138   :  { %626 = vadd.xlane.f32.xlu1 %v625_v19 }
 0x139   :  { %546 = vadd.xlane.f32.xlu0 %v545_v20 }
 0x189   :  { %v505_v22 = vpop.xlane.xlu1 %504 }
 0x18a   :  { %v502_v23 = vpop.xlane.xlu0 %501  ;;  %v549_v25 = vmul.f32 0.03125, %v505_v22 }
 0x18b   :  { %v548_v29 = vmul.f32 0.03125, %v502_v23 }
 0x18d   :  { %v585_v24 = vpop.xlane.xlu1 %584 }
 0x18e   :  { %v629_v26 = vmul.f32 0.03125, %v585_v24  ;;  %v582_v27 = vpop.xlane.xlu0 %581 }
 0x18f   :  { %v628_v30 = vmul.f32 0.03125, %v582_v27 }
 0x190   :  { %v645_v31 = vsel %vm63_vm6, %v629_v26, %v549_v25 }
 0x191   :  { %v644_v32 = vsel %vm63_vm6, %v628_v30, %v548_v29  ;;  %v591_v33 = vpop.xlane.xlu1 %590  ;;  %v4040_v35 = vsub.f32 %v3860_v43, %v645_v31 }
 0x192   :  { %v631_v36 = vmul.f32 0.03125, %v591_v33  ;;  %v511_v42 = vpop.xlane.xlu0 %510  ;;  %v4043_v44 = vsub.f32 %v3863_v45, %v644_v32 }
 0x193   :  { %v551_v47 = vmul.f32 0.03125, %v511_v42  ;;  %v677_v48 = vmul.f32 %v4040_v35, %v4040_v35 }
 0x194   :  { %v676_v49 = vmul.f32 %v4043_v44, %v4043_v44 }
 0x195   :  { %v647_v51 = vsel %vm63_vm6, %v631_v36, %v551_v47  ;;  %v588_v53 = vpop.xlane.xlu1 %587  ;;  %v773_v43 = vsel %vm63_vm6, %v677_v48, 0.0  ;;  %v693_v54 = vsel %vm63_vm6, 0.0, %v677_v48 }
 0x196   :  { %v630_v55 = vmul.f32 0.03125, %v588_v53  ;;  %v508_v45 = vpop.xlane.xlu0 %507  ;;  %v791_v56 = vsel %vm499_vm7, %v773_v43, 0.0  ;;  %v711_v59 = vsel %vm499_vm7, %v693_v54, 0.0  ;;  %v772_v61 = vsel %vm63_vm6, %v676_v49, 0.0 }
 0x197   :  { %v550_v60 = vmul.f32 0.03125, %v508_v45  ;;  %792 = vadd.xlane.f32.xlu1 %v791_v56  ;;  %712 = vadd.xlane.f32.xlu0 %v711_v59  ;;  %v692_v62 = vsel %vm63_vm6, 0.0, %v676_v49  ;;  %v4062_v1 = vsub.f32 %v3873_v50, %v647_v51  ;;  %v788_v9 = vsel %vm499_vm7, %v772_v61, 0.0 }
 0x198   :  { %v708_v10 = vsel %vm499_vm7, %v692_v62, 0.0 }
 0x199   :  { %v646_v2 = vsel %vm63_vm6, %v630_v55, %v550_v60  ;;  %v597_v3 = vpop.xlane.xlu1 %596  ;;  %v679_v4 = vmul.f32 %v4062_v1, %v4062_v1 }
 0x19a   :  { %v633_v6 = vmul.f32 0.03125, %v597_v3  ;;  %v517_v8 = vpop.xlane.xlu0 %516  ;;  %v4071_v12 = vsub.f32 %v3884_v57, %v646_v2 }
 0x19b   :  { %v553_v13 = vmul.f32 0.03125, %v517_v8  ;;  %789 = vadd.xlane.f32.xlu1 %v788_v9  ;;  %709 = vadd.xlane.f32.xlu0 %v708_v10  ;;  %v775_v50 = vsel %vm63_vm6, %v679_v4, 0.0  ;;  %v695_v15 = vsel %vm63_vm6, 0.0, %v679_v4 }
 0x19c   :  { %v678_v16 = vmul.f32 %v4071_v12, %v4071_v12  ;;  %v797_v57 = vsel %vm499_vm7, %v775_v50, 0.0  ;;  %v717_v20 = vsel %vm499_vm7, %v695_v15, 0.0 }
 0x19d   :  { %v649_v17 = vsel %vm63_vm6, %v633_v6, %v553_v13  ;;  %v594_v41 = vpop.xlane.xlu1 %593 }
 0x19e   :  { %v632_v18 = vmul.f32 0.03125, %v594_v41  ;;  %v514_v19 = vpop.xlane.xlu0 %513  ;;  %v4084_v22 = vsub.f32 %v3895_v0, %v649_v17  ;;  %v774_v24 = vsel %vm63_vm6, %v678_v16, 0.0  ;;  %v694_v25 = vsel %vm63_vm6, 0.0, %v678_v16 }
 0x19f   :  { %v552_v23 = vmul.f32 0.03125, %v514_v19  ;;  %798 = vadd.xlane.f32.xlu1 %v797_v57  ;;  %718 = vadd.xlane.f32.xlu0 %v717_v20  ;;  %v794_v0 = vsel %vm499_vm7, %v774_v24, 0.0  ;;  %v714_v32 = vsel %vm499_vm7, %v694_v25, 0.0 }
 0x1a0   :  { %v681_v26 = vmul.f32 %v4084_v22, %v4084_v22 }
 0x1a1   :  { %v648_v27 = vsel %vm63_vm6, %v632_v18, %v552_v23  ;;  %v603_v29 = vpop.xlane.xlu1 %602 }
 0x1a2   :  { %v635_v30 = vmul.f32 0.03125, %v603_v29  ;;  %v523_v31 = vpop.xlane.xlu0 %522  ;;  %v4097_v33 = vsub.f32 %v3906_v7, %v648_v27  ;;  %v777_v42 = vsel %vm63_vm6, %v681_v26, 0.0  ;;  %v697_v47 = vsel %vm63_vm6, 0.0, %v681_v26 }
 0x1a3   :  { %v555_v36 = vmul.f32 0.03125, %v523_v31  ;;  %795 = vadd.xlane.f32.xlu1 %v794_v0  ;;  %715 = vadd.xlane.f32.xlu0 %v714_v32  ;;  %v803_v7 = vsel %vm499_vm7, %v777_v42, 0.0  ;;  %v723_v54 = vsel %vm499_vm7, %v697_v47, 0.0 }
 0x1a4   :  { %v680_v48 = vmul.f32 %v4097_v33, %v4097_v33 }
 0x1a5   :  { %v651_v49 = vsel %vm63_vm6, %v635_v30, %v555_v36  ;;  %v600_v51 = vpop.xlane.xlu1 %599 }
 0x1a6   :  { %v634_v53 = vmul.f32 0.03125, %v600_v51  ;;  %v520_v43 = vpop.xlane.xlu0 %519  ;;  %v4110_v55 = vsub.f32 %v3917_v14, %v651_v49  ;;  %v776_v56 = vsel %vm63_vm6, %v680_v48, 0.0  ;;  %v696_v59 = vsel %vm63_vm6, 0.0, %v680_v48 }
 0x1a7   :  { %v554_v45 = vmul.f32 0.03125, %v520_v43  ;;  %804 = vadd.xlane.f32.xlu1 %v803_v7  ;;  %724 = vadd.xlane.f32.xlu0 %v723_v54  ;;  %v800_v14 = vsel %vm499_vm7, %v776_v56, 0.0  ;;  %v720_v4 = vsel %vm499_vm7, %v696_v59, 0.0 }
 0x1a8   :  { %v683_v60 = vmul.f32 %v4110_v55, %v4110_v55 }
 0x1a9   :  { %v650_v61 = vsel %vm63_vm6, %v634_v53, %v554_v45  ;;  %v609_v62 = vpop.xlane.xlu1 %608 }
 0x1aa   :  { %v637_v2 = vmul.f32 0.03125, %v609_v62  ;;  %v529_v3 = vpop.xlane.xlu0 %528  ;;  %v4123_v6 = vsub.f32 %v3928_v21, %v650_v61  ;;  %v779_v9 = vsel %vm63_vm6, %v683_v60, 0.0  ;;  %v699_v10 = vsel %vm63_vm6, 0.0, %v683_v60  ;;  %v973_v60 = vld [vmem:[%s5856_s4 + $0x8] sm:$0xff] }
 0x1ab   :  { %v557_v8 = vmul.f32 0.03125, %v529_v3  ;;  %801 = vadd.xlane.f32.xlu1 %v800_v14  ;;  %721 = vadd.xlane.f32.xlu0 %v720_v4  ;;  %v809_v21 = vsel %vm499_vm7, %v779_v9, 0.0  ;;  %v729_v41 = vsel %vm499_vm7, %v699_v10, 0.0 }
 0x1ac   :  { %v682_v13 = vmul.f32 %v4123_v6, %v4123_v6 }
 0x1ad   :  { %v653_v50 = vsel %vm63_vm6, %v637_v2, %v557_v8  ;;  %v606_v15 = vpop.xlane.xlu1 %605 }
 0x1ae   :  { %v636_v16 = vmul.f32 0.03125, %v606_v15  ;;  %v526_v17 = vpop.xlane.xlu0 %525  ;;  %v4136_v18 = vsub.f32 %v3939_v28, %v653_v50  ;;  %v778_v57 = vsel %vm63_vm6, %v682_v13, 0.0  ;;  %v698_v20 = vsel %vm63_vm6, 0.0, %v682_v13 }
 0x1af   :  { %v556_v19 = vmul.f32 0.03125, %v526_v17  ;;  %810 = vadd.xlane.f32.xlu1 %v809_v21  ;;  %730 = vadd.xlane.f32.xlu0 %v729_v41  ;;  %v806_v28 = vsel %vm499_vm7, %v778_v57, 0.0  ;;  %v726_v29 = vsel %vm499_vm7, %v698_v20, 0.0 }
 0x1b0   :  { %v685_v23 = vmul.f32 %v4136_v18, %v4136_v18 }
 0x1b1   :  { %v652_v24 = vsel %vm63_vm6, %v636_v16, %v556_v19  ;;  %v615_v25 = vpop.xlane.xlu1 %614  ;;  %v975_v16 = vld [vmem:[%s5856_s4 + $0x18] sm:$0xff] }
 0x1b2   :  { %v639_v26 = vmul.f32 0.03125, %v615_v25  ;;  %v535_v27 = vpop.xlane.xlu0 %534  ;;  %v4149_v30 = vsub.f32 %v3950_v34, %v652_v24  ;;  %v781_v0 = vsel %vm63_vm6, %v685_v23, 0.0  ;;  %v701_v32 = vsel %vm63_vm6, 0.0, %v685_v23 }
 0x1b3   :  { %v559_v31 = vmul.f32 0.03125, %v535_v27  ;;  %807 = vadd.xlane.f32.xlu1 %v806_v28  ;;  %727 = vadd.xlane.f32.xlu0 %v726_v29  ;;  %v815_v34 = vsel %vm499_vm7, %v781_v0, 0.0  ;;  %v735_v51 = vsel %vm499_vm7, %v701_v32, 0.0  ;;  %v976_v28 = vld [vmem:[%s5856_s4 + $0x20] sm:$0xff]  ;;  %v977_v29 = vld [vmem:[%s5856_s4 + $0x28] sm:$0xff] }
 0x1b4   :  { %v684_v36 = vmul.f32 %v4149_v30, %v4149_v30 }
 0x1b5   :  { %v655_v42 = vsel %vm63_vm6, %v639_v26, %v559_v31  ;;  %v612_v47 = vpop.xlane.xlu1 %611 }
 0x1b6   :  { %v638_v48 = vmul.f32 0.03125, %v612_v47  ;;  %v532_v49 = vpop.xlane.xlu0 %531  ;;  %v4162_v53 = vsub.f32 %v3961_v46, %v655_v42  ;;  %v780_v7 = vsel %vm63_vm6, %v684_v36, 0.0  ;;  %v700_v54 = vsel %vm63_vm6, 0.0, %v684_v36  ;;  %v972_v46 = vld [vmem:[%s5856_s4] sm:$0xff] }
 0x1b7   :  { %v558_v43 = vmul.f32 0.03125, %v532_v49  ;;  %816 = vadd.xlane.f32.xlu1 %v815_v34  ;;  %736 = vadd.xlane.f32.xlu0 %v735_v51  ;;  %v812_v2 = vsel %vm499_vm7, %v780_v7, 0.0  ;;  %v732_v3 = vsel %vm499_vm7, %v700_v54, 0.0  ;;  %v3324_v10 = vpack.c.bf16 %v973_v60, %v972_v46  ;;  %v978_v7 = vld [vmem:[%s5856_s4 + $0x30] sm:$0xff]  ;;  %v979_v54 = vld [vmem:[%s5856_s4 + $0x38] sm:$0xff] }
 0x1b8   :  { %v687_v45 = vmul.f32 %v4162_v53, %v4162_v53  ;;  %v3332_v34 = vpack.c.bf16 %v977_v29, %v976_v28 }
 0x1b9   :  { %v654_v56 = vsel %vm63_vm6, %v638_v48, %v558_v43  ;;  %v621_v59 = vpop.xlane.xlu1 %620  ;;  %3325 = vmatprep.subr.bf16.mxu0 %v3324_v10  ;;  %3356 = vmatprep.subr.bf16.mxu1 %v3324_v10 }
 0x1ba   :  { %v641_v61 = vmul.f32 0.03125, %v621_v59  ;;  %v541_v62 = vpop.xlane.xlu0 %540  ;;  %v4181_v14 = vsub.f32 %v3972_v52, %v654_v56  ;;  %v783_v8 = vsel %vm63_vm6, %v687_v45, 0.0  ;;  %v703_v9 = vsel %vm63_vm6, 0.0, %v687_v45  ;;  %v974_v52 = vld [vmem:[%s5856_s4 + $0x10] sm:$0xff]  ;;  %3327 = vmatpush3.bf16.msra.mxu0 %v3324_v10  ;;  %3360 = vmatpush3.bf16.msra.mxu1 %v3324_v10 }
 0x1bb   :  { %v561_v4 = vmul.f32 0.03125, %v541_v62  ;;  %813 = vadd.xlane.f32.xlu1 %v812_v2  ;;  %733 = vadd.xlane.f32.xlu0 %v732_v3  ;;  %v821_v41 = vsel %vm499_vm7, %v783_v8, 0.0  ;;  %v741_v19 = vsel %vm499_vm7, %v703_v9, 0.0  ;;  %v3328_v25 = vpack.c.bf16 %v975_v16, %v974_v52 }
 0x1bc   :  { %v686_v13 = vmul.f32 %v4181_v14, %v4181_v14  ;;  %v3336_v3 = vpack.c.bf16 %v979_v54, %v978_v7 }
 0x1bd   :  { %v657_v50 = vsel %vm63_vm6, %v641_v61, %v561_v4  ;;  %v618_v15 = vpop.xlane.xlu1 %617  ;;  %3329 = vmatprep.subr.bf16.mxu0 %v3328_v25  ;;  %3357 = vmatprep.subr.bf16.mxu1 %v3328_v25 }
 0x1be   :  { %v640_v17 = vmul.f32 0.03125, %v618_v15  ;;  %v538_v21 = vpop.xlane.xlu0 %537  ;;  %v4200_v57 = vsub.f32 %v3983_v58, %v657_v50  ;;  %v782_v23 = vsel %vm63_vm6, %v686_v13, 0.0  ;;  %v702_v24 = vsel %vm63_vm6, 0.0, %v686_v13  ;;  %3331 = vmatpush3.bf16.msra.mxu0 %v3328_v25  ;;  %3361 = vmatpush3.bf16.msra.mxu1 %v3328_v25 }
 0x1bf   :  { %v560_v20 = vmul.f32 0.03125, %v538_v21  ;;  %822 = vadd.xlane.f32.xlu1 %v821_v41  ;;  %742 = vadd.xlane.f32.xlu0 %v741_v19  ;;  %v818_v32 = vsel %vm499_vm7, %v782_v23, 0.0  ;;  %v738_v36 = vsel %vm499_vm7, %v702_v24, 0.0 }
 0x1c0   :  { %v689_v26 = vmul.f32 %v4200_v57, %v4200_v57  ;;  %3333 = vmatprep.subr.bf16.mxu0 %v3332_v34  ;;  %3358 = vmatprep.subr.bf16.mxu1 %v3332_v34 }
 0x1c1   :  { %v656_v27 = vsel %vm63_vm6, %v640_v17, %v560_v20  ;;  %v624_v58 = vpop.xlane.xlu1 %623 }
 0x1c2   :  { %v642_v31 = vmul.f32 0.03125, %v624_v58  ;;  %v544_v0 = vpop.xlane.xlu0 %543  ;;  %v4219_v42 = vsub.f32 %v3994_v63, %v656_v27  ;;  %v785_v48 = vsel %vm63_vm6, %v689_v26, 0.0  ;;  %v705_v49 = vsel %vm63_vm6, 0.0, %v689_v26  ;;  %3335 = vmatpush3.bf16.msra.mxu0 %v3332_v34  ;;  %3362 = vmatpush3.bf16.msra.mxu1 %v3332_v34 }
 0x1c3   :  { %v562_v47 = vmul.f32 0.03125, %v544_v0  ;;  %819 = vadd.xlane.f32.xlu1 %v818_v32  ;;  %739 = vadd.xlane.f32.xlu0 %v738_v36  ;;  %v827_v59 = vsel %vm499_vm7, %v785_v48, 0.0  ;;  %v747_v46 = vsel %vm499_vm7, %v705_v49, 0.0  ;;  %v918_v34 = vsub.s32 1, %v3843_v37 }
 0x1c4   :  { %v688_v51 = vmul.f32 %v4219_v42, %v4219_v42  ;;  %3337 = vmatprep.subr.bf16.mxu0 %v3336_v3  ;;  %3359 = vmatprep.subr.bf16.mxu1 %v3336_v3 }
 0x1c5   :  { %v658_v43 = vsel %vm63_vm6, %v642_v31, %v562_v47  ;;  %v627_v63 = vpop.xlane.xlu1 %626 }
 0x1c6   :  { %v643_v45 = vmul.f32 0.03125, %v627_v63  ;;  %v547_v56 = vpop.xlane.xlu0 %546  ;;  %v4238_v60 = vsub.f32 %v4005_v5, %v658_v43  ;;  %v784_v62 = vsel %vm63_vm6, %v688_v51, 0.0  ;;  %v704_v2 = vsel %vm63_vm6, 0.0, %v688_v51  ;;  %3339 = vmatpush3.bf16.msra.mxu0 %v3336_v3  ;;  %3363 = vmatpush3.bf16.msra.mxu1 %v3336_v3 }
 0x1c7   :  { %v563_v61 = vmul.f32 0.03125, %v547_v56  ;;  %828 = vadd.xlane.f32.xlu1 %v827_v59  ;;  %748 = vadd.xlane.f32.xlu0 %v747_v46  ;;  %v824_v5 = vsel %vm499_vm7, %v784_v62, 0.0  ;;  %v744_v9 = vsel %vm499_vm7, %v704_v2, 0.0  ;;  %v4279_v59 = vrot.slane %v3849_v39, %v918_v34 }
 0x1c8   :  { %v690_v4 = vmul.f32 %v4238_v60, %v4238_v60  ;;  %v938_v46 = vsub.s32 2, %v3843_v37 }
 0x1c9   :  { %v659_v8 = vsel %vm63_vm6, %v643_v45, %v563_v61 }
 0x1ca   :  { %v4251_v10 = vsub.f32 %v4016_v11, %v659_v8  ;;  %v786_v13 = vsel %vm63_vm6, %v690_v4, 0.0  ;;  %v706_v50 = vsel %vm63_vm6, 0.0, %v690_v4 }
 0x1cb   :  { %825 = vadd.xlane.f32.xlu1 %v824_v5  ;;  %745 = vadd.xlane.f32.xlu0 %v744_v9  ;;  %v830_v52 = vsel %vm499_vm7, %v786_v13, 0.0  ;;  %v750_v16 = vsel %vm499_vm7, %v706_v50, 0.0  ;;  %v4288_v13 = vrot.slane %v3849_v39, %v938_v46 }
 0x1cc   :  { %v691_v15 = vmul.f32 %v4251_v10, %v4251_v10 }
 0x1ce   :  { %v787_v11 = vsel %vm63_vm6, %v691_v15, 0.0  ;;  %v707_v17 = vsel %vm63_vm6, 0.0, %v691_v15 }
 0x1cf   :  { %831 = vadd.xlane.f32.xlu1 %v830_v52  ;;  %751 = vadd.xlane.f32.xlu0 %v750_v16  ;;  %v833_v21 = vsel %vm499_vm7, %v787_v11, 0.0  ;;  %v753_v41 = vsel %vm499_vm7, %v707_v17, 0.0 }
 0x1d3   :  { %834 = vadd.xlane.f32.xlu1 %v833_v21  ;;  %754 = vadd.xlane.f32.xlu0 %v753_v41 }
 0x224   :  { %v793_v19 = vpop.xlane.xlu1 %792  ;;  %v713_v20 = vpop.xlane.xlu0 %712 }
 0x225   :  { %v837_v23 = vmul.f32 0.03125, %v793_v19  ;;  %v757_v24 = vmul.f32 0.03125, %v713_v20 }
 0x227   :  { %v853_v25 = vsel %vm63_vm6, %v837_v23, %v757_v24 }
 0x228   :  { %v869_v26 = vadd.f32 1e-05, %v853_v25  ;;  %v790_v27 = vpop.xlane.xlu1 %789  ;;  %v710_v58 = vpop.xlane.xlu0 %709 }
 0x229   :  { %v836_v28 = vmul.f32 0.03125, %v790_v27  ;;  %v756_v29 = vmul.f32 0.03125, %v710_v58 }
 0x22a   :  { %3382 = vrsqrt.f32 %v869_v26 }
 0x22b   :  { %v852_v31 = vsel %vm63_vm6, %v836_v28, %v756_v29 }
 0x22c   :  { %v868_v0 = vadd.f32 1e-05, %v852_v31  ;;  %v799_v32 = vpop.xlane.xlu1 %798  ;;  %v719_v36 = vpop.xlane.xlu0 %718 }
 0x22d   :  { %v839_v47 = vmul.f32 0.03125, %v799_v32  ;;  %v759_v48 = vmul.f32 0.03125, %v719_v36 }
 0x22e   :  { %3384 = vrsqrt.f32 %v868_v0 }
 0x22f   :  { %v855_v49 = vsel %vm63_vm6, %v839_v47, %v759_v48 }
 0x230   :  { %v871_v51 = vadd.f32 1e-05, %v855_v49  ;;  %v796_v43 = vpop.xlane.xlu1 %795  ;;  %v716_v63 = vpop.xlane.xlu0 %715 }
 0x231   :  { %v838_v7 = vmul.f32 0.03125, %v796_v43  ;;  %v758_v54 = vmul.f32 0.03125, %v716_v63 }
 0x232   :  { %3386 = vrsqrt.f32 %v871_v51 }
 0x233   :  { %v854_v45 = vsel %vm63_vm6, %v838_v7, %v758_v54 }
 0x234   :  { %v3383_v56 = vpop.eup %3382  ;;  %v870_v61 = vadd.f32 1e-05, %v854_v45  ;;  %v805_v62 = vpop.xlane.xlu1 %804 }
 0x235   :  { %v725_v2 = vpop.xlane.xlu0 %724  ;;  %v901_v3 = vmul.f32 %v3383_v56, %v4040_v35  ;;  %v841_v4 = vmul.f32 0.03125, %v805_v62 }
 0x236   :  { %v761_v8 = vmul.f32 0.03125, %v725_v2  ;;  %3388 = vrsqrt.f32 %v870_v61 }
 0x237   :  { %v921_v50 = vmul.f32 %v4279_v59, %v901_v3 }
 0x238   :  { %v857_v5 = vsel %vm63_vm6, %v841_v4, %v761_v8  ;;  %v3385_v9 = vpop.eup %3384  ;;  %v802_v52 = vpop.xlane.xlu1 %801 }
 0x239   :  { %v873_v15 = vadd.f32 1e-05, %v857_v5  ;;  %v722_v16 = vpop.xlane.xlu0 %721  ;;  %v900_v11 = vmul.f32 %v3385_v9, %v4043_v44  ;;  %v840_v35 = vmul.f32 0.03125, %v802_v52  ;;  %v941_v20 = vadd.f32 %v4288_v13, %v921_v50 }
 0x23a   :  { %v760_v17 = vmul.f32 0.03125, %v722_v16 }
 0x23b   :  { %3390 = vrsqrt.f32 %v873_v15  ;;  %v920_v21 = vmul.f32 %v4279_v59, %v900_v11 }
 0x23c   :  { %v856_v41 = vsel %vm63_vm6, %v840_v35, %v760_v17  ;;  %v3387_v19 = vpop.eup %3386  ;;  %v811_v23 = vpop.xlane.xlu1 %810 }
 0x23d   :  { %v872_v39 = vadd.f32 1e-05, %v856_v41  ;;  %v731_v24 = vpop.xlane.xlu0 %730  ;;  %v940_v25 = vadd.f32 %v4288_v13, %v920_v21  ;;  %v903_v26 = vmul.f32 %v3387_v19, %v4062_v1  ;;  %v843_v27 = vmul.f32 0.03125, %v811_v23 }
 0x23e   :  { %v763_v44 = vmul.f32 0.03125, %v731_v24 }
 0x23f   :  { %3392 = vrsqrt.f32 %v872_v39  ;;  %v923_v29 = vmul.f32 %v4279_v59, %v903_v26 }
 0x240   :  { %3394 = vtanh.f32 %v940_v25  ;;  %v859_v58 = vsel %vm63_vm6, %v843_v27, %v763_v44  ;;  %v3389_v28 = vpop.eup %3388  ;;  %v808_v0 = vpop.xlane.xlu1 %807 }
 0x241   :  { %3396 = vtanh.f32 %v941_v20  ;;  %v875_v31 = vadd.f32 1e-05, %v859_v58  ;;  %v728_v32 = vpop.xlane.xlu0 %727  ;;  %v842_v36 = vmul.f32 0.03125, %v808_v0  ;;  %v902_v48 = vmul.f32 %v3389_v28, %v4071_v12 }
 0x242   :  { %v762_v47 = vmul.f32 0.03125, %v728_v32  ;;  %v943_v43 = vadd.f32 %v4288_v13, %v923_v29 }
 0x243   :  { %3398 = vrsqrt.f32 %v875_v31  ;;  %v922_v49 = vmul.f32 %v4279_v59, %v902_v48 }
 0x244   :  { %v858_v1 = vsel %vm63_vm6, %v842_v36, %v762_v47  ;;  %v817_v7 = vpop.xlane.xlu1 %816 }
 0x245   :  { %v3391_v51 = vpop.eup %3390  ;;  %v874_v63 = vadd.f32 1e-05, %v858_v1  ;;  %v737_v54 = vpop.xlane.xlu0 %736  ;;  %v845_v56 = vmul.f32 0.03125, %v817_v7  ;;  %v942_v62 = vadd.f32 %v4288_v13, %v922_v49 }
 0x246   :  { %v905_v45 = vmul.f32 %v3391_v51, %v4084_v22  ;;  %v765_v61 = vmul.f32 0.03125, %v737_v54 }
 0x247   :  { %3400 = vrsqrt.f32 %v874_v63 }
 0x248   :  { %v861_v12 = vsel %vm63_vm6, %v845_v56, %v765_v61  ;;  %3402 = vtanh.f32 %v942_v62  ;;  %v925_v3 = vmul.f32 %v4279_v59, %v905_v45  ;;  %v814_v8 = vpop.xlane.xlu1 %813 }
 0x249   :  { %v3393_v2 = vpop.eup %3392  ;;  %3404 = vtanh.f32 %v943_v43  ;;  %v877_v4 = vadd.f32 1e-05, %v861_v12  ;;  %v734_v5 = vpop.xlane.xlu0 %733  ;;  %v844_v22 = vmul.f32 0.03125, %v814_v8 }
 0x24a   :  { %v3395_v9 = vpop.eup %3394  ;;  %v904_v50 = vmul.f32 %v3393_v2, %v4097_v33  ;;  %v764_v15 = vmul.f32 0.03125, %v734_v5  ;;  %v945_v17 = vadd.f32 %v4288_v13, %v925_v3 }
 0x24b   :  { %v3397_v52 = vpop.eup %3396  ;;  %3406 = vrsqrt.f32 %v877_v4  ;;  %3254 = vmatprep.mubr.msk.f32.mxu0 %vm499_vm7, %v3395_v9 }
 0x24c   :  { %v924_v16 = vmul.f32 %v4279_v59, %v904_v50  ;;  %v860_v11 = vsel %vm63_vm6, %v844_v22, %v764_v15  ;;  %3255 = vmatmul.mubr.msk.f32.vlgmr.msra.gmra.mrb[16].mxu0 %vm499_vm7, %v3397_v52  ;;  %v823_v41 = vpop.xlane.xlu1 %822 }
 0x24d   :  { %v3399_v35 = vpop.eup %3398  ;;  %v876_v21 = vadd.f32 1e-05, %v860_v11  ;;  %v743_v19 = vpop.xlane.xlu0 %742  ;;  %v847_v39 = vmul.f32 0.03125, %v823_v41 }
 0x24e   :  { %v944_v33 = vadd.f32 %v4288_v13, %v924_v16  ;;  %v907_v20 = vmul.f32 %v3399_v35, %v4110_v55  ;;  %v767_v23 = vmul.f32 0.03125, %v743_v19 }
 0x24f   :  { %3408 = vrsqrt.f32 %v876_v21 }
 0x250   :  { %3410 = vtanh.f32 %v944_v33  ;;  %v863_v24 = vsel %vm63_vm6, %v847_v39, %v767_v23  ;;  %v927_v26 = vmul.f32 %v4279_v59, %v907_v20  ;;  %v820_v44 = vpop.xlane.xlu1 %819 }
 0x251   :  { %v3401_v25 = vpop.eup %3400  ;;  %3412 = vtanh.f32 %v945_v17  ;;  %v879_v27 = vadd.f32 1e-05, %v863_v24  ;;  %v740_v58 = vpop.xlane.xlu0 %739  ;;  %v846_v31 = vmul.f32 0.03125, %v820_v44 }
 0x252   :  { %v3403_v28 = vpop.eup %3402  ;;  %v906_v29 = vmul.f32 %v3401_v25, %v4123_v6  ;;  %v766_v0 = vmul.f32 0.03125, %v740_v58  ;;  %v947_v48 = vadd.f32 %v4288_v13, %v927_v26 }
 0x253   :  { %v3405_v55 = vpop.eup %3404  ;;  %3414 = vrsqrt.f32 %v879_v27  ;;  %3257 = vmatprep.mubr.msk.f32.mxu1 %vm499_vm7, %v3403_v28 }
 0x254   :  { %v926_v32 = vmul.f32 %v4279_v59, %v906_v29  ;;  %v862_v36 = vsel %vm63_vm6, %v846_v31, %v766_v0  ;;  %3258 = vmatmul.mubr.msk.f32.vlgmr.msra.gmra.mrb[0].mxu1 %vm499_vm7, %v3405_v55  ;;  %v829_v49 = vpop.xlane.xlu1 %828 }
 0x255   :  { %v3407_v47 = vpop.eup %3406  ;;  %v878_v1 = vadd.f32 1e-05, %v862_v36  ;;  %v749_v51 = vpop.xlane.xlu0 %748  ;;  %v849_v63 = vmul.f32 0.03125, %v829_v49 }
 0x256   :  { %v946_v6 = vadd.f32 %v4288_v13, %v926_v32  ;;  %v909_v43 = vmul.f32 %v3407_v47, %v4136_v18  ;;  %v769_v7 = vmul.f32 0.03125, %v749_v51 }
 0x257   :  { %3416 = vrsqrt.f32 %v878_v1 }
 0x258   :  { %3418 = vtanh.f32 %v946_v6  ;;  %v865_v54 = vsel %vm63_vm6, %v849_v63, %v769_v7  ;;  %v929_v56 = vmul.f32 %v4279_v59, %v909_v43  ;;  %v826_v62 = vpop.xlane.xlu1 %825 }
 0x259   :  { %v3409_v45 = vpop.eup %3408  ;;  %3420 = vtanh.f32 %v947_v48  ;;  %v881_v61 = vadd.f32 1e-05, %v865_v54  ;;  %v746_v12 = vpop.xlane.xlu0 %745  ;;  %v848_v4 = vmul.f32 0.03125, %v826_v62 }
 0x25a   :  { %v3411_v2 = vpop.eup %3410  ;;  %v908_v3 = vmul.f32 %v3409_v45, %v4149_v30  ;;  %v768_v8 = vmul.f32 0.03125, %v746_v12  ;;  %v949_v22 = vadd.f32 %v4288_v13, %v929_v56  ;;  %v982_v12 = vsub.s32 3, %v3843_v37 }
 0x25b   :  { %v3413_v18 = vpop.eup %3412  ;;  %3422 = vrsqrt.f32 %v881_v61  ;;  %3260 = vmatprep.mubr.msk.f32.mxu1 %vm499_vm7, %v3411_v2 }
 0x25c   :  { %v928_v5 = vmul.f32 %v4279_v59, %v908_v3  ;;  %v864_v9 = vsel %vm63_vm6, %v848_v4, %v768_v8  ;;  %3261 = vmatmul.mubr.msk.f32.gmra.mrb[2].mxu1 %vm499_vm7, %v3413_v18  ;;  %v832_v52 = vpop.xlane.xlu1 %831 }
 0x25d   :  { %v3415_v50 = vpop.eup %3414  ;;  %v880_v15 = vadd.f32 1e-05, %v864_v9  ;;  %v752_v16 = vpop.xlane.xlu0 %751  ;;  %v850_v35 = vmul.f32 0.03125, %v832_v52 }
 0x25e   :  { %v948_v30 = vadd.f32 %v4288_v13, %v928_v5  ;;  %v911_v11 = vmul.f32 %v3415_v50, %v4162_v53  ;;  %v770_v17 = vmul.f32 0.03125, %v752_v16 }
 0x25f   :  { %3424 = vrsqrt.f32 %v880_v15 }
 0x260   :  { %3426 = vtanh.f32 %v948_v30  ;;  %v866_v21 = vsel %vm63_vm6, %v850_v35, %v770_v17  ;;  %v931_v19 = vmul.f32 %v4279_v59, %v911_v11  ;;  %v835_v20 = vpop.xlane.xlu1 %834 }
 0x261   :  { %v3417_v41 = vpop.eup %3416  ;;  %3428 = vtanh.f32 %v949_v22  ;;  %v882_v33 = vadd.f32 1e-05, %v866_v21  ;;  %v755_v39 = vpop.xlane.xlu0 %754  ;;  %v851_v25 = vmul.f32 0.03125, %v835_v20 }
 0x262   :  { %v3419_v23 = vpop.eup %3418  ;;  %v910_v24 = vmul.f32 %v3417_v41, %v4181_v14  ;;  %v771_v26 = vmul.f32 0.03125, %v755_v39  ;;  %v951_v28 = vadd.f32 %v4288_v13, %v931_v19 }
 0x263   :  { %v3421_v53 = vpop.eup %3420  ;;  %3430 = vrsqrt.f32 %v882_v33  ;;  %3263 = vmatprep.mubr.msk.f32.mxu1 %vm499_vm7, %v3419_v23 }
 0x264   :  { %v930_v27 = vmul.f32 %v4279_v59, %v910_v24  ;;  %v867_v44 = vsel %vm63_vm6, %v851_v25, %v771_v26  ;;  %3264 = vmatmul.mubr.msk.f32.gmra.mrb[4].mxu1 %vm499_vm7, %v3421_v53 }
 0x265   :  { %v3423_v58 = vpop.eup %3422  ;;  %v883_v29 = vadd.f32 1e-05, %v867_v44 }
 0x266   :  { %v950_v31 = vadd.f32 %v4288_v13, %v930_v27  ;;  %v913_v14 = vmul.f32 %v3423_v58, %v4200_v57 }
 0x267   :  { %3432 = vrsqrt.f32 %v883_v29 }
 0x268   :  { %3434 = vtanh.f32 %v950_v31  ;;  %v933_v55 = vmul.f32 %v4279_v59, %v913_v14 }
 0x269   :  { %v3425_v0 = vpop.eup %3424  ;;  %3436 = vtanh.f32 %v951_v28 }
 0x26a   :  { %v3427_v32 = vpop.eup %3426  ;;  %v912_v36 = vmul.f32 %v3425_v0, %v4219_v42  ;;  %v953_v49 = vadd.f32 %v4288_v13, %v933_v55 }
 0x26b   :  { %v3429_v47 = vpop.eup %3428  ;;  %3266 = vmatprep.mubr.msk.f32.mxu1 %vm499_vm7, %v3427_v32 }
 0x26c   :  { %v932_v48 = vmul.f32 %v4279_v59, %v912_v36  ;;  %3267 = vmatmul.mubr.msk.f32.gmra.mrb[6].mxu1 %vm499_vm7, %v3429_v47 }
 0x26d   :  { %v3431_v1 = vpop.eup %3430 }
 0x26e   :  { %v952_v57 = vadd.f32 %v4288_v13, %v932_v48  ;;  %v914_v51 = vmul.f32 %v3431_v1, %v4238_v60 }
 0x270   :  { %3438 = vtanh.f32 %v952_v57  ;;  %v934_v6 = vmul.f32 %v4279_v59, %v914_v51 }
 0x271   :  { %v3433_v43 = vpop.eup %3432  ;;  %3440 = vtanh.f32 %v953_v49 }
 0x272   :  { %v3435_v42 = vpop.eup %3434  ;;  %v954_v63 = vadd.f32 %v4288_v13, %v934_v6  ;;  %v915_v7 = vmul.f32 %v3433_v43, %v4251_v10 }
 0x273   :  { %v3437_v54 = vpop.eup %3436  ;;  %3269 = vmatprep.mubr.msk.f32.mxu1 %vm499_vm7, %v3435_v42 }
 0x274   :  { %3442 = vtanh.f32 %v954_v63  ;;  %v935_v45 = vmul.f32 %v4279_v59, %v915_v7  ;;  %3270 = vmatmul.mubr.msk.f32.gmra.mrb[8].mxu1 %vm499_vm7, %v3437_v54  ;;  %v4379_v59 = vld [vmem:[%s5858_s6] sm:$0xff] }
 0x276   :  { %v955_v60 = vadd.f32 %v4288_v13, %v935_v45  ;;  %v4382_v13 = vrot.slane %v4379_v59, %v982_v12 }
 0x278   :  { %3444 = vtanh.f32 %v955_v60 }
 0x27a   :  { %v3439_v56 = vpop.eup %3438 }
 0x27b   :  { %v3441_v61 = vpop.eup %3440  ;;  %3272 = vmatprep.mubr.msk.f32.mxu1 %vm499_vm7, %v3439_v56 }
 0x27c   :  { %3273 = vmatmul.mubr.msk.f32.gmra.mrb[10].mxu1 %vm499_vm7, %v3441_v61 }
 0x27e   :  { %v3443_v62 = vpop.eup %3442 }
 0x27f   :  { %3275 = vmatprep.mubr.msk.f32.mxu1 %vm499_vm7, %v3443_v62 }
 0x282   :  { %v3445_v10 = vpop.eup %3444 }
 0x283   :  { %3276 = vmatmul.mubr.msk.f32.gmra.mrb[12].mxu1 %vm499_vm7, %v3445_v10 }
 0x31f   :  { %v3256_v2 = vpop.f32.mrb[16].mxu0 }
 0x320   :  { %v4385_v3 = vadd.f32 %v3256_v2, %v4382_v13  ;;  %v1098_v4 = vpop.f32.mrb[17].mxu0 }
 0x321   :  { %v4388_v8 = vadd.f32 %v1098_v4, %v4382_v13 }
 0x322   :  { %v1258_v18 = vsel %vm63_vm6, %v4385_v3, 0.0  ;;  %v1178_v5 = vsel %vm63_vm6, 0.0, %v4385_v3 }
 0x323   :  { %v1276_v9 = vsel %vm499_vm7, %v1258_v18, 0.0  ;;  %v1196_v50 = vsel %vm499_vm7, %v1178_v5, 0.0  ;;  %v1257_v22 = vsel %vm63_vm6, %v4388_v8, 0.0  ;;  %v1177_v15 = vsel %vm63_vm6, 0.0, %v4388_v8 }
 0x324   :  { %1277 = vadd.xlane.f32.xlu1 %v1276_v9  ;;  %1197 = vadd.xlane.f32.xlu0 %v1196_v50  ;;  %v1273_v16 = vsel %vm499_vm7, %v1257_v22, 0.0  ;;  %v1193_v30 = vsel %vm499_vm7, %v1177_v15, 0.0 }
 0x327   :  { %v3259_v52 = vpop.f32.mrb[0].mxu1 }
 0x328   :  { %v4407_v11 = vadd.f32 %v3259_v52, %v4382_v13  ;;  %1274 = vadd.xlane.f32.xlu1 %v1273_v16  ;;  %1194 = vadd.xlane.f32.xlu0 %v1193_v30  ;;  %v1108_v35 = vpop.f32.mrb[1].mxu1 }
 0x329   :  { %v4410_v17 = vadd.f32 %v1108_v35, %v4382_v13 }
 0x32a   :  { %v1260_v21 = vsel %vm63_vm6, %v4407_v11, 0.0  ;;  %v1180_v41 = vsel %vm63_vm6, 0.0, %v4407_v11 }
 0x32b   :  { %v1282_v19 = vsel %vm499_vm7, %v1260_v21, 0.0  ;;  %v1202_v33 = vsel %vm499_vm7, %v1180_v41, 0.0  ;;  %v1259_v20 = vsel %vm63_vm6, %v4410_v17, 0.0  ;;  %v1179_v39 = vsel %vm63_vm6, 0.0, %v4410_v17 }
 0x32c   :  { %1283 = vadd.xlane.f32.xlu1 %v1282_v19  ;;  %1203 = vadd.xlane.f32.xlu0 %v1202_v33  ;;  %v1279_v24 = vsel %vm499_vm7, %v1259_v20, 0.0  ;;  %v1199_v25 = vsel %vm499_vm7, %v1179_v39, 0.0 }
 0x32f   :  { %v3262_v23 = vpop.f32.mrb[2].mxu1 }
 0x330   :  { %v4429_v26 = vadd.f32 %v3262_v23, %v4382_v13  ;;  %1280 = vadd.xlane.f32.xlu1 %v1279_v24  ;;  %1200 = vadd.xlane.f32.xlu0 %v1199_v25  ;;  %v1118_v53 = vpop.f32.mrb[3].mxu1 }
 0x331   :  { %v4432_v27 = vadd.f32 %v1118_v53, %v4382_v13 }
 0x332   :  { %v1262_v44 = vsel %vm63_vm6, %v4429_v26, 0.0  ;;  %v1182_v58 = vsel %vm63_vm6, 0.0, %v4429_v26 }
 0x333   :  { %v1288_v28 = vsel %vm499_vm7, %v1262_v44, 0.0  ;;  %v1208_v29 = vsel %vm499_vm7, %v1182_v58, 0.0  ;;  %v1261_v31 = vsel %vm63_vm6, %v4432_v27, 0.0  ;;  %v1181_v14 = vsel %vm63_vm6, 0.0, %v4432_v27 }
 0x334   :  { %1289 = vadd.xlane.f32.xlu1 %v1288_v28  ;;  %1209 = vadd.xlane.f32.xlu0 %v1208_v29  ;;  %v1285_v55 = vsel %vm499_vm7, %v1261_v31, 0.0  ;;  %v1205_v32 = vsel %vm499_vm7, %v1181_v14, 0.0 }
 0x337   :  { %v3265_v0 = vpop.f32.mrb[4].mxu1 }
 0x338   :  { %v4451_v36 = vadd.f32 %v3265_v0, %v4382_v13  ;;  %1286 = vadd.xlane.f32.xlu1 %v1285_v55  ;;  %1206 = vadd.xlane.f32.xlu0 %v1205_v32  ;;  %v1128_v47 = vpop.f32.mrb[5].mxu1 }
 0x339   :  { %v4454_v48 = vadd.f32 %v1128_v47, %v4382_v13 }
 0x33a   :  { %v1264_v1 = vsel %vm63_vm6, %v4451_v36, 0.0  ;;  %v1184_v49 = vsel %vm63_vm6, 0.0, %v4451_v36 }
 0x33b   :  { %v1294_v57 = vsel %vm499_vm7, %v1264_v1, 0.0  ;;  %v1214_v51 = vsel %vm499_vm7, %v1184_v49, 0.0  ;;  %v1263_v6 = vsel %vm63_vm6, %v4454_v48, 0.0  ;;  %v1183_v43 = vsel %vm63_vm6, 0.0, %v4454_v48 }
 0x33c   :  { %1295 = vadd.xlane.f32.xlu1 %v1294_v57  ;;  %1215 = vadd.xlane.f32.xlu0 %v1214_v51  ;;  %v1291_v63 = vsel %vm499_vm7, %v1263_v6, 0.0  ;;  %v1211_v7 = vsel %vm499_vm7, %v1183_v43, 0.0 }
 0x33f   :  { %v3268_v42 = vpop.f32.mrb[6].mxu1 }
 0x340   :  { %v4473_v54 = vadd.f32 %v3268_v42, %v4382_v13  ;;  %1292 = vadd.xlane.f32.xlu1 %v1291_v63  ;;  %1212 = vadd.xlane.f32.xlu0 %v1211_v7  ;;  %v1138_v45 = vpop.f32.mrb[7].mxu1 }
 0x341   :  { %v4476_v60 = vadd.f32 %v1138_v45, %v4382_v13 }
 0x342   :  { %v1266_v56 = vsel %vm63_vm6, %v4473_v54, 0.0  ;;  %v1186_v61 = vsel %vm63_vm6, 0.0, %v4473_v54 }
 0x343   :  { %v1300_v62 = vsel %vm499_vm7, %v1266_v56, 0.0  ;;  %v1220_v10 = vsel %vm499_vm7, %v1186_v61, 0.0  ;;  %v1265_v12 = vsel %vm63_vm6, %v4476_v60, 0.0  ;;  %v1185_v2 = vsel %vm63_vm6, 0.0, %v4476_v60 }
 0x344   :  { %1301 = vadd.xlane.f32.xlu1 %v1300_v62  ;;  %1221 = vadd.xlane.f32.xlu0 %v1220_v10  ;;  %v1297_v18 = vsel %vm499_vm7, %v1265_v12, 0.0  ;;  %v1217_v5 = vsel %vm499_vm7, %v1185_v2, 0.0 }
 0x347   :  { %v3271_v4 = vpop.f32.mrb[8].mxu1 }
 0x348   :  { %v4495_v9 = vadd.f32 %v3271_v4, %v4382_v13  ;;  %1298 = vadd.xlane.f32.xlu1 %v1297_v18  ;;  %1218 = vadd.xlane.f32.xlu0 %v1217_v5  ;;  %v1148_v50 = vpop.f32.mrb[9].mxu1 }
 0x349   :  { %v4498_v22 = vadd.f32 %v1148_v50, %v4382_v13 }
 0x34a   :  { %v1268_v15 = vsel %vm63_vm6, %v4495_v9, 0.0  ;;  %v1188_v52 = vsel %vm63_vm6, 0.0, %v4495_v9 }
 0x34b   :  { %v1306_v16 = vsel %vm499_vm7, %v1268_v15, 0.0  ;;  %v1226_v30 = vsel %vm499_vm7, %v1188_v52, 0.0  ;;  %v1267_v35 = vsel %vm63_vm6, %v4498_v22, 0.0  ;;  %v1187_v21 = vsel %vm63_vm6, 0.0, %v4498_v22 }
 0x34c   :  { %1307 = vadd.xlane.f32.xlu1 %v1306_v16  ;;  %1227 = vadd.xlane.f32.xlu0 %v1226_v30  ;;  %v1303_v19 = vsel %vm499_vm7, %v1267_v35, 0.0  ;;  %v1223_v33 = vsel %vm499_vm7, %v1187_v21, 0.0 }
 0x34f   :  { %v3274_v41 = vpop.f32.mrb[10].mxu1 }
 0x350   :  { %v4517_v20 = vadd.f32 %v3274_v41, %v4382_v13  ;;  %1304 = vadd.xlane.f32.xlu1 %v1303_v19  ;;  %1224 = vadd.xlane.f32.xlu0 %v1223_v33  ;;  %v1158_v39 = vpop.f32.mrb[11].mxu1 }
 0x351   :  { %v4520_v23 = vadd.f32 %v1158_v39, %v4382_v13 }
 0x352   :  { %v1270_v24 = vsel %vm63_vm6, %v4517_v20, 0.0  ;;  %v1190_v25 = vsel %vm63_vm6, 0.0, %v4517_v20 }
 0x353   :  { %v1312_v53 = vsel %vm499_vm7, %v1270_v24, 0.0  ;;  %v1232_v44 = vsel %vm499_vm7, %v1190_v25, 0.0  ;;  %v1269_v58 = vsel %vm63_vm6, %v4520_v23, 0.0  ;;  %v1189_v28 = vsel %vm63_vm6, 0.0, %v4520_v23 }
 0x354   :  { %1313 = vadd.xlane.f32.xlu1 %v1312_v53  ;;  %1233 = vadd.xlane.f32.xlu0 %v1232_v44  ;;  %v1309_v14 = vsel %vm499_vm7, %v1269_v58, 0.0  ;;  %v1229_v0 = vsel %vm499_vm7, %v1189_v28, 0.0 }
 0x356   :  { %v3277_v29 = vpop.f32.mrb[12].mxu1 }
 0x357   :  { %v1168_v31 = vpop.f32.mrb[13].mxu1  ;;  %v4539_v55 = vadd.f32 %v3277_v29, %v4382_v13 }
 0x358   :  { %v4542_v32 = vadd.f32 %v1168_v31, %v4382_v13  ;;  %1310 = vadd.xlane.f32.xlu1 %v1309_v14  ;;  %1230 = vadd.xlane.f32.xlu0 %v1229_v0 }
 0x359   :  { %v1272_v13 = vsel %vm63_vm6, %v4539_v55, 0.0  ;;  %v1192_v51 = vsel %vm63_vm6, 0.0, %v4539_v55 }
 0x35a   :  { %v1271_v47 = vsel %vm63_vm6, %v4542_v32, 0.0  ;;  %v1191_v1 = vsel %vm63_vm6, 0.0, %v4542_v32  ;;  %v1318_v6 = vsel %vm499_vm7, %v1272_v13, 0.0  ;;  %v1238_v43 = vsel %vm499_vm7, %v1192_v51, 0.0 }
 0x35b   :  { %v1315_v49 = vsel %vm499_vm7, %v1271_v47, 0.0  ;;  %v1235_v57 = vsel %vm499_vm7, %v1191_v1, 0.0 }
 0x35c   :  { %1316 = vadd.xlane.f32.xlu1 %v1315_v49  ;;  %1236 = vadd.xlane.f32.xlu0 %v1235_v57 }
 0x360   :  { %1319 = vadd.xlane.f32.xlu1 %v1318_v6  ;;  %1239 = vadd.xlane.f32.xlu0 %v1238_v43 }
 0x3b1   :  { %v1278_v42 = vpop.xlane.xlu1 %1277  ;;  %v1198_v63 = vpop.xlane.xlu0 %1197 }
 0x3b2   :  { %v1322_v7 = vmul.f32 0.03125, %v1278_v42  ;;  %v1242_v45 = vmul.f32 0.03125, %v1198_v63 }
 0x3b4   :  { %v1338_v56 = vsel %vm63_vm6, %v1322_v7, %v1242_v45 }
 0x3b5   :  { %v1275_v61 = vpop.xlane.xlu1 %1274  ;;  %v1195_v62 = vpop.xlane.xlu0 %1194  ;;  %v4563_v10 = vsub.f32 %v4385_v3, %v1338_v56 }
 0x3b6   :  { %v1321_v12 = vmul.f32 0.03125, %v1275_v61  ;;  %v1241_v2 = vmul.f32 0.03125, %v1195_v62 }
 0x3b7   :  { %v1370_v4 = vmul.f32 %v4563_v10, %v4563_v10 }
 0x3b8   :  { %v1337_v18 = vsel %vm63_vm6, %v1321_v12, %v1241_v2 }
 0x3b9   :  { %v1284_v5 = vpop.xlane.xlu1 %1283  ;;  %v1204_v50 = vpop.xlane.xlu0 %1203  ;;  %v1466_v15 = vsel %vm63_vm6, %v1370_v4, 0.0  ;;  %v1386_v52 = vsel %vm63_vm6, 0.0, %v1370_v4  ;;  %v4574_v16 = vsub.f32 %v4388_v8, %v1337_v18 }
 0x3ba   :  { %v1324_v3 = vmul.f32 0.03125, %v1284_v5  ;;  %v1244_v30 = vmul.f32 0.03125, %v1204_v50  ;;  %v1484_v35 = vsel %vm499_vm7, %v1466_v15, 0.0  ;;  %v1404_v21 = vsel %vm499_vm7, %v1386_v52, 0.0 }
 0x3bb   :  { %1485 = vadd.xlane.f32.xlu1 %v1484_v35  ;;  %1405 = vadd.xlane.f32.xlu0 %v1404_v21  ;;  %v1369_v41 = vmul.f32 %v4574_v16, %v4574_v16 }
 0x3bc   :  { %v1340_v19 = vsel %vm63_vm6, %v1324_v3, %v1244_v30 }
 0x3bd   :  { %v1281_v33 = vpop.xlane.xlu1 %1280  ;;  %v1201_v39 = vpop.xlane.xlu0 %1200  ;;  %v1465_v8 = vsel %vm63_vm6, %v1369_v41, 0.0  ;;  %v1385_v24 = vsel %vm63_vm6, 0.0, %v1369_v41  ;;  %v4587_v25 = vsub.f32 %v4407_v11, %v1340_v19 }
 0x3be   :  { %v1323_v53 = vmul.f32 0.03125, %v1281_v33  ;;  %v1243_v44 = vmul.f32 0.03125, %v1201_v39  ;;  %v1481_v58 = vsel %vm499_vm7, %v1465_v8, 0.0  ;;  %v1401_v28 = vsel %vm499_vm7, %v1385_v24, 0.0 }
 0x3bf   :  { %1482 = vadd.xlane.f32.xlu1 %v1481_v58  ;;  %1402 = vadd.xlane.f32.xlu0 %v1401_v28  ;;  %v1372_v29 = vmul.f32 %v4587_v25, %v4587_v25 }
 0x3c0   :  { %v1339_v31 = vsel %vm63_vm6, %v1323_v53, %v1243_v44 }
 0x3c1   :  { %v1290_v14 = vpop.xlane.xlu1 %1289  ;;  %v1210_v0 = vpop.xlane.xlu0 %1209  ;;  %v1468_v11 = vsel %vm63_vm6, %v1372_v29, 0.0  ;;  %v1388_v47 = vsel %vm63_vm6, 0.0, %v1372_v29  ;;  %v4600_v1 = vsub.f32 %v4410_v17, %v1339_v31 }
 0x3c2   :  { %v1326_v49 = vmul.f32 0.03125, %v1290_v14  ;;  %v1246_v57 = vmul.f32 0.03125, %v1210_v0  ;;  %v1490_v13 = vsel %vm499_vm7, %v1468_v11, 0.0  ;;  %v1410_v51 = vsel %vm499_vm7, %v1388_v47, 0.0 }
 0x3c3   :  { %1491 = vadd.xlane.f32.xlu1 %v1490_v13  ;;  %1411 = vadd.xlane.f32.xlu0 %v1410_v51  ;;  %v1371_v6 = vmul.f32 %v4600_v1, %v4600_v1 }
 0x3c4   :  { %v1342_v43 = vsel %vm63_vm6, %v1326_v49, %v1246_v57 }
 0x3c5   :  { %v1287_v42 = vpop.xlane.xlu1 %1286  ;;  %v1207_v63 = vpop.xlane.xlu0 %1206  ;;  %v1467_v17 = vsel %vm63_vm6, %v1371_v6, 0.0  ;;  %v1387_v7 = vsel %vm63_vm6, 0.0, %v1371_v6  ;;  %v4613_v45 = vsub.f32 %v4429_v26, %v1342_v43 }
 0x3c6   :  { %v1325_v56 = vmul.f32 0.03125, %v1287_v42  ;;  %v1245_v61 = vmul.f32 0.03125, %v1207_v63  ;;  %v1487_v62 = vsel %vm499_vm7, %v1467_v17, 0.0  ;;  %v1407_v12 = vsel %vm499_vm7, %v1387_v7, 0.0 }
 0x3c7   :  { %1488 = vadd.xlane.f32.xlu1 %v1487_v62  ;;  %1408 = vadd.xlane.f32.xlu0 %v1407_v12  ;;  %v1374_v2 = vmul.f32 %v4613_v45, %v4613_v45 }
 0x3c8   :  { %v1341_v4 = vsel %vm63_vm6, %v1325_v56, %v1245_v61 }
 0x3c9   :  { %v1296_v18 = vpop.xlane.xlu1 %1295  ;;  %v1216_v5 = vpop.xlane.xlu0 %1215  ;;  %v1470_v26 = vsel %vm63_vm6, %v1374_v2, 0.0  ;;  %v1390_v50 = vsel %vm63_vm6, 0.0, %v1374_v2  ;;  %v4626_v15 = vsub.f32 %v4432_v27, %v1341_v4 }
 0x3ca   :  { %v1328_v52 = vmul.f32 0.03125, %v1296_v18  ;;  %v1248_v3 = vmul.f32 0.03125, %v1216_v5  ;;  %v1496_v30 = vsel %vm499_vm7, %v1470_v26, 0.0  ;;  %v1416_v35 = vsel %vm499_vm7, %v1390_v50, 0.0 }
 0x3cb   :  { %1497 = vadd.xlane.f32.xlu1 %v1496_v30  ;;  %1417 = vadd.xlane.f32.xlu0 %v1416_v35  ;;  %v1373_v21 = vmul.f32 %v4626_v15, %v4626_v15 }
 0x3cc   :  { %v1344_v41 = vsel %vm63_vm6, %v1328_v52, %v1248_v3 }
 0x3cd   :  { %v1293_v19 = vpop.xlane.xlu1 %1292  ;;  %v1213_v33 = vpop.xlane.xlu0 %1212  ;;  %v1469_v27 = vsel %vm63_vm6, %v1373_v21, 0.0  ;;  %v1389_v39 = vsel %vm63_vm6, 0.0, %v1373_v21  ;;  %v4639_v8 = vsub.f32 %v4451_v36, %v1344_v41 }
 0x3ce   :  { %v1327_v24 = vmul.f32 0.03125, %v1293_v19  ;;  %v1247_v53 = vmul.f32 0.03125, %v1213_v33  ;;  %v1493_v44 = vsel %vm499_vm7, %v1469_v27, 0.0  ;;  %v1413_v58 = vsel %vm499_vm7, %v1389_v39, 0.0 }
 0x3cf   :  { %1494 = vadd.xlane.f32.xlu1 %v1493_v44  ;;  %1414 = vadd.xlane.f32.xlu0 %v1413_v58  ;;  %v1376_v28 = vmul.f32 %v4639_v8, %v4639_v8 }
 0x3d0   :  { %v1343_v29 = vsel %vm63_vm6, %v1327_v24, %v1247_v53 }
 0x3d1   :  { %v1302_v31 = vpop.xlane.xlu1 %1301  ;;  %v1222_v14 = vpop.xlane.xlu0 %1221  ;;  %v1472_v36 = vsel %vm63_vm6, %v1376_v28, 0.0  ;;  %v1392_v0 = vsel %vm63_vm6, 0.0, %v1376_v28  ;;  %v4652_v11 = vsub.f32 %v4454_v48, %v1343_v29 }
 0x3d2   :  { %v1330_v47 = vmul.f32 0.03125, %v1302_v31  ;;  %v1250_v49 = vmul.f32 0.03125, %v1222_v14  ;;  %v1502_v57 = vsel %vm499_vm7, %v1472_v36, 0.0  ;;  %v1422_v13 = vsel %vm499_vm7, %v1392_v0, 0.0 }
 0x3d3   :  { %1503 = vadd.xlane.f32.xlu1 %v1502_v57  ;;  %1423 = vadd.xlane.f32.xlu0 %v1422_v13  ;;  %v1375_v51 = vmul.f32 %v4652_v11, %v4652_v11 }
 0x3d4   :  { %v1346_v6 = vsel %vm63_vm6, %v1330_v47, %v1250_v49 }
 0x3d5   :  { %v1299_v43 = vpop.xlane.xlu1 %1298  ;;  %v1219_v42 = vpop.xlane.xlu0 %1218  ;;  %v1471_v48 = vsel %vm63_vm6, %v1375_v51, 0.0  ;;  %v1391_v63 = vsel %vm63_vm6, 0.0, %v1375_v51  ;;  %v4665_v17 = vsub.f32 %v4473_v54, %v1346_v6 }
 0x3d6   :  { %v1329_v7 = vmul.f32 0.03125, %v1299_v43  ;;  %v1249_v56 = vmul.f32 0.03125, %v1219_v42  ;;  %v1499_v61 = vsel %vm499_vm7, %v1471_v48, 0.0  ;;  %v1419_v62 = vsel %vm499_vm7, %v1391_v63, 0.0 }
 0x3d7   :  { %1500 = vadd.xlane.f32.xlu1 %v1499_v61  ;;  %1420 = vadd.xlane.f32.xlu0 %v1419_v62  ;;  %v1378_v12 = vmul.f32 %v4665_v17, %v4665_v17 }
 0x3d8   :  { %v1345_v2 = vsel %vm63_vm6, %v1329_v7, %v1249_v56 }
 0x3d9   :  { %v1308_v4 = vpop.xlane.xlu1 %1307  ;;  %v1228_v18 = vpop.xlane.xlu0 %1227  ;;  %v1474_v54 = vsel %vm63_vm6, %v1378_v12, 0.0  ;;  %v1394_v5 = vsel %vm63_vm6, 0.0, %v1378_v12  ;;  %v4678_v26 = vsub.f32 %v4476_v60, %v1345_v2 }
 0x3da   :  { %v1332_v50 = vmul.f32 0.03125, %v1308_v4  ;;  %v1252_v52 = vmul.f32 0.03125, %v1228_v18  ;;  %v1508_v3 = vsel %vm499_vm7, %v1474_v54, 0.0  ;;  %v1428_v30 = vsel %vm499_vm7, %v1394_v5, 0.0 }
 0x3db   :  { %1509 = vadd.xlane.f32.xlu1 %v1508_v3  ;;  %1429 = vadd.xlane.f32.xlu0 %v1428_v30  ;;  %v1377_v35 = vmul.f32 %v4678_v26, %v4678_v26 }
 0x3dc   :  { %v1348_v21 = vsel %vm63_vm6, %v1332_v50, %v1252_v52 }
 0x3dd   :  { %v1305_v41 = vpop.xlane.xlu1 %1304  ;;  %v1225_v19 = vpop.xlane.xlu0 %1224  ;;  %v1473_v60 = vsel %vm63_vm6, %v1377_v35, 0.0  ;;  %v1393_v33 = vsel %vm63_vm6, 0.0, %v1377_v35  ;;  %v4691_v27 = vsub.f32 %v4495_v9, %v1348_v21 }
 0x3de   :  { %v1331_v39 = vmul.f32 0.03125, %v1305_v41  ;;  %v1251_v24 = vmul.f32 0.03125, %v1225_v19  ;;  %v1505_v53 = vsel %vm499_vm7, %v1473_v60, 0.0  ;;  %v1425_v44 = vsel %vm499_vm7, %v1393_v33, 0.0 }
 0x3df   :  { %1506 = vadd.xlane.f32.xlu1 %v1505_v53  ;;  %1426 = vadd.xlane.f32.xlu0 %v1425_v44  ;;  %v1380_v58 = vmul.f32 %v4691_v27, %v4691_v27 }
 0x3e0   :  { %v1347_v28 = vsel %vm63_vm6, %v1331_v39, %v1251_v24 }
 0x3e1   :  { %v1314_v29 = vpop.xlane.xlu1 %1313  ;;  %v1234_v31 = vpop.xlane.xlu0 %1233  ;;  %v1476_v9 = vsel %vm63_vm6, %v1380_v58, 0.0  ;;  %v1396_v14 = vsel %vm63_vm6, 0.0, %v1380_v58  ;;  %v4704_v36 = vsub.f32 %v4498_v22, %v1347_v28 }
 0x3e2   :  { %v1334_v0 = vmul.f32 0.03125, %v1314_v29  ;;  %v1254_v47 = vmul.f32 0.03125, %v1234_v31  ;;  %v1514_v49 = vsel %vm499_vm7, %v1476_v9, 0.0  ;;  %v1434_v57 = vsel %vm499_vm7, %v1396_v14, 0.0  ;;  %v1841_v14 = vld [vmem:[%s5857_s5] sm:$0xff] }
 0x3e3   :  { %1515 = vadd.xlane.f32.xlu1 %v1514_v49  ;;  %1435 = vadd.xlane.f32.xlu0 %v1434_v57  ;;  %v1379_v13 = vmul.f32 %v4704_v36, %v4704_v36 }
 0x3e4   :  { %v1350_v51 = vsel %vm63_vm6, %v1334_v0, %v1254_v47  ;;  %v1842_v0 = vld [vmem:[%s5857_s5 + $0x8] sm:$0xff] }
 0x3e5   :  { %v1311_v6 = vpop.xlane.xlu1 %1310  ;;  %v1231_v43 = vpop.xlane.xlu0 %1230  ;;  %v1475_v22 = vsel %vm63_vm6, %v1379_v13, 0.0  ;;  %v1395_v42 = vsel %vm63_vm6, 0.0, %v1379_v13  ;;  %v4717_v48 = vsub.f32 %v4517_v20, %v1350_v51  ;;  %v3340_v49 = vpack.c.bf16 %v1842_v0, %v1841_v14 }
 0x3e6   :  { %v1333_v63 = vmul.f32 0.03125, %v1311_v6  ;;  %v1253_v7 = vmul.f32 0.03125, %v1231_v43  ;;  %v1511_v56 = vsel %vm499_vm7, %v1475_v22, 0.0  ;;  %v1431_v61 = vsel %vm499_vm7, %v1395_v42, 0.0  ;;  %v1843_v6 = vld [vmem:[%s5857_s5 + $0x10] sm:$0xff]  ;;  %v1844_v43 = vld [vmem:[%s5857_s5 + $0x18] sm:$0xff] }
 0x3e7   :  { %1512 = vadd.xlane.f32.xlu1 %v1511_v56  ;;  %1432 = vadd.xlane.f32.xlu0 %v1431_v61  ;;  %v1382_v62 = vmul.f32 %v4717_v48, %v4717_v48  ;;  %v3344_v22 = vpack.c.bf16 %v1844_v43, %v1843_v6  ;;  %v1845_v42 = vld [vmem:[%s5857_s5 + $0x20] sm:$0xff]  ;;  %v1847_v56 = vld [vmem:[%s5857_s5 + $0x30] sm:$0xff]  ;;  %v1848_v61 = vld [vmem:[%s5857_s5 + $0x38] sm:$0xff] }
 0x3e8   :  { %v1349_v12 = vsel %vm63_vm6, %v1333_v63, %v1253_v7  ;;  %3341 = vmatprep.subr.bf16.mxu1 %v3340_v49  ;;  %v1846_v63 = vld [vmem:[%s5857_s5 + $0x28] sm:$0xff] }
 0x3e9   :  { %v1317_v2 = vpop.xlane.xlu1 %1316  ;;  %v1237_v4 = vpop.xlane.xlu0 %1236  ;;  %v1478_v20 = vsel %vm63_vm6, %v1382_v62, 0.0  ;;  %v1398_v18 = vsel %vm63_vm6, 0.0, %v1382_v62  ;;  %v4730_v54 = vsub.f32 %v4520_v23, %v1349_v12  ;;  %3343 = vmatpush3.bf16.msra.mxu1 %v3340_v49  ;;  %v3348_v7 = vpack.c.bf16 %v1846_v63, %v1845_v42 }
 0x3ea   :  { %v1335_v5 = vmul.f32 0.03125, %v1317_v2  ;;  %v1255_v50 = vmul.f32 0.03125, %v1237_v4  ;;  %v1520_v52 = vsel %vm499_vm7, %v1478_v20, 0.0  ;;  %v1440_v3 = vsel %vm499_vm7, %v1398_v18, 0.0  ;;  %3345 = vmatprep.subr.bf16.mxu1 %v3344_v22 }
 0x3eb   :  { %1521 = vadd.xlane.f32.xlu1 %v1520_v52  ;;  %1441 = vadd.xlane.f32.xlu0 %v1440_v3  ;;  %v1381_v30 = vmul.f32 %v4730_v54, %v4730_v54  ;;  %v3352_v62 = vpack.c.bf16 %v1848_v61, %v1847_v56 }
 0x3ec   :  { %v1351_v35 = vsel %vm63_vm6, %v1335_v5, %v1255_v50 }
 0x3ed   :  { %v1320_v21 = vpop.xlane.xlu1 %1319  ;;  %v1240_v41 = vpop.xlane.xlu0 %1239  ;;  %v1477_v23 = vsel %vm63_vm6, %v1381_v30, 0.0  ;;  %v1397_v19 = vsel %vm63_vm6, 0.0, %v1381_v30  ;;  %v4743_v60 = vsub.f32 %v4542_v32, %v1351_v35  ;;  %3347 = vmatpush3.bf16.msra.mxu1 %v3344_v22 }
 0x3ee   :  { %v1336_v33 = vmul.f32 0.03125, %v1320_v21  ;;  %v1256_v39 = vmul.f32 0.03125, %v1240_v41  ;;  %v1517_v24 = vsel %vm499_vm7, %v1477_v23, 0.0  ;;  %v1437_v53 = vsel %vm499_vm7, %v1397_v19, 0.0  ;;  %3349 = vmatprep.subr.bf16.mxu1 %v3348_v7 }
 0x3ef   :  { %1518 = vadd.xlane.f32.xlu1 %v1517_v24  ;;  %1438 = vadd.xlane.f32.xlu0 %v1437_v53  ;;  %v1383_v44 = vmul.f32 %v4743_v60, %v4743_v60  ;;  %v1611_v24 = vsub.s32 4, %v3843_v37 }
 0x3f0   :  { %v1352_v58 = vsel %vm63_vm6, %v1336_v33, %v1256_v39 }
 0x3f1   :  { %v1479_v28 = vsel %vm63_vm6, %v1383_v44, 0.0  ;;  %v1399_v32 = vsel %vm63_vm6, 0.0, %v1383_v44  ;;  %v4756_v29 = vsub.f32 %v4539_v55, %v1352_v58  ;;  %3351 = vmatpush3.bf16.msra.mxu1 %v3348_v7  ;;  %v4803_v14 = vrot.slane %v4379_v59, %v1611_v24 }
 0x3f2   :  { %v1523_v31 = vsel %vm499_vm7, %v1479_v28, 0.0  ;;  %v1443_v9 = vsel %vm499_vm7, %v1399_v32, 0.0  ;;  %3353 = vmatprep.subr.bf16.mxu1 %v3352_v62 }
 0x3f3   :  { %1524 = vadd.xlane.f32.xlu1 %v1523_v31  ;;  %1444 = vadd.xlane.f32.xlu0 %v1443_v9  ;;  %v1384_v47 = vmul.f32 %v4756_v29, %v4756_v29  ;;  %v1631_v31 = vsub.s32 5, %v3843_v37 }
 0x3f5   :  { %v1480_v55 = vsel %vm63_vm6, %v1384_v47, 0.0  ;;  %v1400_v57 = vsel %vm63_vm6, 0.0, %v1384_v47  ;;  %3355 = vmatpush3.bf16.msra.mxu1 %v3352_v62  ;;  %v4807_v6 = vrot.slane %v4379_v59, %v1631_v31 }
 0x3f6   :  { %v1526_v13 = vsel %vm499_vm7, %v1480_v55, 0.0  ;;  %v1446_v51 = vsel %vm499_vm7, %v1400_v57, 0.0 }
 0x3f7   :  { %1527 = vadd.xlane.f32.xlu1 %v1526_v13  ;;  %1447 = vadd.xlane.f32.xlu0 %v1446_v51 }
 0x448   :  { %v1486_v12 = vpop.xlane.xlu1 %1485  ;;  %v1406_v2 = vpop.xlane.xlu0 %1405 }
 0x449   :  { %v1530_v4 = vmul.f32 0.03125, %v1486_v12  ;;  %v1450_v20 = vmul.f32 0.03125, %v1406_v2 }
 0x44b   :  { %v1546_v18 = vsel %vm63_vm6, %v1530_v4, %v1450_v20 }
 0x44c   :  { %v1562_v5 = vadd.f32 1e-05, %v1546_v18  ;;  %v1483_v50 = vpop.xlane.xlu1 %1482  ;;  %v1403_v52 = vpop.xlane.xlu0 %1402 }
 0x44d   :  { %v1529_v3 = vmul.f32 0.03125, %v1483_v50  ;;  %v1449_v30 = vmul.f32 0.03125, %v1403_v52 }
 0x44e   :  { %3446 = vrsqrt.f32 %v1562_v5 }
 0x44f   :  { %v1545_v35 = vsel %vm63_vm6, %v1529_v3, %v1449_v30 }
 0x450   :  { %v1561_v21 = vadd.f32 1e-05, %v1545_v35  ;;  %v1492_v41 = vpop.xlane.xlu1 %1491  ;;  %v1412_v23 = vpop.xlane.xlu0 %1411 }
 0x451   :  { %v1532_v19 = vmul.f32 0.03125, %v1492_v41  ;;  %v1452_v33 = vmul.f32 0.03125, %v1412_v23 }
 0x452   :  { %3448 = vrsqrt.f32 %v1561_v21 }
 0x453   :  { %v1548_v39 = vsel %vm63_vm6, %v1532_v19, %v1452_v33 }
 0x454   :  { %v1564_v53 = vadd.f32 1e-05, %v1548_v39  ;;  %v1489_v44 = vpop.xlane.xlu1 %1488  ;;  %v1409_v58 = vpop.xlane.xlu0 %1408 }
 0x455   :  { %v1531_v28 = vmul.f32 0.03125, %v1489_v44  ;;  %v1451_v32 = vmul.f32 0.03125, %v1409_v58 }
 0x456   :  { %3450 = vrsqrt.f32 %v1564_v53 }
 0x457   :  { %v1547_v9 = vsel %vm63_vm6, %v1531_v28, %v1451_v32 }
 0x458   :  { %v3447_v0 = vpop.eup %3446  ;;  %v1563_v47 = vadd.f32 1e-05, %v1547_v9  ;;  %v1498_v49 = vpop.xlane.xlu1 %1497 }
 0x459   :  { %v1418_v55 = vpop.xlane.xlu0 %1417  ;;  %v1594_v57 = vmul.f32 %v3447_v0, %v4563_v10  ;;  %v1534_v13 = vmul.f32 0.03125, %v1498_v49 }
 0x45a   :  { %v1454_v51 = vmul.f32 0.03125, %v1418_v55  ;;  %3452 = vrsqrt.f32 %v1563_v47 }
 0x45b   :  { %v1614_v22 = vmul.f32 %v4803_v14, %v1594_v57 }
 0x45c   :  { %v1550_v43 = vsel %vm63_vm6, %v1534_v13, %v1454_v51  ;;  %v3449_v42 = vpop.eup %3448  ;;  %v1495_v7 = vpop.xlane.xlu1 %1494 }
 0x45d   :  { %v1566_v63 = vadd.f32 1e-05, %v1550_v43  ;;  %v1415_v56 = vpop.xlane.xlu0 %1414  ;;  %v1533_v61 = vmul.f32 0.03125, %v1495_v7  ;;  %v1593_v12 = vmul.f32 %v3449_v42, %v4574_v16  ;;  %v4814_v10 = vadd.f32 %v4807_v6, %v1614_v22 }
 0x45e   :  { %v1453_v62 = vmul.f32 0.03125, %v1415_v56 }
 0x45f   :  { %3454 = vrsqrt.f32 %v1566_v63  ;;  %v1613_v2 = vmul.f32 %v4803_v14, %v1593_v12  ;;  %v1650_v4 = vmin.f32 %v4814_v10, 20.0  ;;  %vm1794_vm8 = vcmp.gt.f32.partialorder %v4814_v10, 20.0 }
 0x460   :  { %v1549_v59 = vsel %vm63_vm6, %v1533_v61, %v1453_v62  ;;  %v3451_v20 = vpop.eup %3450  ;;  %v1504_v5 = vpop.xlane.xlu1 %1503 }
 0x461   :  { %v1565_v18 = vadd.f32 1e-05, %v1549_v59  ;;  %v1424_v50 = vpop.xlane.xlu0 %1423  ;;  %v1536_v52 = vmul.f32 0.03125, %v1504_v5  ;;  %v4821_v30 = vadd.f32 %v4807_v6, %v1613_v2  ;;  %v1667_v16 = vmul.f32 1.442695, %v1650_v4 }
 0x462   :  { %v1456_v3 = vmul.f32 0.03125, %v1424_v50  ;;  %v1596_v35 = vmul.f32 %v3451_v20, %v4587_v25 }
 0x463   :  { %3456 = vrsqrt.f32 %v1565_v18  ;;  %v1649_v41 = vmin.f32 %v4821_v30, 20.0  ;;  %vm1793_vm9 = vcmp.gt.f32.partialorder %v4821_v30, 20.0 }
 0x464   :  { %v1552_v21 = vsel %vm63_vm6, %v1536_v52, %v1456_v3  ;;  %3458 = vpow2.f32 %v1667_v16  ;;  %v3453_v23 = vpop.eup %3452  ;;  %v1501_v33 = vpop.xlane.xlu1 %1500  ;;  %v1616_v24 = vmul.f32 %v4803_v14, %v1596_v35 }
 0x465   :  { %v1568_v19 = vadd.f32 1e-05, %v1552_v21  ;;  %v1421_v39 = vpop.xlane.xlu0 %1420  ;;  %v1535_v53 = vmul.f32 0.03125, %v1501_v33  ;;  %v1665_v58 = vmul.f32 1.442695, %v1649_v41  ;;  %v1595_v28 = vmul.f32 %v3453_v23, %v4600_v1 }
 0x466   :  { %v1455_v44 = vmul.f32 0.03125, %v1421_v39  ;;  %v4830_v25 = vadd.f32 %v4807_v6, %v1616_v24 }
 0x467   :  { %3460 = vrsqrt.f32 %v1568_v19  ;;  %v1615_v31 = vmul.f32 %v4803_v14, %v1595_v28 }
 0x468   :  { %v1551_v32 = vsel %vm63_vm6, %v1535_v53, %v1455_v44  ;;  %3462 = vpow2.f32 %v1665_v58  ;;  %v1510_v47 = vpop.xlane.xlu1 %1509  ;;  %v1652_v55 = vmin.f32 %v4830_v25, 20.0  ;;  %vm1796_vm11 = vcmp.gt.f32.partialorder %v4830_v25, 20.0 }
 0x469   :  { %v3455_v9 = vpop.eup %3454  ;;  %v1567_v0 = vadd.f32 1e-05, %v1551_v32  ;;  %v1430_v49 = vpop.xlane.xlu0 %1429  ;;  %v1538_v57 = vmul.f32 0.03125, %v1510_v47  ;;  %v4837_v1 = vadd.f32 %v4807_v6, %v1615_v31 }
 0x46a   :  { %v1458_v13 = vmul.f32 0.03125, %v1430_v49  ;;  %v1598_v51 = vmul.f32 %v3455_v9, %v4613_v45  ;;  %v1671_v43 = vmul.f32 1.442695, %v1652_v55 }
 0x46b   :  { %3464 = vrsqrt.f32 %v1567_v0  ;;  %v1651_v42 = vmin.f32 %v4837_v1, 20.0  ;;  %vm1795_vm10 = vcmp.gt.f32.partialorder %v4837_v1, 20.0 }
 0x46c   :  { %v1554_v22 = vsel %vm63_vm6, %v1538_v57, %v1458_v13  ;;  %v1618_v63 = vmul.f32 %v4803_v14, %v1598_v51  ;;  %v1507_v61 = vpop.xlane.xlu1 %1506  ;;  %3466 = vpow2.f32 %v1671_v43 }
 0x46d   :  { %v3457_v7 = vpop.eup %3456  ;;  %v1570_v56 = vadd.f32 1e-05, %v1554_v22  ;;  %v1427_v62 = vpop.xlane.xlu0 %1426  ;;  %v1537_v59 = vmul.f32 0.03125, %v1507_v61  ;;  %v1669_v4 = vmul.f32 1.442695, %v1651_v42 }
 0x46e   :  { %v3459_v12 = vpop.eup %3458  ;;  %v1457_v2 = vmul.f32 0.03125, %v1427_v62  ;;  %v1597_v45 = vmul.f32 %v3457_v7, %v4626_v15  ;;  %v4846_v5 = vadd.f32 %v4807_v6, %v1618_v63 }
 0x46f   :  { %3468 = vrsqrt.f32 %v1570_v56  ;;  %v1698_v20 = vmul.f32 %v3459_v12, %v3459_v12  ;;  %v1714_v18 = vmul.f32 2.0, %v3459_v12 }
 0x470   :  { %v1553_v50 = vsel %vm63_vm6, %v1537_v59, %v1457_v2  ;;  %3470 = vpow2.f32 %v1669_v4  ;;  %v1617_v52 = vmul.f32 %v4803_v14, %v1597_v45  ;;  %v1516_v35 = vpop.xlane.xlu1 %1515  ;;  %v1654_v15 = vmin.f32 %v4846_v5, 20.0 }
 0x471   :  { %v3461_v3 = vpop.eup %3460  ;;  %v1569_v16 = vadd.f32 1e-05, %v1553_v50  ;;  %v1436_v21 = vpop.xlane.xlu0 %1435  ;;  %v4851_v41 = vadd.f32 %v1714_v18, %v1698_v20  ;;  %v1540_v19 = vmul.f32 0.03125, %v1516_v35  ;;  %vm1798_vm12 = vcmp.gt.f32.partialorder %v4846_v5, 20.0 }
 0x472   :  { %v3463_v23 = vpop.eup %3462  ;;  %v1460_v33 = vmul.f32 0.03125, %v1436_v21  ;;  %v4855_v39 = vadd.f32 %v4807_v6, %v1617_v52  ;;  %v1600_v24 = vmul.f32 %v3461_v3, %v4639_v8  ;;  %v1675_v31 = vmul.f32 1.442695, %v1654_v15 }
 0x473   :  { %3472 = vrsqrt.f32 %v1569_v16  ;;  %v1697_v53 = vmul.f32 %v3463_v23, %v3463_v23  ;;  %v1713_v44 = vmul.f32 2.0, %v3463_v23  ;;  %v1746_v58 = vadd.f32 2.0, %v4851_v41 }
 0x474   :  { %v1556_v28 = vsel %vm63_vm6, %v1540_v19, %v1460_v33  ;;  %v1653_v32 = vmin.f32 %v4855_v39, 20.0  ;;  %v1513_v0 = vpop.xlane.xlu1 %1512  ;;  %v1620_v55 = vmul.f32 %v4803_v14, %v1600_v24  ;;  %vm1797_vm13 = vcmp.gt.f32.partialorder %v4855_v39, 20.0 }
 0x475   :  { %v3465_v9 = vpop.eup %3464  ;;  %v1433_v47 = vpop.xlane.xlu0 %1432  ;;  %v4862_v49 = vadd.f32 %v1713_v44, %v1697_v53  ;;  %3474 = vrcp.f32 %v1746_v58  ;;  %v1539_v8 = vmul.f32 0.03125, %v1513_v0  ;;  %v1572_v43 = vadd.f32 1e-05, %v1556_v28 }
 0x476   :  { %v1459_v57 = vmul.f32 0.03125, %v1433_v47  ;;  %v1673_v13 = vmul.f32 1.442695, %v1653_v32  ;;  %3476 = vpow2.f32 %v1675_v31  ;;  %v3467_v51 = vpop.eup %3466  ;;  %v1599_v42 = vmul.f32 %v3465_v9, %v4652_v11 }
 0x477   :  { %v1745_v22 = vadd.f32 2.0, %v4862_v49  ;;  %v4868_v63 = vadd.f32 %v4807_v6, %v1620_v55  ;;  %v1700_v56 = vmul.f32 %v3467_v51, %v3467_v51  ;;  %v1716_v61 = vmul.f32 2.0, %v3467_v51 }
 0x478   :  { %v1555_v7 = vsel %vm63_vm6, %v1539_v8, %v1459_v57  ;;  %3478 = vpow2.f32 %v1673_v13  ;;  %v1522_v59 = vpop.xlane.xlu1 %1521  ;;  %v1619_v4 = vmul.f32 %v4803_v14, %v1599_v42 }
 0x479   :  { %v3469_v62 = vpop.eup %3468  ;;  %v1571_v12 = vadd.f32 1e-05, %v1555_v7  ;;  %v1442_v2 = vpop.xlane.xlu0 %1441  ;;  %3480 = vrcp.f32 %v1745_v22  ;;  %v1656_v45 = vmin.f32 %v4868_v63, 20.0  ;;  %v1542_v11 = vmul.f32 0.03125, %v1522_v59 }
 0x47a   :  { %v3471_v20 = vpop.eup %3470  ;;  %v1462_v18 = vmul.f32 0.03125, %v1442_v2  ;;  %v4874_v50 = vadd.f32 %v1716_v61, %v1700_v56  ;;  %3482 = vrsqrt.f32 %v1572_v43  ;;  %v4877_v16 = vadd.f32 %v4807_v6, %v1619_v4 }
 0x47b   :  { %v1699_v52 = vmul.f32 %v3471_v20, %v3471_v20  ;;  %v1715_v3 = vmul.f32 2.0, %v3471_v20  ;;  %v1679_v15 = vmul.f32 1.442695, %v1656_v45  ;;  %v1602_v23 = vmul.f32 %v3469_v62, %v4665_v17 }
 0x47c   :  { %v1558_v35 = vsel %vm63_vm6, %v1542_v11, %v1462_v18  ;;  %v1748_v21 = vadd.f32 2.0, %v4874_v50  ;;  %3484 = vrsqrt.f32 %v1571_v12  ;;  %v1519_v24 = vpop.xlane.xlu1 %1518  ;;  %v1655_v58 = vmin.f32 %v4877_v16, 20.0 }
 0x47d   :  { %v3473_v19 = vpop.eup %3472  ;;  %v1574_v33 = vadd.f32 1e-05, %v1558_v35  ;;  %v1439_v53 = vpop.xlane.xlu0 %1438  ;;  %v4883_v44 = vadd.f32 %v1715_v3, %v1699_v52  ;;  %v1541_v28 = vmul.f32 0.03125, %v1519_v24  ;;  %v1622_v47 = vmul.f32 %v4803_v14, %v1602_v23 }
 0x47e   :  { %v1461_v32 = vmul.f32 0.03125, %v1439_v53  ;;  %3486 = vrcp.f32 %v1748_v21  ;;  %v1601_v31 = vmul.f32 %v3473_v19, %v4678_v26  ;;  %v1677_v0 = vmul.f32 1.442695, %v1655_v58 }
 0x47f   :  { %v3475_v9 = vpop.eup %3474  ;;  %3488 = vrsqrt.f32 %v1574_v33  ;;  %v1747_v17 = vadd.f32 2.0, %v4883_v44  ;;  %vm1799_vm14 = vcmp.gt.f32.partialorder %v4877_v16, 20.0  ;;  %vm1800_vm15 = vcmp.gt.f32.partialorder %v4868_v63, 20.0 }
 0x480   :  { %v3477_v55 = vpop.eup %3476  ;;  %v1557_v8 = vsel %vm63_vm6, %v1541_v28, %v1461_v32  ;;  %v1764_v57 = vmul.f32 %v3475_v9, %v4851_v41  ;;  %3490 = vpow2.f32 %v1679_v15  ;;  %v1621_v13 = vmul.f32 %v4803_v14, %v1601_v31  ;;  %v1525_v43 = vpop.xlane.xlu1 %1524 }
 0x481   :  { %v1573_v51 = vadd.f32 1e-05, %v1557_v8  ;;  %v1445_v22 = vpop.xlane.xlu0 %1444  ;;  %3492 = vrcp.f32 %v1747_v17  ;;  %v1702_v26 = vmul.f32 %v3477_v55, %v3477_v55  ;;  %v1718_v42 = vmul.f32 2.0, %v3477_v55 }
 0x482   :  { %v3479_v7 = vpop.eup %3478  ;;  %v1543_v56 = vmul.f32 0.03125, %v1525_v43  ;;  %v1463_v61 = vmul.f32 0.03125, %v1445_v22  ;;  %v1810_v62 = vmul.f32 %v1764_v57, %v4814_v10  ;;  %3494 = vpow2.f32 %v1677_v0 }
 0x483   :  { %v3481_v12 = vpop.eup %3480  ;;  %3496 = vrsqrt.f32 %v1573_v51  ;;  %v1701_v59 = vmul.f32 %v3479_v7, %v3479_v7  ;;  %v1717_v2 = vmul.f32 2.0, %v3479_v7  ;;  %v4895_v41 = vadd.f32 %v1718_v42, %v1702_v26 }
 0x484   :  { %v1559_v4 = vsel %vm63_vm6, %v1543_v56, %v1463_v61  ;;  %v1762_v45 = vmul.f32 %v3481_v12, %v4862_v49  ;;  %v4902_v20 = vadd.f32 %v4807_v6, %v1621_v13  ;;  %v3483_v11 = vpop.eup %3482  ;;  %v1528_v52 = vpop.xlane.xlu1 %1527  ;;  %v4908_v15 = vadd.f32 %v4807_v6, %v1622_v47 }
 0x485   :  { %v1575_v18 = vadd.f32 1e-05, %v1559_v4  ;;  %v1448_v3 = vpop.xlane.xlu0 %1447  ;;  %v4904_v35 = vadd.f32 %v1717_v2, %v1701_v59  ;;  %v1750_v21 = vadd.f32 2.0, %v4895_v41  ;;  %v1544_v23 = vmul.f32 0.03125, %v1528_v52 }
 0x486   :  { %v1464_v19 = vmul.f32 0.03125, %v1448_v3  ;;  %v1809_v49 = vmul.f32 %v1762_v45, %v4821_v30  ;;  %v1657_v33 = vmin.f32 %v4902_v20, 20.0  ;;  %v3485_v24 = vpop.eup %3484  ;;  %v1826_v53 = vsel %vm1794_vm8, %v4814_v10, %v1810_v62 }
 0x487   :  { %3498 = vrsqrt.f32 %v1575_v18  ;;  %v1749_v58 = vadd.f32 2.0, %v4904_v35  ;;  %v1658_v28 = vmin.f32 %v4908_v15, 20.0  ;;  %v1603_v57 = vmul.f32 %v3485_v24, %v4704_v36 }
 0x488   :  { %v3487_v32 = vpop.eup %3486  ;;  %v1560_v31 = vsel %vm63_vm6, %v1544_v23, %v1464_v19  ;;  %v1825_v9 = vsel %vm1793_vm9, %v4821_v30, %v1809_v49  ;;  %3500 = vrcp.f32 %v1750_v21  ;;  %v1681_v17 = vmul.f32 1.442695, %v1657_v33 }
 0x489   :  { %v3489_v0 = vpop.eup %3488  ;;  %v1576_v47 = vadd.f32 1e-05, %v1560_v31  ;;  %3294 = vmatprep.mubr.msk.f32.mxu1 %vm499_vm7, %v1825_v9  ;;  %v1768_v10 = vmul.f32 %v3487_v32, %v4874_v50  ;;  %3502 = vrcp.f32 %v1749_v58  ;;  %v1683_v55 = vmul.f32 1.442695, %v1658_v28 }
 0x48a   :  { %v3491_v8 = vpop.eup %3490  ;;  %3295 = vmatmul.mubr.msk.f32.vlgmr.msra.gmra.mrb[14].mxu1 %vm499_vm7, %v1826_v53  ;;  %3504 = vpow2.f32 %v1681_v17  ;;  %v1604_v13 = vmul.f32 %v3483_v11, %v4691_v27  ;;  %v1623_v50 = vmul.f32 %v4803_v14, %v1603_v57  ;;  %v1606_v45 = vmul.f32 %v3489_v0, %v4717_v48 }
 0x48b   :  { %v3493_v51 = vpop.eup %3492  ;;  %3506 = vrsqrt.f32 %v1576_v47  ;;  %v1704_v30 = vmul.f32 %v3491_v8, %v3491_v8  ;;  %v1720_v43 = vmul.f32 2.0, %v3491_v8  ;;  %v1812_v56 = vmul.f32 %v1768_v10, %v4830_v25 }
 0x48c   :  { %v3495_v22 = vpop.eup %3494  ;;  %v1766_v26 = vmul.f32 %v3493_v51, %v4883_v44  ;;  %3508 = vpow2.f32 %v1683_v55  ;;  %v1624_v42 = vmul.f32 %v4803_v14, %v1604_v13  ;;  %v4935_v12 = vadd.f32 %v4807_v6, %v1623_v50 }
 0x48d   :  { %v3497_v7 = vpop.eup %3496  ;;  %v1703_v61 = vmul.f32 %v3495_v22, %v3495_v22  ;;  %v1719_v62 = vmul.f32 2.0, %v3495_v22  ;;  %v4931_v36 = vadd.f32 %v1720_v43, %v1704_v30  ;;  %v1626_v49 = vmul.f32 %v4803_v14, %v1606_v45 }
 0x48e   :  { %v1811_v27 = vmul.f32 %v1766_v26, %v4837_v1  ;;  %v4938_v59 = vadd.f32 %v4807_v6, %v1624_v42  ;;  %v1605_v44 = vmul.f32 %v3497_v7, %v4730_v54  ;;  %v1659_v18 = vmin.f32 %v4935_v12, 20.0 }
 0x48f   :  { %v4942_v2 = vadd.f32 %v1719_v62, %v1703_v61  ;;  %v1752_v4 = vadd.f32 2.0, %v4931_v36  ;;  %v1828_v54 = vsel %vm1796_vm11, %v4830_v25, %v1812_v56  ;;  %v4963_v32 = vadd.f32 %v4807_v6, %v1626_v49 }
 0x490   :  { %v1827_v11 = vsel %vm1795_vm10, %v4837_v1, %v1811_v27  ;;  %v1660_v52 = vmin.f32 %v4938_v59, 20.0  ;;  %v1625_v23 = vmul.f32 %v4803_v14, %v1605_v44  ;;  %v1685_v48 = vmul.f32 1.442695, %v1659_v18 }
 0x491   :  { %v3499_v3 = vpop.eup %3498  ;;  %3297 = vmatprep.mubr.msk.f32.mxu1 %vm499_vm7, %v1827_v11  ;;  %v1751_v21 = vadd.f32 2.0, %v4942_v2  ;;  %3510 = vrcp.f32 %v1752_v4  ;;  %vm1801_vm0 = vcmp.gt.f32.partialorder %v4902_v20, 20.0  ;;  %vm1802_vm1 = vcmp.gt.f32.partialorder %v4908_v15, 20.0 }
 0x492   :  { %v3501_v19 = vpop.eup %3500  ;;  %3298 = vmatmul.mubr.msk.f32.gmra.mrb[16].mxu1 %vm499_vm7, %v1828_v54  ;;  %v1687_v1 = vmul.f32 1.442695, %v1660_v52  ;;  %v1607_v33 = vmul.f32 %v3499_v3, %v4743_v60  ;;  %v4959_v25 = vadd.f32 %v4807_v6, %v1625_v23  ;;  %vm1803_vm2 = vcmp.gt.f32.partialorder %v4935_v12, 20.0 }
 0x493   :  { %v3503_v24 = vpop.eup %3502  ;;  %v1772_v53 = vmul.f32 %v3501_v19, %v4895_v41  ;;  %3512 = vrcp.f32 %v1751_v21  ;;  %vm1804_vm3 = vcmp.gt.f32.partialorder %v4938_v59, 20.0  ;;  %vm1806_vm5 = vcmp.gt.f32.partialorder %v4963_v32, 20.0 }
 0x494   :  { %v3505_v58 = vpop.eup %3504  ;;  %v1770_v28 = vmul.f32 %v3503_v24, %v4904_v35  ;;  %3514 = vpow2.f32 %v1685_v48  ;;  %v1627_v31 = vmul.f32 %v4803_v14, %v1607_v33  ;;  %v1661_v10 = vmin.f32 %v4959_v25, 20.0 }
 0x495   :  { %v3507_v9 = vpop.eup %3506  ;;  %v1814_v17 = vmul.f32 %v1772_v53, %v4846_v5  ;;  %v1705_v60 = vmul.f32 %v3505_v58, %v3505_v58  ;;  %v1721_v0 = vmul.f32 2.0, %v3505_v58  ;;  %3516 = vpow2.f32 %v1687_v1 }
 0x496   :  { %v3509_v41 = vpop.eup %3508  ;;  %v1813_v47 = vmul.f32 %v1770_v28, %v4855_v39  ;;  %v1662_v35 = vmin.f32 %v4963_v32, 20.0  ;;  %v1689_v30 = vmul.f32 1.442695, %v1661_v10  ;;  %v4976_v50 = vadd.f32 %v4807_v6, %v1627_v31 }
 0x497   :  { %v1737_v55 = vadd.f32 %v1721_v0, %v1705_v60  ;;  %v1706_v8 = vmul.f32 %v3509_v41, %v3509_v41  ;;  %v1722_v57 = vmul.f32 2.0, %v3509_v41  ;;  %v1830_v51 = vsel %vm1798_vm12, %v4846_v5, %v1814_v17 }
 0x498   :  { %v1829_v13 = vsel %vm1797_vm13, %v4855_v39, %v1813_v47  ;;  %v1691_v43 = vmul.f32 1.442695, %v1662_v35  ;;  %v1608_v42 = vmul.f32 %v3507_v9, %v4756_v29  ;;  %3518 = vpow2.f32 %v1689_v30 }
 0x499   :  { %3300 = vmatprep.mubr.msk.f32.mxu1 %vm499_vm7, %v1829_v13  ;;  %v1753_v22 = vadd.f32 2.0, %v1737_v55  ;;  %v1738_v26 = vadd.f32 %v1722_v57, %v1706_v8  ;;  %v1663_v39 = vmin.f32 %v4976_v50, 20.0  ;;  %vm1805_vm4 = vcmp.gt.f32.partialorder %v4959_v25, 20.0 }
 0x49a   :  { %3301 = vmatmul.mubr.msk.f32.gmra.mrb[18].mxu1 %vm499_vm7, %v1830_v51  ;;  %v1628_v61 = vmul.f32 %v4803_v14, %v1608_v42  ;;  %vm1807_vm8 = vcmp.gt.f32.partialorder %v4976_v50, 20.0 }
 0x49b   :  { %v3511_v7 = vpop.eup %3510  ;;  %3520 = vrcp.f32 %v1753_v22  ;;  %v1754_v56 = vadd.f32 2.0, %v1738_v26  ;;  %v1693_v27 = vmul.f32 1.442695, %v1663_v39 }
 0x49c   :  { %v1776_v5 = vmul.f32 %v3511_v7, %v4931_v36  ;;  %3522 = vpow2.f32 %v1691_v43  ;;  %v4985_v29 = vadd.f32 %v4807_v6, %v1628_v61 }
 0x49d   :  { %v3513_v62 = vpop.eup %3512  ;;  %3524 = vrcp.f32 %v1754_v56 }
 0x49e   :  { %v3515_v44 = vpop.eup %3514  ;;  %v1774_v4 = vmul.f32 %v3513_v62, %v4942_v2  ;;  %v1816_v11 = vmul.f32 %v1776_v5, %v4868_v63  ;;  %3526 = vpow2.f32 %v1693_v27  ;;  %v1664_v21 = vmin.f32 %v4985_v29, 20.0 }
 0x49f   :  { %v3517_v45 = vpop.eup %3516  ;;  %v1707_v18 = vmul.f32 %v3515_v44, %v3515_v44  ;;  %v1723_v52 = vmul.f32 2.0, %v3515_v44  ;;  %vm1808_vm9 = vcmp.gt.f32.partialorder %v4985_v29, 20.0 }
 0x4a0   :  { %v1815_v36 = vmul.f32 %v1774_v4, %v4877_v16  ;;  %v1708_v3 = vmul.f32 %v3517_v45, %v3517_v45  ;;  %v1724_v54 = vmul.f32 2.0, %v3517_v45  ;;  %v1832_v23 = vsel %vm1800_vm15, %v4868_v63, %v1816_v11 }
 0x4a1   :  { %v1739_v14 = vadd.f32 %v1723_v52, %v1707_v18  ;;  %v1695_v48 = vmul.f32 1.442695, %v1664_v21 }
 0x4a2   :  { %v1831_v2 = vsel %vm1799_vm14, %v4877_v16, %v1815_v36  ;;  %v1740_v6 = vadd.f32 %v1724_v54, %v1708_v3  ;;  %v3519_v1 = vpop.eup %3518 }
 0x4a3   :  { %3303 = vmatprep.mubr.msk.f32.mxu1 %vm499_vm7, %v1831_v2  ;;  %v1755_v19 = vadd.f32 2.0, %v1739_v14  ;;  %v1709_v24 = vmul.f32 %v3519_v1, %v3519_v1  ;;  %v1725_v53 = vmul.f32 2.0, %v3519_v1 }
 0x4a4   :  { %3304 = vmatmul.mubr.msk.f32.gmra.mrb[20].mxu1 %vm499_vm7, %v1832_v23  ;;  %v1756_v49 = vadd.f32 2.0, %v1740_v6  ;;  %v5032_v23 = vld [vmem:[%s5858_s6] sm:$0xff] }
 0x4a5   :  { %v3521_v33 = vpop.eup %3520  ;;  %3528 = vrcp.f32 %v1755_v19  ;;  %v1741_v31 = vadd.f32 %v1725_v53, %v1709_v24 }
 0x4a6   :  { %v3523_v58 = vpop.eup %3522  ;;  %v1778_v28 = vmul.f32 %v3521_v33, %v1737_v55  ;;  %3530 = vrcp.f32 %v1756_v49 }
 0x4a7   :  { %v3525_v16 = vpop.eup %3524  ;;  %v1710_v9 = vmul.f32 %v3523_v58, %v3523_v58  ;;  %v1726_v17 = vmul.f32 2.0, %v3523_v58  ;;  %3532 = vpow2.f32 %v1695_v48  ;;  %v1757_v41 = vadd.f32 2.0, %v1741_v31 }
 0x4a8   :  { %v1817_v63 = vmul.f32 %v1778_v28, %v4902_v20  ;;  %v1780_v60 = vmul.f32 %v3525_v16, %v1738_v26  ;;  %v3527_v0 = vpop.eup %3526 }
 0x4a9   :  { %v1742_v47 = vadd.f32 %v1726_v17, %v1710_v9  ;;  %v1711_v8 = vmul.f32 %v3527_v0, %v3527_v0  ;;  %v1727_v55 = vmul.f32 2.0, %v3527_v0  ;;  %3534 = vrcp.f32 %v1757_v41 }
 0x4aa   :  { %v1833_v10 = vsel %vm1801_vm0, %v4902_v20, %v1817_v63  ;;  %v1818_v35 = vmul.f32 %v1780_v60, %v4908_v15 }
 0x4ab   :  { %3306 = vmatprep.mubr.msk.f32.mxu1 %vm499_vm7, %v1833_v10  ;;  %v1758_v57 = vadd.f32 2.0, %v1742_v47  ;;  %v1743_v51 = vadd.f32 %v1727_v55, %v1711_v8 }
 0x4ac   :  { %v1834_v13 = vsel %vm1802_vm1, %v4908_v15, %v1818_v35 }
 0x4ad   :  { %3307 = vmatmul.mubr.msk.f32.gmra.mrb[22].mxu1 %vm499_vm7, %v1834_v13  ;;  %3536 = vrcp.f32 %v1758_v57  ;;  %v1759_v30 = vadd.f32 2.0, %v1743_v51 }
 0x4af   :  { %v3529_v43 = vpop.eup %3528  ;;  %3538 = vrcp.f32 %v1759_v30 }
 0x4b0   :  { %v3531_v22 = vpop.eup %3530  ;;  %v1782_v20 = vmul.f32 %v3529_v43, %v1739_v14 }
 0x4b1   :  { %v3533_v26 = vpop.eup %3532  ;;  %v1784_v42 = vmul.f32 %v3531_v22, %v1740_v6 }
 0x4b2   :  { %v1819_v7 = vmul.f32 %v1782_v20, %v4935_v12  ;;  %v1712_v56 = vmul.f32 %v3533_v26, %v3533_v26  ;;  %v1728_v39 = vmul.f32 2.0, %v3533_v26 }
 0x4b3   :  { %v1820_v5 = vmul.f32 %v1784_v42, %v4938_v59  ;;  %v3535_v62 = vpop.eup %3534 }
 0x4b4   :  { %v1835_v15 = vsel %vm1803_vm2, %v4935_v12, %v1819_v7  ;;  %v1744_v61 = vadd.f32 %v1728_v39, %v1712_v56  ;;  %v1786_v44 = vmul.f32 %v3535_v62, %v1741_v31 }
 0x4b5   :  { %3309 = vmatprep.mubr.msk.f32.mxu1 %vm499_vm7, %v1835_v15  ;;  %v1836_v27 = vsel %vm1804_vm3, %v4938_v59, %v1820_v5 }
 0x4b6   :  { %3310 = vmatmul.mubr.msk.f32.gmra.mrb[24].mxu1 %vm499_vm7, %v1836_v27  ;;  %v1760_v4 = vadd.f32 2.0, %v1744_v61  ;;  %v1821_v11 = vmul.f32 %v1786_v44, %v4959_v25 }
 0x4b7   :  { %v3537_v45 = vpop.eup %3536 }
 0x4b8   :  { %v1788_v18 = vmul.f32 %v3537_v45, %v1742_v47  ;;  %3540 = vrcp.f32 %v1760_v4  ;;  %v1837_v52 = vsel %vm1805_vm4, %v4959_v25, %v1821_v11 }
 0x4b9   :  { %v3539_v12 = vpop.eup %3538  ;;  %3312 = vmatprep.mubr.msk.f32.mxu1 %vm499_vm7, %v1837_v52 }
 0x4ba   :  { %v1822_v36 = vmul.f32 %v1788_v18, %v4963_v32  ;;  %v1790_v59 = vmul.f32 %v3539_v12, %v1743_v51 }
 0x4bc   :  { %v1838_v3 = vsel %vm1806_vm5, %v4963_v32, %v1822_v36  ;;  %v1823_v54 = vmul.f32 %v1790_v59, %v4976_v50  ;;  %v1851_v32 = vsub.s32 6, %v3843_v37 }
 0x4bd   :  { %3313 = vmatmul.mubr.msk.f32.gmra.mrb[26].mxu1 %vm499_vm7, %v1838_v3 }
 0x4be   :  { %v1839_v14 = vsel %vm1807_vm8, %v4976_v50, %v1823_v54  ;;  %v5035_v50 = vrot.slane %v5032_v23, %v1851_v32 }
 0x4bf   :  { %3315 = vmatprep.mubr.msk.f32.mxu1 %vm499_vm7, %v1839_v14 }
 0x4c2   :  { %v3541_v25 = vpop.eup %3540 }
 0x4c3   :  { %v1792_v21 = vmul.f32 %v3541_v25, %v1744_v61 }
 0x4c5   :  { %v1824_v2 = vmul.f32 %v1792_v21, %v4985_v29 }
 0x4c7   :  { %v1840_v6 = vsel %vm1808_vm9, %v4985_v29, %v1824_v2 }
 0x4c8   :  { %3316 = vmatmul.mubr.msk.f32.gmra.mrb[28].mxu1 %vm499_vm7, %v1840_v6 }
 0x55d   :  { %v3296_v19 = vpop.f32.mrb[14].mxu1 }
 0x55e   :  { %v5038_v48 = vadd.f32 %v3296_v19, %v5035_v50  ;;  %v1967_v1 = vpop.f32.mrb[15].mxu1 }
 0x55f   :  { %v5041_v49 = vadd.f32 %v1967_v1, %v5035_v50 }
 0x560   :  { %v2047_v29 = vsel %vm63_vm6, 0.0, %v5038_v48  ;;  %v2127_v58 = vsel %vm63_vm6, %v5038_v48, 0.0 }
 0x561   :  { %v2065_v33 = vsel %vm499_vm7, %v2047_v29, 0.0  ;;  %v2046_v24 = vsel %vm63_vm6, 0.0, %v5041_v49  ;;  %v2126_v28 = vsel %vm63_vm6, %v5041_v49, 0.0  ;;  %v2145_v31 = vsel %vm499_vm7, %v2127_v58, 0.0 }
 0x562   :  { %2066 = vadd.xlane.f32.xlu1 %v2065_v33  ;;  %v2062_v53 = vsel %vm499_vm7, %v2046_v24, 0.0  ;;  %v2142_v63 = vsel %vm499_vm7, %v2126_v28, 0.0 }
 0x563   :  { %2063 = vadd.xlane.f32.xlu0 %v2062_v53 }
 0x565   :  { %v3299_v16 = vpop.f32.mrb[16].mxu1 }
 0x566   :  { %v5059_v9 = vadd.f32 %v3299_v16, %v5035_v50  ;;  %2146 = vadd.xlane.f32.xlu1 %v2145_v31  ;;  %v1977_v17 = vpop.f32.mrb[17].mxu1 }
 0x567   :  { %v5063_v60 = vadd.f32 %v1977_v17, %v5035_v50  ;;  %2143 = vadd.xlane.f32.xlu0 %v2142_v63 }
 0x568   :  { %v2129_v0 = vsel %vm63_vm6, %v5059_v9, 0.0  ;;  %v2049_v41 = vsel %vm63_vm6, 0.0, %v5059_v9 }
 0x569   :  { %v2151_v47 = vsel %vm499_vm7, %v2129_v0, 0.0  ;;  %v2071_v10 = vsel %vm499_vm7, %v2049_v41, 0.0  ;;  %v2128_v35 = vsel %vm63_vm6, %v5063_v60, 0.0  ;;  %v2048_v8 = vsel %vm63_vm6, 0.0, %v5063_v60 }
 0x56a   :  { %2152 = vadd.xlane.f32.xlu1 %v2151_v47  ;;  %v2148_v57 = vsel %vm499_vm7, %v2128_v35, 0.0  ;;  %v2068_v30 = vsel %vm499_vm7, %v2048_v8, 0.0 }
 0x56b   :  { %2072 = vadd.xlane.f32.xlu0 %v2071_v10 }
 0x56d   :  { %v3302_v55 = vpop.f32.mrb[18].mxu1 }
 0x56e   :  { %v5081_v13 = vadd.f32 %v3302_v55, %v5035_v50  ;;  %2149 = vadd.xlane.f32.xlu1 %v2148_v57  ;;  %v1987_v51 = vpop.f32.mrb[19].mxu1 }
 0x56f   :  { %v5085_v43 = vadd.f32 %v1987_v51, %v5035_v50  ;;  %2069 = vadd.xlane.f32.xlu0 %v2068_v30 }
 0x570   :  { %v2131_v22 = vsel %vm63_vm6, %v5081_v13, 0.0  ;;  %v2051_v20 = vsel %vm63_vm6, 0.0, %v5081_v13 }
 0x571   :  { %v2157_v26 = vsel %vm499_vm7, %v2131_v22, 0.0  ;;  %v2077_v42 = vsel %vm499_vm7, %v2051_v20, 0.0  ;;  %v2130_v7 = vsel %vm63_vm6, %v5085_v43, 0.0  ;;  %v2050_v56 = vsel %vm63_vm6, 0.0, %v5085_v43 }
 0x572   :  { %2158 = vadd.xlane.f32.xlu1 %v2157_v26  ;;  %v2154_v39 = vsel %vm499_vm7, %v2130_v7, 0.0  ;;  %v2074_v5 = vsel %vm499_vm7, %v2050_v56, 0.0 }
 0x573   :  { %2078 = vadd.xlane.f32.xlu0 %v2077_v42 }
 0x576   :  { %2155 = vadd.xlane.f32.xlu1 %v2154_v39 }
 0x577   :  { %v3305_v15 = vpop.f32.mrb[20].mxu1  ;;  %2075 = vadd.xlane.f32.xlu0 %v2074_v5 }
 0x578   :  { %v5104_v61 = vadd.f32 %v3305_v15, %v5035_v50  ;;  %v1997_v62 = vpop.f32.mrb[21].mxu1 }
 0x579   :  { %v5107_v27 = vadd.f32 %v1997_v62, %v5035_v50 }
 0x57a   :  { %v2133_v44 = vsel %vm63_vm6, %v5104_v61, 0.0  ;;  %v2053_v4 = vsel %vm63_vm6, 0.0, %v5104_v61 }
 0x57b   :  { %v2163_v45 = vsel %vm499_vm7, %v2133_v44, 0.0  ;;  %v2083_v11 = vsel %vm499_vm7, %v2053_v4, 0.0  ;;  %v2132_v18 = vsel %vm63_vm6, %v5107_v27, 0.0  ;;  %v2052_v12 = vsel %vm63_vm6, 0.0, %v5107_v27 }
 0x57c   :  { %2164 = vadd.xlane.f32.xlu1 %v2163_v45  ;;  %2084 = vadd.xlane.f32.xlu0 %v2083_v11  ;;  %v2160_v52 = vsel %vm499_vm7, %v2132_v18, 0.0  ;;  %v2080_v36 = vsel %vm499_vm7, %v2052_v12, 0.0 }
 0x580   :  { %v3308_v59 = vpop.f32.mrb[22].mxu1  ;;  %2161 = vadd.xlane.f32.xlu1 %v2160_v52  ;;  %2081 = vadd.xlane.f32.xlu0 %v2080_v36 }
 0x581   :  { %v5126_v3 = vadd.f32 %v3308_v59, %v5035_v50  ;;  %v2007_v54 = vpop.f32.mrb[23].mxu1 }
 0x582   :  { %v5129_v14 = vadd.f32 %v2007_v54, %v5035_v50 }
 0x583   :  { %v2135_v25 = vsel %vm63_vm6, %v5126_v3, 0.0  ;;  %v2055_v21 = vsel %vm63_vm6, 0.0, %v5126_v3 }
 0x584   :  { %v2169_v2 = vsel %vm499_vm7, %v2135_v25, 0.0  ;;  %v2089_v6 = vsel %vm499_vm7, %v2055_v21, 0.0  ;;  %v2134_v32 = vsel %vm63_vm6, %v5129_v14, 0.0  ;;  %v2054_v19 = vsel %vm63_vm6, 0.0, %v5129_v14 }
 0x585   :  { %2170 = vadd.xlane.f32.xlu1 %v2169_v2  ;;  %2090 = vadd.xlane.f32.xlu0 %v2089_v6  ;;  %v2166_v1 = vsel %vm499_vm7, %v2134_v32, 0.0  ;;  %v2086_v29 = vsel %vm499_vm7, %v2054_v19, 0.0 }
 0x589   :  { %v3311_v33 = vpop.f32.mrb[24].mxu1  ;;  %2167 = vadd.xlane.f32.xlu1 %v2166_v1  ;;  %2087 = vadd.xlane.f32.xlu0 %v2086_v29 }
 0x58a   :  { %v5148_v24 = vadd.f32 %v3311_v33, %v5035_v50  ;;  %v2017_v53 = vpop.f32.mrb[25].mxu1 }
 0x58b   :  { %v5151_v58 = vadd.f32 %v2017_v53, %v5035_v50 }
 0x58c   :  { %v2137_v28 = vsel %vm63_vm6, %v5148_v24, 0.0  ;;  %v2057_v16 = vsel %vm63_vm6, 0.0, %v5148_v24 }
 0x58d   :  { %v2175_v31 = vsel %vm499_vm7, %v2137_v28, 0.0  ;;  %v2095_v17 = vsel %vm499_vm7, %v2057_v16, 0.0  ;;  %v2136_v63 = vsel %vm63_vm6, %v5151_v58, 0.0  ;;  %v2056_v0 = vsel %vm63_vm6, 0.0, %v5151_v58 }
 0x58e   :  { %2176 = vadd.xlane.f32.xlu1 %v2175_v31  ;;  %2096 = vadd.xlane.f32.xlu0 %v2095_v17  ;;  %v2172_v10 = vsel %vm499_vm7, %v2136_v63, 0.0  ;;  %v2092_v8 = vsel %vm499_vm7, %v2056_v0, 0.0 }
 0x590   :  { %v3314_v41 = vpop.f32.mrb[26].mxu1 }
 0x591   :  { %v5168_v47 = vadd.f32 %v3314_v41, %v5035_v50  ;;  %v2027_v35 = vpop.f32.mrb[27].mxu1 }
 0x592   :  { %2173 = vadd.xlane.f32.xlu1 %v2172_v10  ;;  %v5173_v55 = vadd.f32 %v2027_v35, %v5035_v50  ;;  %2093 = vadd.xlane.f32.xlu0 %v2092_v8 }
 0x593   :  { %v2139_v57 = vsel %vm63_vm6, %v5168_v47, 0.0  ;;  %v2059_v51 = vsel %vm63_vm6, 0.0, %v5168_v47 }
 0x594   :  { %v2181_v30 = vsel %vm499_vm7, %v2139_v57, 0.0  ;;  %v2101_v22 = vsel %vm499_vm7, %v2059_v51, 0.0  ;;  %v2138_v20 = vsel %vm63_vm6, %v5173_v55, 0.0  ;;  %v2058_v26 = vsel %vm63_vm6, 0.0, %v5173_v55 }
 0x595   :  { %v2178_v42 = vsel %vm499_vm7, %v2138_v20, 0.0  ;;  %v2098_v7 = vsel %vm499_vm7, %v2058_v26, 0.0 }
 0x596   :  { %2182 = vadd.xlane.f32.xlu1 %v2181_v30  ;;  %2102 = vadd.xlane.f32.xlu0 %v2101_v22 }
 0x59a   :  { %2179 = vadd.xlane.f32.xlu1 %v2178_v42  ;;  %2099 = vadd.xlane.f32.xlu0 %v2098_v7 }
 0x59b   :  { %v3317_v56 = vpop.f32.mrb[28].mxu1 }
 0x59c   :  { %v5192_v39 = vadd.f32 %v3317_v56, %v5035_v50  ;;  %v2037_v5 = vpop.f32.mrb[29].mxu1 }
 0x59d   :  { %v5195_v15 = vadd.f32 %v2037_v5, %v5035_v50 }
 0x59e   :  { %v2141_v11 = vsel %vm63_vm6, %v5192_v39, 0.0  ;;  %v2061_v50 = vsel %vm63_vm6, 0.0, %v5192_v39 }
 0x59f   :  { %v2140_v62 = vsel %vm63_vm6, %v5195_v15, 0.0  ;;  %v2060_v44 = vsel %vm63_vm6, 0.0, %v5195_v15  ;;  %v2187_v18 = vsel %vm499_vm7, %v2141_v11, 0.0  ;;  %v2107_v12 = vsel %vm499_vm7, %v2061_v50, 0.0 }
 0x5a0   :  { %v2184_v4 = vsel %vm499_vm7, %v2140_v62, 0.0  ;;  %v2104_v45 = vsel %vm499_vm7, %v2060_v44, 0.0 }
 0x5a1   :  { %2185 = vadd.xlane.f32.xlu1 %v2184_v4  ;;  %2105 = vadd.xlane.f32.xlu0 %v2104_v45 }
 0x5a5   :  { %2188 = vadd.xlane.f32.xlu1 %v2187_v18  ;;  %2108 = vadd.xlane.f32.xlu0 %v2107_v12 }
 0x5ef   :  { %v2067_v52 = vpop.xlane.xlu1 %2066 }
 0x5f0   :  { %v2064_v36 = vpop.xlane.xlu0 %2063  ;;  %v2111_v54 = vmul.f32 0.03125, %v2067_v52 }
 0x5f1   :  { %v2110_v2 = vmul.f32 0.03125, %v2064_v36 }
 0x5f3   :  { %v2147_v59 = vpop.xlane.xlu1 %2146 }
 0x5f4   :  { %v2191_v25 = vmul.f32 0.03125, %v2147_v59  ;;  %v2144_v21 = vpop.xlane.xlu0 %2143 }
 0x5f5   :  { %v2190_v6 = vmul.f32 0.03125, %v2144_v21 }
 0x5f6   :  { %v2207_v32 = vsel %vm63_vm6, %v2191_v25, %v2111_v54 }
 0x5f7   :  { %v5216_v19 = vsub.f32 %v5038_v48, %v2207_v32  ;;  %v2206_v1 = vsel %vm63_vm6, %v2190_v6, %v2110_v2  ;;  %v2153_v29 = vpop.xlane.xlu1 %2152 }
 0x5f8   :  { %v5221_v33 = vsub.f32 %v5041_v49, %v2206_v1  ;;  %v2193_v53 = vmul.f32 0.03125, %v2153_v29  ;;  %v2073_v28 = vpop.xlane.xlu0 %2072 }
 0x5f9   :  { %v2113_v16 = vmul.f32 0.03125, %v2073_v28  ;;  %v2239_v31 = vmul.f32 %v5216_v19, %v5216_v19 }
 0x5fa   :  { %v2238_v17 = vmul.f32 %v5221_v33, %v5221_v33 }
 0x5fb   :  { %v2209_v48 = vsel %vm63_vm6, %v2193_v53, %v2113_v16  ;;  %v2150_v63 = vpop.xlane.xlu1 %2149  ;;  %v2255_v0 = vsel %vm63_vm6, 0.0, %v2239_v31  ;;  %v2335_v30 = vsel %vm63_vm6, %v2239_v31, 0.0 }
 0x5fc   :  { %v5232_v41 = vsub.f32 %v5059_v9, %v2209_v48  ;;  %v2192_v49 = vmul.f32 0.03125, %v2150_v63  ;;  %v2070_v10 = vpop.xlane.xlu0 %2069  ;;  %v2273_v35 = vsel %vm499_vm7, %v2255_v0, 0.0  ;;  %v2254_v8 = vsel %vm63_vm6, 0.0, %v2238_v17 }
 0x5fd   :  { %v2112_v57 = vmul.f32 0.03125, %v2070_v10  ;;  %2274 = vadd.xlane.f32.xlu1 %v2273_v35  ;;  %v2270_v51 = vsel %vm499_vm7, %v2254_v8, 0.0  ;;  %v2334_v22 = vsel %vm63_vm6, %v2238_v17, 0.0  ;;  %v2353_v5 = vsel %vm499_vm7, %v2335_v30, 0.0 }
 0x5fe   :  { %2271 = vadd.xlane.f32.xlu0 %v2270_v51  ;;  %v2241_v9 = vmul.f32 %v5232_v41, %v5232_v41  ;;  %v2350_v44 = vsel %vm499_vm7, %v2334_v22, 0.0 }
 0x5ff   :  { %v2208_v20 = vsel %vm63_vm6, %v2192_v49, %v2112_v57  ;;  %v2159_v26 = vpop.xlane.xlu1 %2158 }
 0x600   :  { %v5247_v42 = vsub.f32 %v5063_v60, %v2208_v20  ;;  %v2195_v7 = vmul.f32 0.03125, %v2159_v26  ;;  %v2079_v56 = vpop.xlane.xlu0 %2078  ;;  %v2337_v4 = vsel %vm63_vm6, %v2241_v9, 0.0  ;;  %v2257_v45 = vsel %vm63_vm6, 0.0, %v2241_v9 }
 0x601   :  { %v2115_v62 = vmul.f32 0.03125, %v2079_v56  ;;  %2354 = vadd.xlane.f32.xlu1 %v2353_v5  ;;  %v2359_v36 = vsel %vm499_vm7, %v2337_v4, 0.0  ;;  %v2279_v54 = vsel %vm499_vm7, %v2257_v45, 0.0 }
 0x602   :  { %2351 = vadd.xlane.f32.xlu0 %v2350_v44  ;;  %v2240_v11 = vmul.f32 %v5247_v42, %v5247_v42 }
 0x603   :  { %v2211_v60 = vsel %vm63_vm6, %v2195_v7, %v2115_v62  ;;  %v2156_v50 = vpop.xlane.xlu1 %2155 }
 0x604   :  { %v5260_v18 = vsub.f32 %v5081_v13, %v2211_v60  ;;  %v2194_v12 = vmul.f32 0.03125, %v2156_v50  ;;  %v2076_v52 = vpop.xlane.xlu0 %2075  ;;  %v2336_v25 = vsel %vm63_vm6, %v2240_v11, 0.0  ;;  %v2256_v21 = vsel %vm63_vm6, 0.0, %v2240_v11 }
 0x605   :  { %v2114_v59 = vmul.f32 0.03125, %v2076_v52  ;;  %2360 = vadd.xlane.f32.xlu1 %v2359_v36  ;;  %v2356_v32 = vsel %vm499_vm7, %v2336_v25, 0.0  ;;  %v2276_v53 = vsel %vm499_vm7, %v2256_v21, 0.0 }
 0x606   :  { %2280 = vadd.xlane.f32.xlu0 %v2279_v54  ;;  %v2243_v2 = vmul.f32 %v5260_v18, %v5260_v18 }
 0x607   :  { %v2210_v13 = vsel %vm63_vm6, %v2194_v12, %v2114_v59 }
 0x608   :  { %v5273_v6 = vsub.f32 %v5085_v43, %v2210_v13  ;;  %v2339_v28 = vsel %vm63_vm6, %v2243_v2, 0.0  ;;  %v2259_v17 = vsel %vm63_vm6, 0.0, %v2243_v2 }
 0x609   :  { %v2165_v1 = vpop.xlane.xlu1 %2164  ;;  %v2085_v29 = vpop.xlane.xlu0 %2084  ;;  %2357 = vadd.xlane.f32.xlu1 %v2356_v32  ;;  %v2365_v63 = vsel %vm499_vm7, %v2339_v28, 0.0  ;;  %v2285_v35 = vsel %vm499_vm7, %v2259_v17, 0.0 }
 0x60a   :  { %v2197_v16 = vmul.f32 0.03125, %v2165_v1  ;;  %v2117_v31 = vmul.f32 0.03125, %v2085_v29  ;;  %2277 = vadd.xlane.f32.xlu0 %v2276_v53  ;;  %v2242_v43 = vmul.f32 %v5273_v6, %v5273_v6 }
 0x60c   :  { %v2213_v48 = vsel %vm63_vm6, %v2197_v16, %v2117_v31  ;;  %v2338_v8 = vsel %vm63_vm6, %v2242_v43, 0.0  ;;  %v2258_v30 = vsel %vm63_vm6, 0.0, %v2242_v43 }
 0x60d   :  { %v5287_v0 = vsub.f32 %v5104_v61, %v2213_v48  ;;  %v2162_v49 = vpop.xlane.xlu1 %2161  ;;  %v2082_v10 = vpop.xlane.xlu0 %2081  ;;  %2366 = vadd.xlane.f32.xlu1 %v2365_v63  ;;  %v2362_v9 = vsel %vm499_vm7, %v2338_v8, 0.0  ;;  %v2282_v26 = vsel %vm499_vm7, %v2258_v30, 0.0 }
 0x60e   :  { %v2196_v57 = vmul.f32 0.03125, %v2162_v49  ;;  %v2116_v51 = vmul.f32 0.03125, %v2082_v10  ;;  %2286 = vadd.xlane.f32.xlu0 %v2285_v35 }
 0x60f   :  { %v2245_v22 = vmul.f32 %v5287_v0, %v5287_v0 }
 0x610   :  { %v2212_v61 = vsel %vm63_vm6, %v2196_v57, %v2116_v51 }
 0x611   :  { %v5300_v20 = vsub.f32 %v5107_v27, %v2212_v61  ;;  %2363 = vadd.xlane.f32.xlu1 %v2362_v9  ;;  %v2341_v7 = vsel %vm63_vm6, %v2245_v22, 0.0  ;;  %v2261_v62 = vsel %vm63_vm6, 0.0, %v2245_v22 }
 0x612   :  { %v2171_v56 = vpop.xlane.xlu1 %2170  ;;  %v2091_v5 = vpop.xlane.xlu0 %2090  ;;  %2283 = vadd.xlane.f32.xlu0 %v2282_v26  ;;  %v2371_v27 = vsel %vm499_vm7, %v2341_v7, 0.0  ;;  %v2291_v60 = vsel %vm499_vm7, %v2261_v62, 0.0 }
 0x613   :  { %v2199_v44 = vmul.f32 0.03125, %v2171_v56  ;;  %v2119_v4 = vmul.f32 0.03125, %v2091_v5  ;;  %v2244_v45 = vmul.f32 %v5300_v20, %v5300_v20 }
 0x615   :  { %v2215_v11 = vsel %vm63_vm6, %v2199_v44, %v2119_v4  ;;  %2372 = vadd.xlane.f32.xlu1 %v2371_v27  ;;  %v2340_v50 = vsel %vm63_vm6, %v2244_v45, 0.0  ;;  %v2260_v59 = vsel %vm63_vm6, 0.0, %v2244_v45 }
 0x616   :  { %v5316_v12 = vsub.f32 %v5126_v3, %v2215_v11  ;;  %v2168_v52 = vpop.xlane.xlu1 %2167  ;;  %v2088_v36 = vpop.xlane.xlu0 %2087  ;;  %2292 = vadd.xlane.f32.xlu0 %v2291_v60  ;;  %v2368_v21 = vsel %vm499_vm7, %v2340_v50, 0.0  ;;  %v2288_v3 = vsel %vm499_vm7, %v2260_v59, 0.0 }
 0x617   :  { %v2198_v54 = vmul.f32 0.03125, %v2168_v52  ;;  %v2118_v25 = vmul.f32 0.03125, %v2088_v36 }
 0x618   :  { %v2247_v2 = vmul.f32 %v5316_v12, %v5316_v12 }
 0x619   :  { %v2214_v13 = vsel %vm63_vm6, %v2198_v54, %v2118_v25  ;;  %2369 = vadd.xlane.f32.xlu1 %v2368_v21 }
 0x61a   :  { %v5327_v32 = vsub.f32 %v5129_v14, %v2214_v13  ;;  %2289 = vadd.xlane.f32.xlu0 %v2288_v3  ;;  %v2343_v1 = vsel %vm63_vm6, %v2247_v2, 0.0  ;;  %v2263_v29 = vsel %vm63_vm6, 0.0, %v2247_v2 }
 0x61b   :  { %v2177_v53 = vpop.xlane.xlu1 %2176  ;;  %v2097_v28 = vpop.xlane.xlu0 %2096  ;;  %v2377_v17 = vsel %vm499_vm7, %v2343_v1, 0.0  ;;  %v2297_v14 = vsel %vm499_vm7, %v2263_v29, 0.0 }
 0x61c   :  { %v2201_v16 = vmul.f32 0.03125, %v2177_v53  ;;  %v2121_v31 = vmul.f32 0.03125, %v2097_v28  ;;  %v2246_v43 = vmul.f32 %v5327_v32, %v5327_v32 }
 0x61d   :  { %2378 = vadd.xlane.f32.xlu1 %v2377_v17 }
 0x61e   :  { %v2217_v48 = vsel %vm63_vm6, %v2201_v16, %v2121_v31  ;;  %2298 = vadd.xlane.f32.xlu0 %v2297_v14  ;;  %v2342_v63 = vsel %vm63_vm6, %v2246_v43, 0.0  ;;  %v2262_v49 = vsel %vm63_vm6, 0.0, %v2246_v43 }
 0x61f   :  { %v5344_v10 = vsub.f32 %v5148_v24, %v2217_v48  ;;  %v2174_v35 = vpop.xlane.xlu1 %2173  ;;  %v2094_v8 = vpop.xlane.xlu0 %2093  ;;  %v2374_v30 = vsel %vm499_vm7, %v2342_v63, 0.0  ;;  %v2294_v22 = vsel %vm499_vm7, %v2262_v49, 0.0 }
 0x620   :  { %v2200_v57 = vmul.f32 0.03125, %v2174_v35  ;;  %v2120_v51 = vmul.f32 0.03125, %v2094_v8 }
 0x621   :  { %2375 = vadd.xlane.f32.xlu1 %v2374_v30  ;;  %v2249_v61 = vmul.f32 %v5344_v10, %v5344_v10 }
 0x622   :  { %v2216_v9 = vsel %vm63_vm6, %v2200_v57, %v2120_v51  ;;  %2295 = vadd.xlane.f32.xlu0 %v2294_v22 }
 0x623   :  { %v5353_v26 = vsub.f32 %v5151_v58, %v2216_v9  ;;  %v2183_v24 = vpop.xlane.xlu1 %2182  ;;  %v2103_v7 = vpop.xlane.xlu0 %2102  ;;  %v2345_v56 = vsel %vm63_vm6, %v2249_v61, 0.0  ;;  %v2265_v5 = vsel %vm63_vm6, 0.0, %v2249_v61 }
 0x624   :  { %v2203_v62 = vmul.f32 0.03125, %v2183_v24  ;;  %v2123_v44 = vmul.f32 0.03125, %v2103_v7  ;;  %v2383_v4 = vsel %vm499_vm7, %v2345_v56, 0.0  ;;  %v2303_v45 = vsel %vm499_vm7, %v2265_v5, 0.0 }
 0x625   :  { %2384 = vadd.xlane.f32.xlu1 %v2383_v4  ;;  %v2248_v27 = vmul.f32 %v5353_v26, %v5353_v26 }
 0x626   :  { %v2219_v58 = vsel %vm63_vm6, %v2203_v62, %v2123_v44  ;;  %2304 = vadd.xlane.f32.xlu0 %v2303_v45 }
 0x627   :  { %v5366_v11 = vsub.f32 %v5168_v47, %v2219_v58  ;;  %v2180_v60 = vpop.xlane.xlu1 %2179  ;;  %v2100_v50 = vpop.xlane.xlu0 %2099  ;;  %v2344_v52 = vsel %vm63_vm6, %v2248_v27, 0.0  ;;  %v2264_v36 = vsel %vm63_vm6, 0.0, %v2248_v27 }
 0x628   :  { %v2202_v59 = vmul.f32 0.03125, %v2180_v60  ;;  %v2122_v54 = vmul.f32 0.03125, %v2100_v50  ;;  %v2380_v25 = vsel %vm499_vm7, %v2344_v52, 0.0  ;;  %v2300_v21 = vsel %vm499_vm7, %v2264_v36, 0.0 }
 0x629   :  { %2381 = vadd.xlane.f32.xlu1 %v2380_v25  ;;  %v2251_v2 = vmul.f32 %v5366_v11, %v5366_v11 }
 0x62a   :  { %v2218_v47 = vsel %vm63_vm6, %v2202_v59, %v2122_v54  ;;  %2301 = vadd.xlane.f32.xlu0 %v2300_v21 }
 0x62b   :  { %v5379_v13 = vsub.f32 %v5173_v55, %v2218_v47  ;;  %v2347_v3 = vsel %vm63_vm6, %v2251_v2, 0.0  ;;  %v2267_v1 = vsel %vm63_vm6, 0.0, %v2251_v2 }
 0x62c   :  { %v2389_v29 = vsel %vm499_vm7, %v2347_v3, 0.0  ;;  %v2309_v53 = vsel %vm499_vm7, %v2267_v1, 0.0 }
 0x62d   :  { %2390 = vadd.xlane.f32.xlu1 %v2389_v29  ;;  %v2250_v28 = vmul.f32 %v5379_v13, %v5379_v13 }
 0x62e   :  { %v2186_v16 = vpop.xlane.xlu1 %2185  ;;  %v2106_v31 = vpop.xlane.xlu0 %2105  ;;  %2310 = vadd.xlane.f32.xlu0 %v2309_v53 }
 0x62f   :  { %v2204_v17 = vmul.f32 0.03125, %v2186_v16  ;;  %v2124_v55 = vmul.f32 0.03125, %v2106_v31  ;;  %v2346_v43 = vsel %vm63_vm6, %v2250_v28, 0.0  ;;  %v2266_v14 = vsel %vm63_vm6, 0.0, %v2250_v28 }
 0x630   :  { %v2386_v48 = vsel %vm499_vm7, %v2346_v43, 0.0  ;;  %v2306_v49 = vsel %vm499_vm7, %v2266_v14, 0.0  ;;  %v2480_v43 = vsub.s32 7, %v3843_v37 }
 0x631   :  { %v2220_v63 = vsel %vm63_vm6, %v2204_v17, %v2124_v55  ;;  %2387 = vadd.xlane.f32.xlu1 %v2386_v48 }
 0x632   :  { %v5398_v35 = vsub.f32 %v5195_v15, %v2220_v63  ;;  %v2189_v8 = vpop.xlane.xlu1 %2188  ;;  %v2109_v57 = vpop.xlane.xlu0 %2108  ;;  %2307 = vadd.xlane.f32.xlu0 %v2306_v49 }
 0x633   :  { %v2205_v51 = vmul.f32 0.03125, %v2189_v8  ;;  %v2125_v30 = vmul.f32 0.03125, %v2109_v57  ;;  %v5433_v57 = vld [vmem:[%s5858_s6 + $0x8] sm:$0x7]  ;;  %s3665_s6 = smov [#allocation2]  }
 0x634   :  { %v2252_v22 = vmul.f32 %v5398_v35, %v5398_v35  ;;  %s3027_s27 = sshll.u32 %s3665_s6, 4  ;;  %s3028_s27 = int_to_ptr.vmem [resolvable:$true] %s3027_s27 }
 0x635   :  { %v2221_v61 = vsel %vm63_vm6, %v2205_v51, %v2125_v30  ;;  %v5436_v30 = vrot.slane %v5032_v23, %v2480_v43  ;;  %s3640_s28 = scalar_lea.vmem %s3028_s27, 16  ;;  %s3644_s29 = scalar_lea.vmem %s3028_s27, 32 }
 0x636   :  { %v5405_v9 = vsub.f32 %v5192_v39, %v2221_v61  ;;  %v2348_v24 = vsel %vm63_vm6, %v2252_v22, 0.0  ;;  %v2268_v15 = vsel %vm63_vm6, 0.0, %v2252_v22  ;;  %p3641_p0 = scmp.ne.s32.totalorder %s3028_s27, %s3640_s28  ;;  %p3645_p1 = scmp.lt.s32.totalorder %s3028_s27, %s3028_s27 }
 0x637   :  { %v2392_v7 = vsel %vm499_vm7, %v2348_v24, 0.0  ;;  %v2312_v56 = vsel %vm499_vm7, %v2268_v15, 0.0  ;;  %p3646_p2 = scmp.lt.s32.totalorder %s3644_s29, %s3640_s28 }
 0x638   :  { %2393 = vadd.xlane.f32.xlu1 %v2392_v7  ;;  %2313 = vadd.xlane.f32.xlu0 %v2312_v56  ;;  %v2253_v5 = vmul.f32 %v5405_v9, %v5405_v9  ;;  %v5443_v7 = vrot.slane %v5433_v57, %v465_v38 }
 0x639   :  { %p3647_p3 = por %p3646_p2, %p3645_p1 }
 0x63a   :  { %v2349_v62 = vsel %vm63_vm6, %v2253_v5, 0.0  ;;  %v2269_v39 = vsel %vm63_vm6, 0.0, %v2253_v5 }
 0x63b   :  { %v2395_v44 = vsel %vm499_vm7, %v2349_v62, 0.0  ;;  %v2315_v4 = vsel %vm499_vm7, %v2269_v39, 0.0  ;;  %p3648_p4 = pnand %p3647_p3, %p3641_p0 }
 0x63c   :  { %2396 = vadd.xlane.f32.xlu1 %v2395_v44  ;;  %2316 = vadd.xlane.f32.xlu0 %v2315_v4 }
 0x68a   :  { %v2275_v45 = vpop.xlane.xlu1 %2274 }
 0x68b   :  { %v2272_v27 = vpop.xlane.xlu0 %2271  ;;  %v2319_v60 = vmul.f32 0.03125, %v2275_v45 }
 0x68c   :  { %v2318_v36 = vmul.f32 0.03125, %v2272_v27 }
 0x68e   :  { %v2355_v58 = vpop.xlane.xlu1 %2354 }
 0x68f   :  { %v2399_v50 = vmul.f32 0.03125, %v2355_v58  ;;  %v2352_v52 = vpop.xlane.xlu0 %2351 }
 0x690   :  { %v2398_v59 = vmul.f32 0.03125, %v2352_v52 }
 0x691   :  { %v2415_v54 = vsel %vm63_vm6, %v2399_v50, %v2319_v60 }
 0x692   :  { %v2431_v25 = vadd.f32 1e-05, %v2415_v54  ;;  %v2414_v21 = vsel %vm63_vm6, %v2398_v59, %v2318_v36  ;;  %v2361_v2 = vpop.xlane.xlu1 %2360 }
 0x693   :  { %v2430_v47 = vadd.f32 1e-05, %v2414_v21  ;;  %v2401_v3 = vmul.f32 0.03125, %v2361_v2  ;;  %v2281_v1 = vpop.xlane.xlu0 %2280 }
 0x694   :  { %3542 = vrsqrt.f32 %v2431_v25  ;;  %v2321_v29 = vmul.f32 0.03125, %v2281_v1 }
 0x695   :  { %3544 = vrsqrt.f32 %v2430_v47 }
 0x696   :  { %v2417_v53 = vsel %vm63_vm6, %v2401_v3, %v2321_v29  ;;  %v2358_v28 = vpop.xlane.xlu1 %2357 }
 0x697   :  { %v2433_v16 = vadd.f32 1e-05, %v2417_v53  ;;  %v2400_v31 = vmul.f32 0.03125, %v2358_v28  ;;  %v2278_v17 = vpop.xlane.xlu0 %2277 }
 0x698   :  { %v2320_v55 = vmul.f32 0.03125, %v2278_v17 }
 0x699   :  { %3546 = vrsqrt.f32 %v2433_v16 }
 0x69a   :  { %v2416_v14 = vsel %vm63_vm6, %v2400_v31, %v2320_v55  ;;  %v2367_v48 = vpop.xlane.xlu1 %2366 }
 0x69b   :  { %v2432_v63 = vadd.f32 1e-05, %v2416_v14  ;;  %v2403_v49 = vmul.f32 0.03125, %v2367_v48  ;;  %v2287_v8 = vpop.xlane.xlu0 %2286 }
 0x69c   :  { %v2323_v51 = vmul.f32 0.03125, %v2287_v8 }
 0x69d   :  { %3548 = vrsqrt.f32 %v2432_v63 }
 0x69e   :  { %v3543_v22 = vpop.eup %3542  ;;  %v2419_v61 = vsel %vm63_vm6, %v2403_v49, %v2323_v51  ;;  %v2364_v24 = vpop.xlane.xlu1 %2363 }
 0x69f   :  { %v3545_v15 = vpop.eup %3544  ;;  %v2463_v56 = vmul.f32 %v3543_v22, %v5216_v19  ;;  %v2435_v5 = vadd.f32 1e-05, %v2419_v61  ;;  %v2402_v62 = vmul.f32 0.03125, %v2364_v24  ;;  %v2284_v39 = vpop.xlane.xlu0 %2283 }
 0x6a0   :  { %v2462_v44 = vmul.f32 %v3545_v15, %v5221_v33  ;;  %v2322_v23 = vmul.f32 0.03125, %v2284_v39 }
 0x6a1   :  { %3550 = vrsqrt.f32 %v2435_v5  ;;  %v2483_v4 = vmul.f32 %v5436_v30, %v2463_v56 }
 0x6a2   :  { %v2418_v45 = vsel %vm63_vm6, %v2402_v62, %v2322_v23  ;;  %v2373_v27 = vpop.xlane.xlu1 %2372  ;;  %v2482_v58 = vmul.f32 %v5436_v30, %v2462_v44 }
 0x6a3   :  { %v3547_v60 = vpop.eup %3546  ;;  %v2434_v38 = vadd.f32 1e-05, %v2418_v45  ;;  %v2405_v50 = vmul.f32 0.03125, %v2373_v27  ;;  %v2293_v52 = vpop.xlane.xlu0 %2292  ;;  %v5452_v19 = vadd.f32 %v5443_v7, %v2483_v4 }
 0x6a4   :  { %v2465_v36 = vmul.f32 %v3547_v60, %v5232_v41  ;;  %v2325_v33 = vmul.f32 0.03125, %v2293_v52  ;;  %v5456_v59 = vadd.f32 %v5443_v7, %v2482_v58 }
 0x6a5   :  { %3552 = vrsqrt.f32 %v2434_v38  ;;  %v2519_v54 = vmin.f32 %v5452_v19, 20.0  ;;  %vm2663_vm10 = vcmp.gt.f32.partialorder %v5452_v19, 20.0 }
 0x6a6   :  { %v2421_v25 = vsel %vm63_vm6, %v2405_v50, %v2325_v33  ;;  %v2370_v21 = vpop.xlane.xlu1 %2369  ;;  %v2518_v2 = vmin.f32 %v5456_v59, 20.0  ;;  %v2485_v47 = vmul.f32 %v5436_v30, %v2465_v36  ;;  %vm2662_vm11 = vcmp.gt.f32.partialorder %v5456_v59, 20.0 }
 0x6a7   :  { %v3549_v3 = vpop.eup %3548  ;;  %v2437_v1 = vadd.f32 1e-05, %v2421_v25  ;;  %v2404_v29 = vmul.f32 0.03125, %v2370_v21  ;;  %v2290_v53 = vpop.xlane.xlu0 %2289  ;;  %v2536_v41 = vmul.f32 1.442695, %v2519_v54 }
 0x6a8   :  { %v2464_v28 = vmul.f32 %v3549_v3, %v5247_v42  ;;  %v2324_v16 = vmul.f32 0.03125, %v2290_v53  ;;  %v2534_v31 = vmul.f32 1.442695, %v2518_v2  ;;  %v5465_v17 = vadd.f32 %v5443_v7, %v2485_v47 }
 0x6a9   :  { %3554 = vrsqrt.f32 %v2437_v1 }
 0x6aa   :  { %v2420_v55 = vsel %vm63_vm6, %v2404_v29, %v2324_v16  ;;  %v2379_v43 = vpop.xlane.xlu1 %2378  ;;  %3556 = vpow2.f32 %v2536_v41  ;;  %v2521_v14 = vmin.f32 %v5465_v17, 20.0  ;;  %v2484_v42 = vmul.f32 %v5436_v30, %v2464_v28 }
 0x6ab   :  { %v3551_v48 = vpop.eup %3550  ;;  %v2436_v63 = vadd.f32 1e-05, %v2420_v55  ;;  %v2407_v49 = vmul.f32 0.03125, %v2379_v43  ;;  %v2299_v8 = vpop.xlane.xlu0 %2298  ;;  %3558 = vpow2.f32 %v2534_v31  ;;  %vm2665_vm12 = vcmp.gt.f32.partialorder %v5465_v17, 20.0 }
 0x6ac   :  { %v2467_v51 = vmul.f32 %v3551_v48, %v5260_v18  ;;  %v2327_v22 = vmul.f32 0.03125, %v2299_v8  ;;  %v2540_v61 = vmul.f32 1.442695, %v2521_v14  ;;  %v5473_v24 = vadd.f32 %v5443_v7, %v2484_v42 }
 0x6ad   :  { %3560 = vrsqrt.f32 %v2436_v63 }
 0x6ae   :  { %v2423_v15 = vsel %vm63_vm6, %v2407_v49, %v2327_v22  ;;  %v2376_v56 = vpop.xlane.xlu1 %2375  ;;  %3562 = vpow2.f32 %v2540_v61  ;;  %v2487_v5 = vmul.f32 %v5436_v30, %v2467_v51  ;;  %v2520_v4 = vmin.f32 %v5473_v24, 20.0 }
 0x6af   :  { %v3553_v62 = vpop.eup %3552  ;;  %v2439_v39 = vadd.f32 1e-05, %v2423_v15  ;;  %v2406_v44 = vmul.f32 0.03125, %v2376_v56  ;;  %v2296_v23 = vpop.xlane.xlu0 %2295  ;;  %vm2664_vm13 = vcmp.gt.f32.partialorder %v5473_v24, 20.0 }
 0x6b0   :  { %v2466_v18 = vmul.f32 %v3553_v62, %v5273_v6  ;;  %v2326_v45 = vmul.f32 0.03125, %v2296_v23  ;;  %v5481_v27 = vadd.f32 %v5443_v7, %v2487_v5  ;;  %v2538_v58 = vmul.f32 1.442695, %v2520_v4 }
 0x6b1   :  { %3564 = vrsqrt.f32 %v2439_v39 }
 0x6b2   :  { %v2422_v60 = vsel %vm63_vm6, %v2406_v44, %v2326_v45  ;;  %v2385_v38 = vpop.xlane.xlu1 %2384  ;;  %v2523_v50 = vmin.f32 %v5481_v27, 20.0  ;;  %v2486_v52 = vmul.f32 %v5436_v30, %v2466_v18  ;;  %3566 = vpow2.f32 %v2538_v58 }
 0x6b3   :  { %v3555_v36 = vpop.eup %3554  ;;  %v2438_v33 = vadd.f32 1e-05, %v2422_v60  ;;  %v2409_v54 = vmul.f32 0.03125, %v2385_v38  ;;  %v2305_v25 = vpop.xlane.xlu0 %2304  ;;  %vm2667_vm14 = vcmp.gt.f32.partialorder %v5481_v27, 20.0 }
 0x6b4   :  { %v3557_v6 = vpop.eup %3556  ;;  %v2329_v21 = vmul.f32 0.03125, %v2305_v25  ;;  %v2544_v2 = vmul.f32 1.442695, %v2523_v50  ;;  %v5488_v47 = vadd.f32 %v5443_v7, %v2486_v52  ;;  %v2469_v1 = vmul.f32 %v3555_v36, %v5287_v0 }
 0x6b5   :  { %v3559_v3 = vpop.eup %3558  ;;  %3568 = vrsqrt.f32 %v2438_v33  ;;  %v2567_v29 = vmul.f32 %v3557_v6, %v3557_v6  ;;  %v2583_v53 = vmul.f32 2.0, %v3557_v6  ;;  %v5513_v52 = vrot.slane %v5433_v57, %v918_v34 }
 0x6b6   :  { %v2425_v41 = vsel %vm63_vm6, %v2409_v54, %v2329_v21  ;;  %v2382_v28 = vpop.xlane.xlu1 %2381  ;;  %v2566_v16 = vmul.f32 %v3559_v3, %v3559_v3  ;;  %v2582_v31 = vmul.f32 2.0, %v3559_v3  ;;  %3570 = vpow2.f32 %v2544_v2 }
 0x6b7   :  { %v3561_v55 = vpop.eup %3560  ;;  %v2441_v43 = vadd.f32 1e-05, %v2425_v41  ;;  %v2408_v14 = vmul.f32 0.03125, %v2382_v28  ;;  %v2302_v48 = vpop.xlane.xlu0 %2301  ;;  %v5493_v63 = vadd.f32 %v2583_v53, %v2567_v29  ;;  %v2522_v49 = vmin.f32 %v5488_v47, 20.0 }
 0x6b8   :  { %v3563_v8 = vpop.eup %3562  ;;  %v2468_v0 = vmul.f32 %v3561_v55, %v5300_v20  ;;  %v2328_v42 = vmul.f32 0.03125, %v2302_v48  ;;  %v5497_v51 = vadd.f32 %v2582_v31, %v2566_v16  ;;  %v2489_v44 = vmul.f32 %v5436_v30, %v2469_v1 }
 0x6b9   :  { %3572 = vrsqrt.f32 %v2441_v43  ;;  %v2615_v22 = vadd.f32 2.0, %v5493_v63  ;;  %v2569_v61 = vmul.f32 %v3563_v8, %v3563_v8  ;;  %v2585_v15 = vmul.f32 2.0, %v3563_v8 }
 0x6ba   :  { %v2424_v56 = vsel %vm63_vm6, %v2408_v14, %v2328_v42  ;;  %v2391_v5 = vpop.xlane.xlu1 %2390  ;;  %v2614_v62 = vadd.f32 2.0, %v5497_v51  ;;  %v2542_v39 = vmul.f32 1.442695, %v2522_v49  ;;  %v5507_v60 = vadd.f32 %v5443_v7, %v2489_v44 }
 0x6bb   :  { %v3565_v23 = vpop.eup %3564  ;;  %v2411_v4 = vmul.f32 0.03125, %v2391_v5  ;;  %v2311_v20 = vpop.xlane.xlu0 %2310  ;;  %3574 = vrcp.f32 %v2615_v22  ;;  %v5504_v18 = vadd.f32 %v2585_v15, %v2569_v61  ;;  %v2440_v45 = vadd.f32 1e-05, %v2424_v56 }
 0x6bc   :  { %v2331_v58 = vmul.f32 0.03125, %v2311_v20  ;;  %3576 = vrcp.f32 %v2614_v62  ;;  %v3567_v38 = vpop.eup %3566  ;;  %v2471_v50 = vmul.f32 %v3565_v23, %v5316_v12  ;;  %v2488_v33 = vmul.f32 %v5436_v30, %v2468_v0 }
 0x6bd   :  { %v2617_v36 = vadd.f32 2.0, %v5504_v18  ;;  %v2568_v6 = vmul.f32 %v3567_v38, %v3567_v38  ;;  %v2584_v21 = vmul.f32 2.0, %v3567_v38  ;;  %3578 = vpow2.f32 %v2542_v39 }
 0x6be   :  { %v2427_v54 = vsel %vm63_vm6, %v2411_v4, %v2331_v58  ;;  %v2388_v25 = vpop.xlane.xlu1 %2387  ;;  %v2525_v29 = vmin.f32 %v5507_v60, 20.0  ;;  %v5526_v16 = vrot.slane %v5433_v57, %v938_v46  ;;  %v2491_v46 = vmul.f32 %v5436_v30, %v2471_v50 }
 0x6bf   :  { %v3569_v2 = vpop.eup %3568  ;;  %v2443_v3 = vadd.f32 1e-05, %v2427_v54  ;;  %v2410_v1 = vmul.f32 0.03125, %v2388_v25  ;;  %v2308_v12 = vpop.xlane.xlu0 %2307  ;;  %3580 = vrcp.f32 %v2617_v36  ;;  %v5521_v28 = vadd.f32 %v2584_v21, %v2568_v6 }
 0x6c0   :  { %v3571_v34 = vpop.eup %3570  ;;  %v2470_v53 = vmul.f32 %v3569_v2, %v5327_v32  ;;  %3582 = vrsqrt.f32 %v2440_v45  ;;  %v2330_v41 = vmul.f32 0.03125, %v2308_v12  ;;  %v2548_v43 = vmul.f32 1.442695, %v2525_v29 }
 0x6c1   :  { %v2571_v31 = vmul.f32 %v3571_v34, %v3571_v34  ;;  %v2587_v55 = vmul.f32 2.0, %v3571_v34  ;;  %3584 = vrsqrt.f32 %v2443_v3  ;;  %v2616_v48 = vadd.f32 2.0, %v5521_v28 }
 0x6c2   :  { %v2426_v14 = vsel %vm63_vm6, %v2410_v1, %v2330_v41  ;;  %v5532_v32 = vadd.f32 %v5443_v7, %v2488_v33  ;;  %3586 = vpow2.f32 %v2548_v43  ;;  %v2490_v42 = vmul.f32 %v5436_v30, %v2470_v53 }
 0x6c3   :  { %v3573_v49 = vpop.eup %3572  ;;  %v2442_v8 = vadd.f32 1e-05, %v2426_v14  ;;  %v5534_v0 = vadd.f32 %v2587_v55, %v2571_v31  ;;  %3588 = vrcp.f32 %v2616_v48  ;;  %v5549_v45 = vadd.f32 %v5443_v7, %v2491_v46 }
 0x6c4   :  { %v2524_v57 = vmin.f32 %v5532_v32, 20.0  ;;  %v5545_v4 = vmul.f32 %v3573_v49, %v5344_v10  ;;  %v5555_v36 = vadd.f32 %v5443_v7, %v2490_v42  ;;  %vm2666_vm15 = vcmp.gt.f32.partialorder %v5488_v47, 20.0 }
 0x6c5   :  { %v3575_v22 = vpop.eup %3574  ;;  %3590 = vrsqrt.f32 %v2442_v8  ;;  %v2394_v61 = vpop.xlane.xlu1 %2393  ;;  %v2619_v56 = vadd.f32 2.0, %v5534_v0  ;;  %vm2669_vm0 = vcmp.gt.f32.partialorder %v5507_v60, 20.0  ;;  %vm2668_vm1 = vcmp.gt.f32.partialorder %v5532_v32, 20.0 }
 0x6c6   :  { %v2314_v15 = vpop.xlane.xlu0 %2313  ;;  %v3577_v5 = vpop.eup %3576  ;;  %v2412_v62 = vmul.f32 0.03125, %v2394_v61  ;;  %v2633_v44 = vmul.f32 %v3575_v22, %v5493_v63  ;;  %v2546_v23 = vmul.f32 1.442695, %v2524_v57  ;;  %vm2671_vm2 = vcmp.gt.f32.partialorder %v5549_v45, 20.0 }
 0x6c7   :  { %v2332_v39 = vmul.f32 0.03125, %v2314_v15  ;;  %v2631_v20 = vmul.f32 %v3577_v5, %v5497_v51  ;;  %3592 = vrcp.f32 %v2619_v56  ;;  %v3579_v58 = vpop.eup %3578  ;;  %vm2670_vm3 = vcmp.gt.f32.partialorder %v5555_v36, 20.0 }
 0x6c8   :  { %v2679_v50 = vmul.f32 %v2633_v44, %v5452_v19  ;;  %3594 = vpow2.f32 %v2546_v23  ;;  %v2570_v25 = vmul.f32 %v3579_v58, %v3579_v58  ;;  %v2586_v6 = vmul.f32 2.0, %v3579_v58 }
 0x6c9   :  { %v2428_v38 = vsel %vm63_vm6, %v2412_v62, %v2332_v39  ;;  %v3581_v63 = vpop.eup %3580  ;;  %v2397_v10 = vpop.xlane.xlu1 %2396  ;;  %v2678_v51 = vmul.f32 %v2631_v20, %v5456_v59 }
 0x6ca   :  { %v2444_v33 = vadd.f32 1e-05, %v2428_v38  ;;  %v2317_v54 = vpop.xlane.xlu0 %2316  ;;  %v3583_v21 = vpop.eup %3582  ;;  %v2413_v2 = vmul.f32 0.03125, %v2397_v10  ;;  %v2695_v1 = vsel %vm2663_vm10, %v5452_v19, %v2679_v50  ;;  %v2637_v12 = vmul.f32 %v3581_v63, %v5504_v18 }
 0x6cb   :  { %v2333_v3 = vmul.f32 0.03125, %v2317_v54  ;;  %v2715_v29 = vmul.f32 %v5513_v52, %v2695_v1  ;;  %v2694_v34 = vsel %vm2662_vm11, %v5456_v59, %v2678_v51  ;;  %v5566_v53 = vadd.f32 %v2586_v6, %v2570_v25  ;;  %v3585_v41 = vpop.eup %3584 }
 0x6cc   :  { %3596 = vrsqrt.f32 %v2444_v33  ;;  %v2714_v55 = vmul.f32 %v5513_v52, %v2694_v34  ;;  %v2681_v43 = vmul.f32 %v2637_v12, %v5465_v17  ;;  %v2527_v19 = vmin.f32 %v5549_v45, 20.0  ;;  %v3587_v18 = vpop.eup %3586 }
 0x6cd   :  { %v2429_v31 = vsel %vm63_vm6, %v2413_v2, %v2333_v3  ;;  %v2472_v14 = vmul.f32 %v3583_v21, %v5353_v26  ;;  %v2735_v59 = vadd.f32 %v5526_v16, %v2715_v29  ;;  %v2618_v49 = vadd.f32 2.0, %v5566_v53  ;;  %v3589_v8 = vpop.eup %3588 }
 0x6ce   :  { %v2445_v48 = vadd.f32 1e-05, %v2429_v31  ;;  %v2734_v46 = vadd.f32 %v5526_v16, %v2714_v55  ;;  %v2697_v57 = vsel %vm2665_vm12, %v5465_v17, %v2681_v43  ;;  %v2573_v42 = vmul.f32 %v3587_v18, %v3587_v18 }
 0x6cf   :  { %v2589_v22 = vmul.f32 2.0, %v3587_v18  ;;  %v3591_v61 = vpop.eup %3590  ;;  %v2475_v15 = vmul.f32 %v3585_v41, %v5366_v11  ;;  %v2751_v26 = vsel %vm63_vm6, 0.0, %v2735_v59  ;;  %v2717_v56 = vmul.f32 %v5513_v52, %v2697_v57 }
 0x6d0   :  { %3598 = vrsqrt.f32 %v2445_v48  ;;  %v2769_v5 = vsel %vm499_vm7, %v2751_v26, 0.0  ;;  %v2750_v62 = vsel %vm63_vm6, 0.0, %v2734_v46  ;;  %v2815_v39 = vsel %vm63_vm6, %v2735_v59, 0.0 }
 0x6d1   :  { %v2552_v17 = vmul.f32 1.442695, %v2527_v19  ;;  %v3593_v44 = vpop.eup %3592  ;;  %2770 = vadd.xlane.f32.xlu1 %v2769_v5  ;;  %v2766_v23 = vsel %vm499_vm7, %v2750_v62, 0.0  ;;  %v2814_v11 = vsel %vm63_vm6, %v2734_v46, 0.0  ;;  %v2737_v20 = vadd.f32 %v5526_v16, %v2717_v56 }
 0x6d2   :  { %v2635_v58 = vmul.f32 %v3589_v8, %v5521_v28  ;;  %v3595_v38 = vpop.eup %3594  ;;  %v2474_v50 = vmul.f32 %v3591_v61, %v5379_v13  ;;  %2767 = vadd.xlane.f32.xlu0 %v2766_v23  ;;  %v2641_v63 = vmul.f32 %v3593_v44, %v5534_v0  ;;  %3600 = vrcp.f32 %v2618_v49 }
 0x6d3   :  { %v5598_v33 = vadd.f32 %v2589_v22, %v2573_v42  ;;  %v2833_v10 = vsel %vm499_vm7, %v2815_v39, 0.0  ;;  %v2817_v54 = vsel %vm63_vm6, %v2737_v20, 0.0  ;;  %v2572_v25 = vmul.f32 %v3595_v38, %v3595_v38 }
 0x6d4   :  { %v2680_v51 = vmul.f32 %v2635_v58, %v5473_v24  ;;  %v2830_v6 = vsel %vm499_vm7, %v2814_v11, 0.0  ;;  %v2753_v28 = vsel %vm63_vm6, 0.0, %v2737_v20  ;;  %v2683_v13 = vmul.f32 %v2641_v63, %v5481_v27 }
 0x6d5   :  { %v2621_v0 = vadd.f32 2.0, %v5598_v33  ;;  %2834 = vadd.xlane.f32.xlu1 %v2833_v10  ;;  %v2588_v3 = vmul.f32 2.0, %v3595_v38  ;;  %3602 = vpow2.f32 %v2552_v17  ;;  %v2526_v1 = vmin.f32 %v5555_v36, 20.0 }
 0x6d6   :  { %v3597_v21 = vpop.eup %3596  ;;  %v2696_v2 = vsel %vm2664_vm13, %v5473_v24, %v2680_v51  ;;  %2831 = vadd.xlane.f32.xlu0 %v2830_v6  ;;  %v2839_v12 = vsel %vm499_vm7, %v2817_v54, 0.0  ;;  %v2699_v34 = vsel %vm2667_vm14, %v5481_v27, %v2683_v13  ;;  %v2775_v41 = vsel %vm499_vm7, %v2753_v28, 0.0 }
 0x6d7   :  { %v2716_v29 = vmul.f32 %v5513_v52, %v2696_v2  ;;  %3604 = vrcp.f32 %v2621_v0  ;;  %v2719_v31 = vmul.f32 %v5513_v52, %v2699_v34  ;;  %v5620_v55 = vadd.f32 %v2588_v3, %v2572_v25 }
 0x6d8   :  { %v2550_v24 = vmul.f32 1.442695, %v2526_v1  ;;  %v2476_v43 = vmul.f32 %v3597_v21, %v5398_v35  ;;  %v2493_v18 = vmul.f32 %v5436_v30, %v5545_v4  ;;  %v2492_v48 = vmul.f32 %v5436_v30, %v2472_v14 }
 0x6d9   :  { %v2736_v19 = vadd.f32 %v5526_v16, %v2716_v29  ;;  %2840 = vadd.xlane.f32.xlu1 %v2839_v12  ;;  %v2739_v27 = vadd.f32 %v5526_v16, %v2719_v31  ;;  %v2620_v49 = vadd.f32 2.0, %v5620_v55  ;;  %v2495_v8 = vmul.f32 %v5436_v30, %v2475_v15 }
 0x6da   :  { %v3599_v59 = vpop.eup %3598  ;;  %3606 = vpow2.f32 %v2550_v24  ;;  %2776 = vadd.xlane.f32.xlu0 %v2775_v41  ;;  %v5635_v4 = vadd.f32 %v5443_v7, %v2493_v18  ;;  %v2494_v14 = vmul.f32 %v5436_v30, %v2474_v50  ;;  %v2496_v23 = vmul.f32 %v5436_v30, %v2476_v43 }
 0x6db   :  { %v2816_v35 = vsel %vm63_vm6, %v2736_v19, 0.0  ;;  %v2752_v46 = vsel %vm63_vm6, 0.0, %v2736_v19  ;;  %v2477_v57 = vmul.f32 %v3599_v59, %v5405_v9  ;;  %v2819_v42 = vsel %vm63_vm6, %v2739_v27, 0.0 }
 0x6dc   :  { %v3601_v22 = vpop.eup %3600  ;;  %v2836_v61 = vsel %vm499_vm7, %v2816_v35, 0.0  ;;  %v2772_v15 = vsel %vm499_vm7, %v2752_v46, 0.0  ;;  %3608 = vrcp.f32 %v2620_v49  ;;  %v2529_v26 = vmin.f32 %v5635_v4, 20.0 }
 0x6dd   :  { %2837 = vadd.xlane.f32.xlu1 %v2836_v61  ;;  %v2755_v56 = vsel %vm63_vm6, 0.0, %v2739_v27  ;;  %v2639_v5 = vmul.f32 %v3601_v22, %v5566_v53  ;;  %v5649_v9 = vadd.f32 %v5443_v7, %v2492_v48  ;;  %v5652_v62 = vadd.f32 %v5443_v7, %v2495_v8 }
 0x6de   :  { %2773 = vadd.xlane.f32.xlu0 %v2772_v15  ;;  %v2845_v39 = vsel %vm499_vm7, %v2819_v42, 0.0  ;;  %v2556_v17 = vmul.f32 1.442695, %v2529_v26  ;;  %v5656_v44 = vadd.f32 %v5443_v7, %v2494_v14  ;;  %v2497_v38 = vmul.f32 %v5436_v30, %v2477_v57 }
 0x6df   :  { %v3603_v11 = vpop.eup %3602  ;;  %v2682_v20 = vmul.f32 %v2639_v5, %v5488_v47  ;;  %v2528_v53 = vmin.f32 %v5649_v9, 20.0  ;;  %v2531_v58 = vmin.f32 %v5652_v62, 20.0  ;;  %v2781_v63 = vsel %vm499_vm7, %v2755_v56, 0.0 }
 0x6e0   :  { %v2575_v10 = vmul.f32 %v3603_v11, %v3603_v11  ;;  %v2591_v54 = vmul.f32 2.0, %v3603_v11  ;;  %3610 = vpow2.f32 %v2556_v17  ;;  %v2530_v0 = vmin.f32 %v5656_v44, 20.0 }
 0x6e1   :  { %v3605_v50 = vpop.eup %3604  ;;  %2846 = vadd.xlane.f32.xlu1 %v2845_v39  ;;  %v2698_v51 = vsel %vm2666_vm15, %v5488_v47, %v2682_v20  ;;  %v2554_v6 = vmul.f32 1.442695, %v2528_v53  ;;  %v2560_v28 = vmul.f32 1.442695, %v2531_v58  ;;  %v5673_v3 = vadd.f32 %v5443_v7, %v2496_v23 }
 0x6e2   :  { %v2645_v25 = vmul.f32 %v3605_v50, %v5598_v33  ;;  %2782 = vadd.xlane.f32.xlu0 %v2781_v63  ;;  %v2718_v13 = vmul.f32 %v5513_v52, %v2698_v51  ;;  %v2607_v30 = vadd.f32 %v2591_v54, %v2575_v10  ;;  %v5676_v47 = vadd.f32 %v5443_v7, %v2497_v38 }
 0x6e3   :  { %3612 = vpow2.f32 %v2554_v6  ;;  %v2558_v41 = vmul.f32 1.442695, %v2530_v0  ;;  %v2532_v31 = vmin.f32 %v5673_v3, 20.0  ;;  %vm2673_vm4 = vcmp.gt.f32.partialorder %v5635_v4, 20.0 }
 0x6e4   :  { %v3607_v21 = vpop.eup %3606  ;;  %v2685_v2 = vmul.f32 %v2645_v25, %v5507_v60  ;;  %v2738_v33 = vadd.f32 %v5526_v16, %v2718_v13  ;;  %v2623_v1 = vadd.f32 2.0, %v2607_v30  ;;  %3614 = vpow2.f32 %v2560_v28 }
 0x6e5   :  { %v2574_v12 = vmul.f32 %v3607_v21, %v3607_v21  ;;  %v2590_v29 = vmul.f32 2.0, %v3607_v21  ;;  %v2562_v49 = vmul.f32 1.442695, %v2532_v31  ;;  %v2533_v46 = vmin.f32 %v5676_v47, 20.0 }
 0x6e6   :  { %v2701_v34 = vsel %vm2669_vm0, %v5507_v60, %v2685_v2  ;;  %v3609_v24 = vpop.eup %3608  ;;  %v2818_v43 = vsel %vm63_vm6, %v2738_v33, 0.0  ;;  %v2754_v19 = vsel %vm63_vm6, 0.0, %v2738_v33  ;;  %3616 = vrcp.f32 %v2623_v1 }
 0x6e7   :  { %v2721_v7 = vmul.f32 %v5513_v52, %v2701_v34  ;;  %v2842_v18 = vsel %vm499_vm7, %v2818_v43, 0.0  ;;  %v2778_v48 = vsel %vm499_vm7, %v2754_v19, 0.0  ;;  %v2643_v60 = vmul.f32 %v3609_v24, %v5620_v55 }
 0x6e8   :  { %v2606_v59 = vadd.f32 %v2590_v29, %v2574_v12  ;;  %2843 = vadd.xlane.f32.xlu1 %v2842_v18  ;;  %2779 = vadd.xlane.f32.xlu0 %v2778_v48  ;;  %3618 = vpow2.f32 %v2558_v41  ;;  %v2564_v5 = vmul.f32 1.442695, %v2533_v46  ;;  %vm2672_vm5 = vcmp.gt.f32.partialorder %v5649_v9, 20.0 }
 0x6e9   :  { %v2741_v27 = vadd.f32 %v5526_v16, %v2721_v7  ;;  %v2684_v8 = vmul.f32 %v2643_v60, %v5532_v32  ;;  %3620 = vpow2.f32 %v2562_v49  ;;  %vm2675_vm8 = vcmp.gt.f32.partialorder %v5652_v62, 20.0 }
 0x6ea   :  { %v2622_v35 = vadd.f32 2.0, %v2606_v59  ;;  %v3611_v14 = vpop.eup %3610  ;;  %vm2674_vm9 = vcmp.gt.f32.partialorder %v5656_v44, 20.0  ;;  %vm2676_vm10 = vcmp.gt.f32.partialorder %v5673_v3, 20.0  ;;  %vm2677_vm11 = vcmp.gt.f32.partialorder %v5676_v47, 20.0 }
 0x6eb   :  { %v2821_v57 = vsel %vm63_vm6, %v2741_v27, 0.0  ;;  %v2757_v42 = vsel %vm63_vm6, 0.0, %v2741_v27  ;;  %v2700_v61 = vsel %vm2668_vm1, %v5532_v32, %v2684_v8  ;;  %v2577_v26 = vmul.f32 %v3611_v14, %v3611_v14 }
 0x6ec   :  { %v2851_v55 = vsel %vm499_vm7, %v2821_v57, 0.0  ;;  %v2787_v22 = vsel %vm499_vm7, %v2757_v42, 0.0  ;;  %3622 = vrcp.f32 %v2622_v35  ;;  %v2720_v15 = vmul.f32 %v5513_v52, %v2700_v61 }
 0x6ed   :  { %2852 = vadd.xlane.f32.xlu1 %v2851_v55  ;;  %2788 = vadd.xlane.f32.xlu0 %v2787_v22  ;;  %v2593_v56 = vmul.f32 2.0, %v3611_v14  ;;  %v3613_v39 = vpop.eup %3612  ;;  %3624 = vpow2.f32 %v2564_v5  ;;  %vm2933_vm12 = vcmask 261312   ;;  %vm2940_vm13 = vcmask 326912  }
 0x6ee   :  { %v2740_v17 = vadd.f32 %v5526_v16, %v2720_v15  ;;  %v2576_v11 = vmul.f32 %v3613_v39, %v3613_v39  ;;  %v2592_v20 = vmul.f32 2.0, %v3613_v39  ;;  %v3615_v53 = vpop.eup %3614  ;;  %vm2947_vm14 = vcmask 392512  }
 0x6ef   :  { %v2609_v23 = vadd.f32 %v2593_v56, %v2577_v26  ;;  %v2579_v25 = vmul.f32 %v3615_v53, %v3615_v53  ;;  %v2595_v13 = vmul.f32 2.0, %v3615_v53  ;;  %vm2954_vm15 = vcmask 458112  }
 0x6f0   :  { %v3617_v58 = vpop.eup %3616  ;;  %v2820_v32 = vsel %vm63_vm6, %v2740_v17, 0.0  ;;  %v2756_v38 = vsel %vm63_vm6, 0.0, %v2740_v17  ;;  %v2608_v63 = vadd.f32 %v2592_v20, %v2576_v11  ;;  %vm2961_vm0 = vcmask 523712  }
 0x6f1   :  { %v2625_v50 = vadd.f32 2.0, %v2609_v23  ;;  %v2848_v10 = vsel %vm499_vm7, %v2820_v32, 0.0  ;;  %v2784_v54 = vsel %vm499_vm7, %v2756_v38, 0.0  ;;  %v2649_v51 = vmul.f32 %v3617_v58, %v2607_v30 }
 0x6f2   :  { %v3619_v6 = vpop.eup %3618  ;;  %2849 = vadd.xlane.f32.xlu1 %v2848_v10  ;;  %2785 = vadd.xlane.f32.xlu0 %v2784_v54  ;;  %v2624_v28 = vadd.f32 2.0, %v2608_v63  ;;  %v2611_v1 = vadd.f32 %v2595_v13, %v2579_v25  ;;  %vm2968_vm1 = vcmask 589312  }
 0x6f3   :  { %3626 = vrcp.f32 %v2625_v50  ;;  %v2687_v0 = vmul.f32 %v2649_v51, %v5549_v45  ;;  %v2578_v21 = vmul.f32 %v3619_v6, %v3619_v6  ;;  %v2594_v2 = vmul.f32 2.0, %v3619_v6  ;;  %v3621_v33 = vpop.eup %3620 }
 0x6f4   :  { %3628 = vrcp.f32 %v2624_v28  ;;  %v2580_v34 = vmul.f32 %v3621_v33, %v3621_v33  ;;  %v2596_v41 = vmul.f32 2.0, %v3621_v33  ;;  %v2627_v43 = vadd.f32 2.0, %v2611_v1 }
 0x6f5   :  { %v2703_v29 = vsel %vm2671_vm2, %v5549_v45, %v2687_v0  ;;  %v2610_v30 = vadd.f32 %v2594_v2, %v2578_v21  ;;  %vm2975_vm2 = vcmask 654912  }
 0x6f6   :  { %v3623_v12 = vpop.eup %3622  ;;  %v2723_v31 = vmul.f32 %v5513_v52, %v2703_v29  ;;  %v2612_v7 = vadd.f32 %v2596_v41, %v2580_v34  ;;  %3630 = vrcp.f32 %v2627_v43 }
 0x6f7   :  { %v2647_v24 = vmul.f32 %v3623_v12, %v2606_v59  ;;  %v2626_v19 = vadd.f32 2.0, %v2610_v30  ;;  %v3625_v60 = vpop.eup %3624 }
 0x6f8   :  { %v2743_v18 = vadd.f32 %v5526_v16, %v2723_v31  ;;  %v2628_v27 = vadd.f32 2.0, %v2612_v7  ;;  %v2581_v8 = vmul.f32 %v3625_v60, %v3625_v60  ;;  %v2597_v42 = vmul.f32 2.0, %v3625_v60 }
 0x6f9   :  { %v2686_v48 = vmul.f32 %v2647_v24, %v5555_v36  ;;  %3632 = vrcp.f32 %v2626_v19 }
 0x6fa   :  { %v2823_v45 = vsel %vm63_vm6, %v2743_v18, 0.0  ;;  %v2759_v49 = vsel %vm63_vm6, 0.0, %v2743_v18  ;;  %3634 = vrcp.f32 %v2628_v27  ;;  %v2613_v15 = vadd.f32 %v2597_v42, %v2581_v8 }
 0x6fb   :  { %v2702_v59 = vsel %vm2670_vm3, %v5555_v36, %v2686_v48  ;;  %v2857_v35 = vsel %vm499_vm7, %v2823_v45, 0.0  ;;  %v2793_v46 = vsel %vm499_vm7, %v2759_v49, 0.0  ;;  %vm2982_vm3 = vcmask 720512  }
 0x6fc   :  { %v2722_v14 = vmul.f32 %v5513_v52, %v2702_v59  ;;  %2858 = vadd.xlane.f32.xlu1 %v2857_v35  ;;  %2794 = vadd.xlane.f32.xlu0 %v2793_v46  ;;  %v2629_v11 = vadd.f32 2.0, %v2613_v15 }
 0x6fd   :  { %v3627_v57 = vpop.eup %3626 }
 0x6fe   :  { %v2742_v55 = vadd.f32 %v5526_v16, %v2722_v14  ;;  %v2653_v22 = vmul.f32 %v3627_v57, %v2609_v23  ;;  %v3629_v61 = vpop.eup %3628  ;;  %3636 = vrcp.f32 %v2629_v11 }
 0x6ff   :  { %v2651_v5 = vmul.f32 %v3629_v61, %v2608_v63 }
 0x700   :  { %v2822_v36 = vsel %vm63_vm6, %v2742_v55, 0.0  ;;  %v2758_v26 = vsel %vm63_vm6, 0.0, %v2742_v55  ;;  %v2689_v56 = vmul.f32 %v2653_v22, %v5635_v4  ;;  %v3631_v53 = vpop.eup %3630 }
 0x701   :  { %v2854_v39 = vsel %vm499_vm7, %v2822_v36, 0.0  ;;  %v2790_v17 = vsel %vm499_vm7, %v2758_v26, 0.0  ;;  %v2688_v20 = vmul.f32 %v2651_v5, %v5649_v9  ;;  %v2657_v50 = vmul.f32 %v3631_v53, %v2611_v1 }
 0x702   :  { %2855 = vadd.xlane.f32.xlu1 %v2854_v39  ;;  %2791 = vadd.xlane.f32.xlu0 %v2790_v17  ;;  %v2705_v23 = vsel %vm2673_vm4, %v5635_v4, %v2689_v56  ;;  %vm2989_vm4 = vcmask 786112  }
 0x703   :  { %v2725_v58 = vmul.f32 %v5513_v52, %v2705_v23  ;;  %v3633_v32 = vpop.eup %3632  ;;  %v2704_v38 = vsel %vm2672_vm5, %v5649_v9, %v2688_v20  ;;  %v2691_v4 = vmul.f32 %v2657_v50, %v5652_v62  ;;  %vm2996_vm5 = vcmask 851712  }
 0x704   :  { %v2724_v10 = vmul.f32 %v5513_v52, %v2704_v38  ;;  %v2655_v54 = vmul.f32 %v3633_v32, %v2610_v30  ;;  %v3635_v51 = vpop.eup %3634 }
 0x705   :  { %v2745_v63 = vadd.f32 %v5526_v16, %v2725_v58  ;;  %v2707_v21 = vsel %vm2675_vm8, %v5652_v62, %v2691_v4  ;;  %v2659_v2 = vmul.f32 %v3635_v51, %v2612_v7  ;;  %v2921_v51 = vadd.s32 4294967280, %v3851_v40 }
 0x706   :  { %v2744_v9 = vadd.f32 %v5526_v16, %v2724_v10  ;;  %v2690_v28 = vmul.f32 %v2655_v54, %v5656_v44  ;;  %v2727_v12 = vmul.f32 %v5513_v52, %v2707_v21  ;;  %v2914_v54 = vadd.s32 4294967288, %v3851_v40 }
 0x707   :  { %v2825_v25 = vsel %vm63_vm6, %v2745_v63, 0.0  ;;  %v2761_v6 = vsel %vm63_vm6, 0.0, %v2745_v63  ;;  %v2692_v34 = vmul.f32 %v2659_v2, %v5673_v3  ;;  %v2935_v2 = vadd.s32 4294967264, %v3851_v40 }
 0x708   :  { %v2863_v13 = vsel %vm499_vm7, %v2825_v25, 0.0  ;;  %v2799_v0 = vsel %vm499_vm7, %v2761_v6, 0.0  ;;  %v2824_v33 = vsel %vm63_vm6, %v2744_v9, 0.0  ;;  %v2760_v1 = vsel %vm63_vm6, 0.0, %v2744_v9  ;;  %v3637_v43 = vpop.eup %3636 }
 0x709   :  { %2864 = vadd.xlane.f32.xlu1 %v2863_v13  ;;  %2800 = vadd.xlane.f32.xlu0 %v2799_v0  ;;  %v2706_v29 = vsel %vm2674_vm9, %v5656_v44, %v2690_v28  ;;  %v2747_v41 = vadd.f32 %v5526_v16, %v2727_v12  ;;  %v2860_v62 = vsel %vm499_vm7, %v2824_v33, 0.0  ;;  %v2796_v31 = vsel %vm499_vm7, %v2760_v1, 0.0 }
 0x70a   :  { %v2726_v30 = vmul.f32 %v5513_v52, %v2706_v29  ;;  %v2708_v24 = vsel %vm2676_vm10, %v5673_v3, %v2692_v34  ;;  %v2661_v48 = vmul.f32 %v3637_v43, %v2613_v15  ;;  %v2917_v6 = vsub.s32 %v2914_v54, %v3843_v37 }
 0x70b   :  { %v2827_v44 = vsel %vm63_vm6, %v2747_v41, 0.0  ;;  %v2763_v19 = vsel %vm63_vm6, 0.0, %v2747_v41  ;;  %v2728_v18 = vmul.f32 %v5513_v52, %v2708_v24  ;;  %v2912_v28 = vsub.s32 %v3851_v40, %v3843_v37 }
 0x70c   :  { %v2746_v7 = vadd.f32 %v5526_v16, %v2726_v30  ;;  %v2869_v60 = vsel %vm499_vm7, %v2827_v44, 0.0  ;;  %v2805_v27 = vsel %vm499_vm7, %v2763_v19, 0.0  ;;  %v2693_v59 = vmul.f32 %v2661_v48, %v5676_v47 }
 0x70d   :  { %2861 = vadd.xlane.f32.xlu1 %v2860_v62  ;;  %2797 = vadd.xlane.f32.xlu0 %v2796_v31  ;;  %v2748_v49 = vadd.f32 %v5526_v16, %v2728_v18  ;;  %v2924_v0 = vsub.s32 %v2921_v51, %v3843_v37  ;;  %v2928_v33 = vadd.s32 4294967272, %v3851_v40  ;;  %v2949_v34 = vadd.s32 4294967248, %v3851_v40 }
 0x70e   :  { %v2826_v3 = vsel %vm63_vm6, %v2746_v7, 0.0  ;;  %v2762_v45 = vsel %vm63_vm6, 0.0, %v2746_v7  ;;  %v2709_v8 = vsel %vm2677_vm11, %v5676_v47, %v2693_v59  ;;  %v2938_v62 = vsub.s32 %v2935_v2, %v3843_v37 }
 0x70f   :  { %v2866_v35 = vsel %vm499_vm7, %v2826_v3, 0.0  ;;  %v2802_v46 = vsel %vm499_vm7, %v2762_v45, 0.0  ;;  %v2729_v14 = vmul.f32 %v5513_v52, %v2709_v8  ;;  %v2828_v57 = vsel %vm63_vm6, %v2748_v49, 0.0 }
 0x710   :  { %v2764_v42 = vsel %vm63_vm6, 0.0, %v2748_v49  ;;  %v2872_v22 = vsel %vm499_vm7, %v2828_v57, 0.0  ;;  %v2931_v24 = vsub.s32 %v2928_v33, %v3843_v37  ;;  %v2942_v44 = vadd.s32 4294967256, %v3851_v40 }
 0x711   :  { %2870 = vadd.xlane.f32.xlu1 %v2869_v60  ;;  %2806 = vadd.xlane.f32.xlu0 %v2805_v27  ;;  %v2749_v55 = vadd.f32 %v5526_v16, %v2729_v14  ;;  %v2808_v47 = vsel %vm499_vm7, %v2764_v42, 0.0  ;;  %v2956_v7 = vadd.s32 4294967240, %v3851_v40  ;;  %v2952_v18 = vsub.s32 %v2949_v34, %v3843_v37 }
 0x712   :  { %v2963_v3 = vadd.s32 4294967232, %v3851_v40  ;;  %v2945_v8 = vsub.s32 %v2942_v44, %v3843_v37  ;;  %v2977_v57 = vadd.s32 4294967216, %v3851_v40  ;;  %v3012_v33 = vadd.s32 4294967176, %v3851_v40 }
 0x713   :  { %v2829_v61 = vsel %vm63_vm6, %v2749_v55, 0.0  ;;  %v2765_v52 = vsel %vm63_vm6, 0.0, %v2749_v55  ;;  %vm2919_vm6 = vcmask 130112   ;;  %v2959_v14 = vsub.s32 %v2956_v7, %v3843_v37 }
 0x714   :  { %v2875_v15 = vsel %vm499_vm7, %v2829_v61, 0.0  ;;  %v2811_v36 = vsel %vm499_vm7, %v2765_v52, 0.0  ;;  %vm2926_vm7 = vcmask 195712   ;;  %vm3003_vm8 = vcmask 917312  }
 0x715   :  { %2867 = vadd.xlane.f32.xlu1 %v2866_v35  ;;  %2803 = vadd.xlane.f32.xlu0 %v2802_v46  ;;  %vm3010_vm9 = vcmask 982912   ;;  %vm3017_vm10 = vcmask 1048512  }
 0x719   :  { %2873 = vadd.xlane.f32.xlu1 %v2872_v22  ;;  %2809 = vadd.xlane.f32.xlu0 %v2808_v47  ;;  %v2966_v22 = vsub.s32 %v2963_v3, %v3843_v37 }
 0x71d   :  { %2876 = vadd.xlane.f32.xlu1 %v2875_v15  ;;  %2812 = vadd.xlane.f32.xlu0 %v2811_v36 }
 0x75e   :  { %v2771_v26 = vpop.xlane.xlu1 %2770 }
 0x75f   :  { %v2768_v16 = vpop.xlane.xlu0 %2767 }
 0x762   :  { %v2835_v56 = vpop.xlane.xlu1 %2834 }
 0x763   :  { %v2832_v5 = vpop.xlane.xlu0 %2831  ;;  %v2879_v9 = vmin.f32 %v2771_v26, %v2835_v56  ;;  %v2970_v26 = vadd.s32 4294967224, %v3851_v40  ;;  %v2984_v56 = vadd.s32 4294967208, %v3851_v40 }
 0x764   :  { %v2878_v13 = vmin.f32 %v2768_v16, %v2832_v5  ;;  %v2980_v5 = vsub.s32 %v2977_v57, %v3843_v37 }
 0x765   :  { %v2918_v29 = vrot.slane %v2879_v9, %v2917_v6 }
 0x766   :  { %v2841_v39 = vpop.xlane.xlu1 %2840  ;;  %v2913_v30 = vrot.slane %v2878_v13, %v2912_v28  ;;  %v3005_v13 = vadd.s32 4294967184, %v3851_v40 }
 0x767   :  { %v2777_v17 = vpop.xlane.xlu0 %2776 }
 0x768   :  { %v2881_v43 = vmin.f32 %v2777_v17, %v2841_v39  ;;  %v2920_v19 = vsel %vm2919_vm6, %v2918_v29, %v2913_v30  ;;  %v3008_v30 = vsub.s32 %v3005_v13, %v3843_v37 }
 0x76a   :  { %v2838_v11 = vpop.xlane.xlu1 %2837  ;;  %v2932_v59 = vrot.slane %v2881_v43, %v2931_v24  ;;  %v3015_v43 = vsub.s32 %v3012_v33, %v3843_v37 }
 0x76b   :  { %v2774_v23 = vpop.xlane.xlu0 %2773 }
 0x76c   :  { %v2880_v21 = vmin.f32 %v2774_v23, %v2838_v11 }
 0x76e   :  { %v2847_v20 = vpop.xlane.xlu1 %2846  ;;  %v2925_v41 = vrot.slane %v2880_v21, %v2924_v0 }
 0x76f   :  { %v2783_v53 = vpop.xlane.xlu0 %2782 }
 0x770   :  { %v2927_v48 = vsel %vm2926_vm7, %v2925_v41, %v2920_v19  ;;  %v2883_v35 = vmin.f32 %v2783_v53, %v2847_v20  ;;  %v2991_v53 = vadd.s32 4294967200, %v3851_v40 }
 0x771   :  { %v2934_v46 = vsel %vm2933_vm12, %v2932_v59, %v2927_v48 }
 0x772   :  { %v2946_v15 = vrot.slane %v2883_v35, %v2945_v8  ;;  %v2994_v9 = vsub.s32 %v2991_v53, %v3843_v37 }
 0x775   :  { %v2844_v58 = vpop.xlane.xlu1 %2843  ;;  %v2780_v32 = vpop.xlane.xlu0 %2779 }
 0x776   :  { %v2882_v31 = vmin.f32 %v2780_v32, %v2844_v58  ;;  %v2973_v32 = vsub.s32 %v2970_v26, %v3843_v37 }
 0x778   :  { %v2939_v60 = vrot.slane %v2882_v31, %v2938_v62 }
 0x77a   :  { %v5796_v38 = vpop.xlane.xlu1 %2852  ;;  %v5798_v50 = vpop.xlane.xlu0 %2788  ;;  %v2941_v42 = vsel %vm2940_vm13, %v2939_v60, %v2934_v46 }
 0x77b   :  { %v2885_v36 = vmin.f32 %v5798_v50, %v5796_v38  ;;  %v2948_v16 = vsel %vm2947_vm14, %v2946_v15, %v2941_v42 }
 0x77d   :  { %v2960_v58 = vrot.slane %v2885_v36, %v2959_v14 }
 0x77f   :  { %v2850_v63 = vpop.xlane.xlu1 %2849  ;;  %v2786_v10 = vpop.xlane.xlu0 %2785 }
 0x780   :  { %v2884_v27 = vmin.f32 %v2786_v10, %v2850_v63  ;;  %v2987_v63 = vsub.s32 %v2984_v56, %v3843_v37  ;;  %v2998_v10 = vadd.s32 4294967192, %v3851_v40 }
 0x782   :  { %v2953_v55 = vrot.slane %v2884_v27, %v2952_v18 }
 0x784   :  { %v2955_v39 = vsel %vm2954_vm15, %v2953_v55, %v2948_v16 }
 0x785   :  { %v2962_v50 = vsel %vm2961_vm0, %v2960_v58, %v2955_v39 }
 0x789   :  { %v5802_v4 = vpop.xlane.xlu1 %2858  ;;  %v5804_v25 = vpop.xlane.xlu0 %2794 }
 0x78a   :  { %v2887_v38 = vmin.f32 %v5804_v25, %v5802_v4  ;;  %v3001_v25 = vsub.s32 %v2998_v10, %v3843_v37 }
 0x78c   :  { %v2974_v0 = vrot.slane %v2887_v38, %v2973_v32 }
 0x78f   :  { %v2856_v1 = vpop.xlane.xlu1 %2855  ;;  %v2792_v12 = vpop.xlane.xlu0 %2791 }
 0x790   :  { %v2886_v47 = vmin.f32 %v2792_v12, %v2856_v1 }
 0x792   :  { %v2967_v17 = vrot.slane %v2886_v47, %v2966_v22 }
 0x794   :  { %v2969_v54 = vsel %vm2968_vm1, %v2967_v17, %v2962_v50 }
 0x795   :  { %v2976_v4 = vsel %vm2975_vm2, %v2974_v0, %v2969_v54 }
 0x796   :  { %v2865_v45 = vpop.xlane.xlu1 %2864  ;;  %v2801_v49 = vpop.xlane.xlu0 %2800 }
 0x797   :  { %v2889_v21 = vmin.f32 %v2801_v49, %v2865_v45 }
 0x799   :  { %v2988_v41 = vrot.slane %v2889_v21, %v2987_v63 }
 0x79a   :  { %v2862_v61 = vpop.xlane.xlu1 %2861  ;;  %v2798_v52 = vpop.xlane.xlu0 %2797 }
 0x79b   :  { %v2888_v11 = vmin.f32 %v2798_v52, %v2862_v61 }
 0x79d   :  { %v2981_v51 = vrot.slane %v2888_v11, %v2980_v5 }
 0x79e   :  { %v2871_v23 = vpop.xlane.xlu1 %2870  ;;  %v2807_v20 = vpop.xlane.xlu0 %2806 }
 0x79f   :  { %v2983_v1 = vsel %vm2982_vm3, %v2981_v51, %v2976_v4  ;;  %v2891_v62 = vmin.f32 %v2807_v20, %v2871_v23 }
 0x7a0   :  { %v2990_v24 = vsel %vm2989_vm4, %v2988_v41, %v2983_v1 }
 0x7a1   :  { %v3002_v40 = vrot.slane %v2891_v62, %v3001_v25 }
 0x7a2   :  { %v2868_v6 = vpop.xlane.xlu1 %2867  ;;  %v2804_v28 = vpop.xlane.xlu0 %2803 }
 0x7a3   :  { %v2890_v2 = vmin.f32 %v2804_v28, %v2868_v6 }
 0x7a5   :  { %v2995_v12 = vrot.slane %v2890_v2, %v2994_v9 }
 0x7a6   :  { %v2874_v29 = vpop.xlane.xlu1 %2873  ;;  %v2810_v34 = vpop.xlane.xlu0 %2809 }
 0x7a7   :  { %v2892_v31 = vmin.f32 %v2810_v34, %v2874_v29  ;;  %v2997_v44 = vsel %vm2996_vm5, %v2995_v12, %v2990_v24 }
 0x7a8   :  { %v3004_v27 = vsel %vm3003_vm8, %v3002_v40, %v2997_v44 }
 0x7a9   :  { %v3009_v19 = vrot.slane %v2892_v31, %v3008_v30 }
 0x7aa   :  { %v2877_v7 = vpop.xlane.xlu1 %2876  ;;  %v2813_v18 = vpop.xlane.xlu0 %2812 }
 0x7ab   :  { %v2893_v48 = vmin.f32 %v2813_v18, %v2877_v7  ;;  %v3011_v3 = vsel %vm3010_vm9, %v3009_v19, %v3004_v27 }
 0x7ad   :  { %v3016_v60 = vrot.slane %v2893_v48, %v3015_v43 }
 0x7af   :  { %v3018_v45 = vsel %vm3017_vm10, %v3016_v60, %v3011_v3 }
 0x7b0   :  { %3020 = vst [vmem:[#allocation2] sm:$0x1] %v3018_v45 }
 0x7b1   :  { %3651 = shalt.err (!%p3648_p4)
}
 0x7b2   :  { %s3652_s9 = scalar_lea.hbm %s5859_s7, 16 }
 0x7b3   :  { %p3653_p5 = scmp.ne.s32.totalorder %s5859_s7, %s3652_s9  ;;  %p3656_p6 = scmp.lt.u32.totalorder %s3652_s9, %s5859_s7 }
 0x7b5   :  { %p3658_p7 = pnand %p3656_p6, %p3653_p5 }
 0x7b7   :  { %3661 = shalt.err (!%p3658_p7)
}
 0x7b8   :  { %3030 = dma.vmem_to_hbm [thread:$0]  %s3028_s27, 16, %s5859_s7, [#allocation3]  }
 0x7b9   :  { %3662 = dma.done.wait [#allocation3], 16  }
 0x7ba   :  { %3663 = vsyncadd [#allocation3], 4294967280 }
 0x7bb   :  { %3034 = vsyncpa [#allocation3], 1 }

</bundles_post_ra>
